<compile_context>
chip_gen: v7x
topology: tpu7x:2x2x1
jax: 0.10.0
libtpu: 0.0.40
codegen_flags: <defaults>
</compile_context>

<pallas_src>
import jax
import jax.numpy as jnp
from jax import lax
from jax.experimental import pallas as pl
from jax.experimental.pallas import tpu as pltpu


# ----------------------------- fused model kernel -----------------------------
def _make_fused_gru_model_kernel(L, T, B, D, H, O):
    TB = T * B
    H2 = 2 * H
    # Full unroll only for small T; cap otherwise (i-cache / live-range blowup).
    UNROLL = T if T <= 8 else 4

    def kernel(*refs):
        x_ref = refs[0]
        layer_refs = [refs[1 + 4 * l: 5 + 4 * l] for l in range(L)]
        lng_ref, lnb_ref, fcw_ref, fcb_ref = refs[1 + 4 * L: 5 + 4 * L]
        o_ref = refs[5 + 4 * L]
        act_scr = refs[6 + 4 * L]    # (2, TB, H)  direction-major layer output
        gi_scr = refs[7 + 4 * L]     # (2, TB, 3H) per-direction gate pre-acts

        def prologue(x_vals, wih_ref, bih_ref):
            # Gate-fused input->hidden matmul for ALL T*B rows at once:
            # one (TB, Dc)@(Dc, 3H) dot per (direction, input stream).
            for d in range(2):
                acc = jnp.dot(x_vals[0], wih_ref[d, 0],
                              preferred_element_type=jnp.float32)
                for s in range(1, len(x_vals)):
                    acc = acc + jnp.dot(x_vals[s], wih_ref[d, s],
                                        preferred_element_type=jnp.float32)
                gi_scr[d] = acc + bih_ref[d]

        def gru_cell(gi, gh, h):
            # gi, gh: (B, 3H) with lanes [r | z | n]; h: (B, H)
            r = jax.nn.sigmoid(gi[:, :H] + gh[:, :H])
            z = jax.nn.sigmoid(gi[:, H:H2] + gh[:, H:H2])
            n = jnp.tanh(gi[:, H2:] + r * gh[:, H2:])
            return (1.0 - z) * n + z * h

        # ----------- layers 0 .. L-2 : full bidirectional sequence output -----
        for l in range(L - 1):
            wih_ref, whh_ref, bih_ref, bhh_ref = layer_refs[l]
            x_vals = [x_ref[...]] if l == 0 else [act_scr[0], act_scr[1]]
            prologue(x_vals, wih_ref, bih_ref)

            whh_f, whh_b = whh_ref[0], whh_ref[1]     # hoisted (H, 3H) weights
            bhh_f, bhh_b = bhh_ref[0], bhh_ref[1]

            def step(t, carry, whh_f=whh_f, whh_b=whh_b,
                     bhh_f=bhh_f, bhh_b=bhh_b):
                h_f, h_b = carry          # hidden states live in vregs
                row_f = pl.multiple_of(t * B, B)
                row_b = pl.multiple_of((T - 1 - t) * B, B)
                # ONE gate-fused (B,H)@(H,3H) matmul per direction per step.
                gh_f = jnp.dot(h_f, whh_f,
                               preferred_element_type=jnp.float32) + bhh_f
                gh_b = jnp.dot(h_b, whh_b,
                               preferred_element_type=jnp.float32) + bhh_b
                h_f = gru_cell(gi_scr[0, pl.ds(row_f, B), :], gh_f, h_f)
                h_b = gru_cell(gi_scr[1, pl.ds(row_b, B), :], gh_b, h_b)
                act_scr[0, pl.ds(row_f, B), :] = h_f
                act_scr[1, pl.ds(row_b, B), :] = h_b
                return (h_f, h_b)

            h0 = jnp.zeros((B, H), jnp.float32)
            lax.fori_loop(0, T, step, (h0, h0), unroll=UNROLL)

        # -------- last layer: only what out[:, -1, :] needs + fused head ------
        wih_ref, whh_ref, bih_ref, bhh_ref = layer_refs[L - 1]
        x_vals = [x_ref[...]] if L == 1 else [act_scr[0], act_scr[1]]
        prologue(x_vals, wih_ref, bih_ref)

        whh_f, bhh_f, bhh_b = whh_ref[0], bhh_ref[0], bhh_ref[1]

        def fwd_step(t, h, whh_f=whh_f, bhh_f=bhh_f):
            row = pl.multiple_of(t * B, B)
            gh = jnp.dot(h, whh_f, preferred_element_type=jnp.float32) + bhh_f
            return gru_cell(gi_scr[0, pl.ds(row, B), :], gh, h)

        h_f = lax.fori_loop(0, T, fwd_step, jnp.zeros((B, H), jnp.float32),
                            unroll=UNROLL)

        # Backward direction: out[:, -1, :] only needs its FIRST step (t = T-1).
        # Valid ONLY because the initial hidden state is zero: gh = b_hh, z*h0 = 0.
        gi_b = gi_scr[1, pl.ds((T - 1) * B, B), :]
        h_b = gru_cell(gi_b, bhh_b, jnp.zeros((B, H), jnp.float32))

        # LayerNorm over the 2H-wide concat([h_f, h_b]), kept as split halves.
        inv_feat = 1.0 / (2.0 * H)
        mean = (jnp.sum(h_f, axis=-1, keepdims=True)
                + jnp.sum(h_b, axis=-1, keepdims=True)) * inv_feat
        df, db = h_f - mean, h_b - mean
        var = (jnp.sum(df * df, axis=-1, keepdims=True)
               + jnp.sum(db * db, axis=-1, keepdims=True)) * inv_feat
        inv_std = lax.rsqrt(var + 1e-5)
        yf = df * inv_std * lng_ref[0] + lnb_ref[0]
        yb = db * inv_std * lng_ref[1] + lnb_ref[1]
        # nn.Dropout: identity in eval mode.
        out = (jnp.dot(yf, fcw_ref[0], preferred_element_type=jnp.float32)
               + jnp.dot(yb, fcw_ref[1], preferred_element_type=jnp.float32)
               + fcb_ref[...])
        o_ref[...] = jnp.maximum(out, 0.0).astype(o_ref.dtype)   # relu activation

    return kernel


def _full_spec(a):
    n = a.ndim
    return pl.BlockSpec(a.shape, lambda i, n=n: (0,) * n)


def gru_model_forward(x_btd, kparams):
    """x_btd: (B, T, input_size) batch-first (like the PyTorch module).
    Returns (B, output_size)."""
    B, T, D = x_btd.shape
    layers = kparams["gru"]
    head = kparams["head"]
    L = len(layers)
    H = layers[0]["whh"].shape[1]
    O = head["fc_w"].shape[-1]
    TB = T * B

    # time-major rows flattened to (T*B, D)
    x = jnp.transpose(x_btd, (1, 0, 2)).reshape(TB, D)

    operands = [x]
    for lp in layers:
        operands += [lp["wih"], lp["whh"], lp["bih"], lp["bhh"]]
    operands += [head["ln_g"], head["ln_b"], head["fc_w"], head["fc_b"]]

    kernel = _make_fused_gru_model_kernel(L, T, B, D, H, O)
    return pl.pallas_call(
        kernel,
        out_shape=jax.ShapeDtypeStruct((B, O), jnp.float32),
        grid=(1,),
        in_specs=[_full_spec(a) for a in operands],
        out_specs=pl.BlockSpec((B, O), lambda i: (0, 0)),
        scratch_shapes=[
            pltpu.VMEM((2, TB, H), jnp.float32),      # inter-layer activations
            pltpu.VMEM((2, TB, 3 * H), jnp.float32),  # gate pre-activations
        ],
        compiler_params=pltpu.CompilerParams(
            dimension_semantics=("arbitrary",),   # time recurrence is serial
            vmem_limit_bytes=32 * 1024 * 1024,    # explicit budget (v5e default 16 MiB)
        ),
    )(*operands)


# ------------------------------ parameter handling -----------------------------
def init_params(key, input_size, hidden_size, num_layers, output_size):
    """PyTorch-layout parameters (also used by the pure-JAX reference)."""
    H = hidden_size
    k = 1.0 / jnp.sqrt(jnp.float32(H))
    layers = []
    for l in range(num_layers):
        d_in = input_size if l == 0 else 2 * H
        dirs = {}
        for name in ("fwd", "bwd"):
            key, k1, k2, k3, k4 = jax.random.split(key, 5)
            dirs[name] = (
                jax.random.uniform(k1, (3 * H, d_in), jnp.float32, -k, k),
                jax.random.uniform(k2, (3 * H, H), jnp.float32, -k, k),
                jax.random.uniform(k3, (3 * H,), jnp.float32, -k, k),
                jax.random.uniform(k4, (3 * H,), jnp.float32, -k, k),
            )
        layers.append(dirs)
    key, k5, k6 = jax.random.split(key, 3)
    kf = 1.0 / jnp.sqrt(jnp.float32(2 * H))
    return {
        "gru": layers,
        "ln_gamma": jnp.ones((2 * H,), jnp.float32),   # PyTorch LayerNorm default
        "ln_beta": jnp.zeros((2 * H,), jnp.float32),
        "fc_w": jax.random.uniform(k5, (output_size, 2 * H), jnp.float32, -kf, kf),
        "fc_b": jax.random.uniform(k6, (output_size,), jnp.float32, -kf, kf),
    }


def pack_params(params, input_size, hidden_size, output_size):
    """Repack PyTorch-layout params ONCE into the gate-fused kernel layout."""
    H = hidden_size
    layers = []
    for l, layer in enumerate(params["gru"]):
        d_in = input_size if l == 0 else 2 * H
        S = 1 if l == 0 else 2    # input streams: layer 0 = x, else fwd/bwd halves
        wih, whh, bih, bhh = [], [], [], []
        for name in ("fwd", "bwd"):
            w_ih, w_hh, b_ih, b_hh = layer[name]
            # (3H, Din) -> (Din, 3H) with gate columns [r | z | n], split by stream
            # (stream s multiplies direction-s half of the previous layer output).
            wih.append(jnp.transpose(w_ih).reshape(S, d_in // S, 3 * H))
            whh.append(jnp.transpose(w_hh))              # (H, 3H), cols [r|z|n]
            bih.append(b_ih.reshape(1, 3 * H))
            bhh.append(b_hh.reshape(1, 3 * H))
        layers.append({
            "wih": jnp.stack(wih),    # (2, S, Din/S, 3H)
            "whh": jnp.stack(whh),    # (2, H, 3H)
            "bih": jnp.stack(bih),    # (2, 1, 3H)
            "bhh": jnp.stack(bhh),    # (2, 1, 3H)
        })
    head = {
        "ln_g": params["ln_gamma"].reshape(2, 1, H),
        "ln_b": params["ln_beta"].reshape(2, 1, H),
        "fc_w": jnp.transpose(params["fc_w"]).reshape(2, H, output_size),
        "fc_b": params["fc_b"].reshape(1, output_size),
    }
    return {"gru": layers, "head": head}


# -------------------------- pure-JAX reference check ---------------------------
def _ref_gru_dir(x_tbd, w_ih, w_hh, b_ih, b_hh, reverse):
    T, B, _ = x_tbd.shape
    H = w_hh.shape[1]                      # w_hh: (3H, H)
    h = jnp.zeros((B, H), jnp.float32)
    outs = [None] * T
    order = range(T - 1, -1, -1) if reverse else range(T)
    for t in order:
        gi = x_tbd[t] @ w_ih.T + b_ih
        gh = h @ w_hh.T + b_hh
        r = jax.nn.sigmoid(gi[:, :H] + gh[:, :H])
        z = jax.nn.sigmoid(gi[:, H:2 * H] + gh[:, H:2 * H])
        n = jnp.tanh(gi[:, 2 * H:] + r * gh[:, 2 * H:])
        h = (1 - z) * n + z * h
        outs[t] = h
    return jnp.stack(outs, axis=0)


def ref_forward(x_btd, params):
    x = jnp.transpose(x_btd, (1, 0, 2))
    for layer in params["gru"]:
        fwd = _ref_gru_dir(x, *layer["fwd"], reverse=False)
        bwd = _ref_gru_dir(x, *layer["bwd"], reverse=True)
        x = jnp.concatenate([fwd, bwd], axis=-1)
    last = x[-1]
    mean = jnp.mean(last, axis=-1, keepdims=True)
    var = jnp.mean((last - mean) ** 2, axis=-1, keepdims=True)
    ln = (last - mean) / jnp.sqrt(var + 1e-5) * params["ln_gamma"] + params["ln_beta"]
    out = ln @ params["fc_w"].T + params["fc_b"]
    return jnp.maximum(out, 0.0)


# ----------------------------------- main --------------------------------------
if __name__ == "__main__":
    B, T, INPUT, HIDDEN, LAYERS, OUT = 2, 8, 16, 32, 2, 8

    key = jax.random.PRNGKey(0)
    key, kx = jax.random.split(key)
    x = jax.random.normal(kx, (B, T, INPUT), jnp.float32)
    params = init_params(key, INPUT, HIDDEN, LAYERS, OUT)
    kparams = pack_params(params, INPUT, HIDDEN, OUT)   # done once, not per call

    y = jax.jit(gru_model_forward)(x, kparams)
    y = jax.block_until_ready(y)

    y_ref = ref_forward(x, params)
    assert y.shape == (B, OUT)
    assert jnp.allclose(y, y_ref, atol=1e-4, rtol=1e-4), (y, y_ref)

    print("KERNEL_OK")
</pallas_src>

<mosaic_0001>
module attributes {stable_mosaic.version = 11 : i64} {
  func.func @kernel(%arg0: i32, %arg1: memref<16x16xf32, #tpu.memory_space<vmem>>, %arg2: memref<2x1x16x96xf32, #tpu.memory_space<vmem>>, %arg3: memref<2x32x96xf32, #tpu.memory_space<vmem>>, %arg4: memref<2x1x96xf32, #tpu.memory_space<vmem>>, %arg5: memref<2x1x96xf32, #tpu.memory_space<vmem>>, %arg6: memref<2x2x32x96xf32, #tpu.memory_space<vmem>>, %arg7: memref<2x32x96xf32, #tpu.memory_space<vmem>>, %arg8: memref<2x1x96xf32, #tpu.memory_space<vmem>>, %arg9: memref<2x1x96xf32, #tpu.memory_space<vmem>>, %arg10: memref<2x1x32xf32, #tpu.memory_space<vmem>>, %arg11: memref<2x1x32xf32, #tpu.memory_space<vmem>>, %arg12: memref<2x32x8xf32, #tpu.memory_space<vmem>>, %arg13: memref<1x8xf32, #tpu.memory_space<vmem>>, %arg14: memref<2x8xf32, #tpu.memory_space<vmem>>, %arg15: memref<2x16x32xf32, #tpu.memory_space<vmem>>, %arg16: memref<2x16x96xf32, #tpu.memory_space<vmem>>) attributes {dimension_semantics = [#tpu.dimension_semantics<arbitrary>], iteration_bounds = array<i64: 1>, scalar_prefetch = 0 : i64, scratch_operands = 2 : i64, tpu.core_type = #tpu.core_type<tc>, window_params = [{pipeline_mode = #tpu.pipeline_mode<synchronous>, transform_indices = @transform_0, window_bounds = array<i64: 16, 16>}, {pipeline_mode = #tpu.pipeline_mode<synchronous>, transform_indices = @transform_1, window_bounds = array<i64: 2, 1, 16, 96>}, {pipeline_mode = #tpu.pipeline_mode<synchronous>, transform_indices = @transform_2, window_bounds = array<i64: 2, 32, 96>}, {pipeline_mode = #tpu.pipeline_mode<synchronous>, transform_indices = @transform_3, window_bounds = array<i64: 2, 1, 96>}, {pipeline_mode = #tpu.pipeline_mode<synchronous>, transform_indices = @transform_4, window_bounds = array<i64: 2, 1, 96>}, {pipeline_mode = #tpu.pipeline_mode<synchronous>, transform_indices = @transform_5, window_bounds = array<i64: 2, 2, 32, 96>}, {pipeline_mode = #tpu.pipeline_mode<synchronous>, transform_indices = @transform_6, window_bounds = array<i64: 2, 32, 96>}, {pipeline_mode = #tpu.pipeline_mode<synchronous>, transform_indices = @transform_7, window_bounds = array<i64: 2, 1, 96>}, {pipeline_mode = #tpu.pipeline_mode<synchronous>, transform_indices = @transform_8, window_bounds = array<i64: 2, 1, 96>}, {pipeline_mode = #tpu.pipeline_mode<synchronous>, transform_indices = @transform_9, window_bounds = array<i64: 2, 1, 32>}, {pipeline_mode = #tpu.pipeline_mode<synchronous>, transform_indices = @transform_10, window_bounds = array<i64: 2, 1, 32>}, {pipeline_mode = #tpu.pipeline_mode<synchronous>, transform_indices = @transform_11, window_bounds = array<i64: 2, 32, 8>}, {pipeline_mode = #tpu.pipeline_mode<synchronous>, transform_indices = @transform_12, window_bounds = array<i64: 1, 8>}, {pipeline_mode = #tpu.pipeline_mode<synchronous>, transform_indices = @transform_13, window_bounds = array<i64: 2, 8>}]} {
    %c0 = arith.constant 0 : index
    %c0_0 = arith.constant 0 : index
    %0 = vector.load %arg1[%c0, %c0_0] : memref<16x16xf32, #tpu.memory_space<vmem>>, vector<16x16xf32>
    %c0_1 = arith.constant 0 : index
    %c0_2 = arith.constant 0 : index
    %c0_3 = arith.constant 0 : index
    %c0_4 = arith.constant 0 : index
    %1 = vector.load %arg2[%c0_1, %c0_2, %c0_3, %c0_4] : memref<2x1x16x96xf32, #tpu.memory_space<vmem>>, vector<1x1x16x96xf32>
    %2 = vector.shape_cast %1 : vector<1x1x16x96xf32> to vector<16x96xf32>
    %cst = arith.constant dense<0.000000e+00> : vector<16x96xf32>
    %3 = tpu.matmul %0, %2, %cst {dimension_numbers = #tpu.dot_dimension_numbers<[1], [0], [0], [1], [0, 0, 1, 1], [], []>} : vector<16x16xf32>, vector<16x96xf32>, vector<16x96xf32> -> vector<16x96xf32>
    %c0_5 = arith.constant 0 : index
    %c0_6 = arith.constant 0 : index
    %c0_7 = arith.constant 0 : index
    %4 = vector.load %arg4[%c0_5, %c0_6, %c0_7] : memref<2x1x96xf32, #tpu.memory_space<vmem>>, vector<1x1x96xf32>
    %5 = vector.shape_cast %4 : vector<1x1x96xf32> to vector<1x96xf32>
    %6 = vector.broadcast %5 : vector<1x96xf32> to vector<16x96xf32>
    %7 = arith.addf %3, %6 : vector<16x96xf32>
    %c0_8 = arith.constant 0 : index
    %c0_9 = arith.constant 0 : index
    %c0_10 = arith.constant 0 : index
    %8 = vector.load %arg16[%c0_8, %c0_9, %c0_10] : memref<2x16x96xf32, #tpu.memory_space<vmem>>, vector<1x16x96xf32>
    %9 = vector.shape_cast %8 : vector<1x16x96xf32> to vector<16x96xf32>
    %10 = vector.shape_cast %7 : vector<16x96xf32> to vector<1x16x96xf32>
    tpu.vector_store %arg16[%c0_8, %c0_9, %c0_10], %10 {strides = array<i32>} : memref<2x16x96xf32, #tpu.memory_space<vmem>>, vector<1x16x96xf32>,
    %c1 = arith.constant 1 : index
    %c0_11 = arith.constant 0 : index
    %c0_12 = arith.constant 0 : index
    %c0_13 = arith.constant 0 : index
    %11 = vector.load %arg2[%c1, %c0_11, %c0_12, %c0_13] : memref<2x1x16x96xf32, #tpu.memory_space<vmem>>, vector<1x1x16x96xf32>
    %12 = vector.shape_cast %11 : vector<1x1x16x96xf32> to vector<16x96xf32>
    %cst_14 = arith.constant dense<0.000000e+00> : vector<16x96xf32>
    %13 = tpu.matmul %0, %12, %cst_14 {dimension_numbers = #tpu.dot_dimension_numbers<[1], [0], [0], [1], [0, 0, 1, 1], [], []>} : vector<16x16xf32>, vector<16x96xf32>, vector<16x96xf32> -> vector<16x96xf32>
    %c1_15 = arith.constant 1 : index
    %c0_16 = arith.constant 0 : index
    %c0_17 = arith.constant 0 : index
    %14 = vector.load %arg4[%c1_15, %c0_16, %c0_17] : memref<2x1x96xf32, #tpu.memory_space<vmem>>, vector<1x1x96xf32>
    %15 = vector.shape_cast %14 : vector<1x1x96xf32> to vector<1x96xf32>
    %16 = vector.broadcast %15 : vector<1x96xf32> to vector<16x96xf32>
    %17 = arith.addf %13, %16 : vector<16x96xf32>
    %c1_18 = arith.constant 1 : index
    %c0_19 = arith.constant 0 : index
    %c0_20 = arith.constant 0 : index
    %18 = vector.load %arg16[%c1_18, %c0_19, %c0_20] : memref<2x16x96xf32, #tpu.memory_space<vmem>>, vector<1x16x96xf32>
    %19 = vector.shape_cast %18 : vector<1x16x96xf32> to vector<16x96xf32>
    %20 = vector.shape_cast %17 : vector<16x96xf32> to vector<1x16x96xf32>
    tpu.vector_store %arg16[%c1_18, %c0_19, %c0_20], %20 {strides = array<i32>} : memref<2x16x96xf32, #tpu.memory_space<vmem>>, vector<1x16x96xf32>,
    %c0_21 = arith.constant 0 : index
    %c0_22 = arith.constant 0 : index
    %c0_23 = arith.constant 0 : index
    %21 = vector.load %arg3[%c0_21, %c0_22, %c0_23] : memref<2x32x96xf32, #tpu.memory_space<vmem>>, vector<1x32x96xf32>
    %22 = vector.shape_cast %21 : vector<1x32x96xf32> to vector<32x96xf32>
    %c1_24 = arith.constant 1 : index
    %c0_25 = arith.constant 0 : index
    %c0_26 = arith.constant 0 : index
    %23 = vector.load %arg3[%c1_24, %c0_25, %c0_26] : memref<2x32x96xf32, #tpu.memory_space<vmem>>, vector<1x32x96xf32>
    %24 = vector.shape_cast %23 : vector<1x32x96xf32> to vector<32x96xf32>
    %c0_27 = arith.constant 0 : index
    %c0_28 = arith.constant 0 : index
    %c0_29 = arith.constant 0 : index
    %25 = vector.load %arg5[%c0_27, %c0_28, %c0_29] : memref<2x1x96xf32, #tpu.memory_space<vmem>>, vector<1x1x96xf32>
    %26 = vector.shape_cast %25 : vector<1x1x96xf32> to vector<1x96xf32>
    %c1_30 = arith.constant 1 : index
    %c0_31 = arith.constant 0 : index
    %c0_32 = arith.constant 0 : index
    %27 = vector.load %arg5[%c1_30, %c0_31, %c0_32] : memref<2x1x96xf32, #tpu.memory_space<vmem>>, vector<1x1x96xf32>
    %28 = vector.shape_cast %27 : vector<1x1x96xf32> to vector<1x96xf32>
    %cst_33 = arith.constant 0.000000e+00 : f32
    %29 = vector.broadcast %cst_33 : f32 to vector<2x32xf32>
    %c0_i32 = arith.constant 0 : i32
    %c2_i32 = arith.constant 2 : i32
    %30 = arith.muli %c0_i32, %c2_i32 : i32
    %31 = tpu.assume_multiple %30, 2 : i32
    %c7_i32 = arith.constant 7 : i32
    %32 = arith.subi %c7_i32, %c0_i32 : i32
    %c2_i32_34 = arith.constant 2 : i32
    %33 = arith.muli %32, %c2_i32_34 : i32
    %34 = tpu.assume_multiple %33, 2 : i32
    %cst_35 = arith.constant dense<0.000000e+00> : vector<2x96xf32>
    %35 = tpu.matmul %29, %22, %cst_35 {dimension_numbers = #tpu.dot_dimension_numbers<[1], [0], [0], [1], [0, 0, 1, 1], [], []>} : vector<2x32xf32>, vector<32x96xf32>, vector<2x96xf32> -> vector<2x96xf32>
    %36 = vector.broadcast %26 : vector<1x96xf32> to vector<2x96xf32>
    %37 = arith.addf %35, %36 : vector<2x96xf32>
    %cst_36 = arith.constant dense<0.000000e+00> : vector<2x96xf32>
    %38 = tpu.matmul %29, %24, %cst_36 {dimension_numbers = #tpu.dot_dimension_numbers<[1], [0], [0], [1], [0, 0, 1, 1], [], []>} : vector<2x32xf32>, vector<32x96xf32>, vector<2x96xf32> -> vector<2x96xf32>
    %39 = vector.broadcast %28 : vector<1x96xf32> to vector<2x96xf32>
    %40 = arith.addf %38, %39 : vector<2x96xf32>
    %c0_37 = arith.constant 0 : index
    %41 = arith.index_cast %31 : i32 to index
    %c0_38 = arith.constant 0 : index
    %42 = vector.load %arg16[%c0_37, %41, %c0_38] : memref<2x16x96xf32, #tpu.memory_space<vmem>>, vector<1x2x96xf32>
    %43 = vector.shape_cast %42 : vector<1x2x96xf32> to vector<2x96xf32>
    %44 = vector.extract_strided_slice %43 {offsets = [0, 0], sizes = [2, 32], strides = [1, 1]} : vector<2x96xf32> to vector<2x32xf32>
    %45 = vector.extract_strided_slice %37 {offsets = [0, 0], sizes = [2, 32], strides = [1, 1]} : vector<2x96xf32> to vector<2x32xf32>
    %46 = arith.addf %44, %45 : vector<2x32xf32>
    %47 = arith.negf %46 : vector<2x32xf32>
    %48 = math.exp %47 : vector<2x32xf32>
    %cst_39 = arith.constant 1.000000e+00 : f32
    %49 = vector.broadcast %cst_39 : f32 to vector<2x32xf32>
    %50 = arith.addf %49, %48 : vector<2x32xf32>
    %51 = arith.divf %49, %50 : vector<2x32xf32>
    %52 = vector.extract_strided_slice %43 {offsets = [0, 32], sizes = [2, 32], strides = [1, 1]} : vector<2x96xf32> to vector<2x32xf32>
    %53 = vector.extract_strided_slice %37 {offsets = [0, 32], sizes = [2, 32], strides = [1, 1]} : vector<2x96xf32> to vector<2x32xf32>
    %54 = arith.addf %52, %53 : vector<2x32xf32>
    %55 = arith.negf %54 : vector<2x32xf32>
    %56 = math.exp %55 : vector<2x32xf32>
    %cst_40 = arith.constant 1.000000e+00 : f32
    %57 = vector.broadcast %cst_40 : f32 to vector<2x32xf32>
    %58 = arith.addf %57, %56 : vector<2x32xf32>
    %59 = arith.divf %57, %58 : vector<2x32xf32>
    %60 = vector.extract_strided_slice %43 {offsets = [0, 64], sizes = [2, 32], strides = [1, 1]} : vector<2x96xf32> to vector<2x32xf32>
    %61 = vector.extract_strided_slice %37 {offsets = [0, 64], sizes = [2, 32], strides = [1, 1]} : vector<2x96xf32> to vector<2x32xf32>
    %62 = arith.mulf %51, %61 : vector<2x32xf32>
    %63 = arith.addf %60, %62 : vector<2x32xf32>
    %64 = math.tanh %63 : vector<2x32xf32>
    %cst_41 = arith.constant 1.000000e+00 : f32
    %65 = vector.broadcast %cst_41 : f32 to vector<2x32xf32>
    %66 = arith.subf %65, %59 : vector<2x32xf32>
    %67 = arith.mulf %66, %64 : vector<2x32xf32>
    %68 = arith.mulf %59, %29 : vector<2x32xf32>
    %69 = arith.addf %67, %68 : vector<2x32xf32>
    %c1_42 = arith.constant 1 : index
    %70 = arith.index_cast %34 : i32 to index
    %c0_43 = arith.constant 0 : index
    %71 = vector.load %arg16[%c1_42, %70, %c0_43] : memref<2x16x96xf32, #tpu.memory_space<vmem>>, vector<1x2x96xf32>
    %72 = vector.shape_cast %71 : vector<1x2x96xf32> to vector<2x96xf32>
    %73 = vector.extract_strided_slice %72 {offsets = [0, 0], sizes = [2, 32], strides = [1, 1]} : vector<2x96xf32> to vector<2x32xf32>
    %74 = vector.extract_strided_slice %40 {offsets = [0, 0], sizes = [2, 32], strides = [1, 1]} : vector<2x96xf32> to vector<2x32xf32>
    %75 = arith.addf %73, %74 : vector<2x32xf32>
    %76 = arith.negf %75 : vector<2x32xf32>
    %77 = math.exp %76 : vector<2x32xf32>
    %cst_44 = arith.constant 1.000000e+00 : f32
    %78 = vector.broadcast %cst_44 : f32 to vector<2x32xf32>
    %79 = arith.addf %78, %77 : vector<2x32xf32>
    %80 = arith.divf %78, %79 : vector<2x32xf32>
    %81 = vector.extract_strided_slice %72 {offsets = [0, 32], sizes = [2, 32], strides = [1, 1]} : vector<2x96xf32> to vector<2x32xf32>
    %82 = vector.extract_strided_slice %40 {offsets = [0, 32], sizes = [2, 32], strides = [1, 1]} : vector<2x96xf32> to vector<2x32xf32>
    %83 = arith.addf %81, %82 : vector<2x32xf32>
    %84 = arith.negf %83 : vector<2x32xf32>
    %85 = math.exp %84 : vector<2x32xf32>
    %cst_45 = arith.constant 1.000000e+00 : f32
    %86 = vector.broadcast %cst_45 : f32 to vector<2x32xf32>
    %87 = arith.addf %86, %85 : vector<2x32xf32>
    %88 = arith.divf %86, %87 : vector<2x32xf32>
    %89 = vector.extract_strided_slice %72 {offsets = [0, 64], sizes = [2, 32], strides = [1, 1]} : vector<2x96xf32> to vector<2x32xf32>
    %90 = vector.extract_strided_slice %40 {offsets = [0, 64], sizes = [2, 32], strides = [1, 1]} : vector<2x96xf32> to vector<2x32xf32>
    %91 = arith.mulf %80, %90 : vector<2x32xf32>
    %92 = arith.addf %89, %91 : vector<2x32xf32>
    %93 = math.tanh %92 : vector<2x32xf32>
    %cst_46 = arith.constant 1.000000e+00 : f32
    %94 = vector.broadcast %cst_46 : f32 to vector<2x32xf32>
    %95 = arith.subf %94, %88 : vector<2x32xf32>
    %96 = arith.mulf %95, %93 : vector<2x32xf32>
    %97 = arith.mulf %88, %29 : vector<2x32xf32>
    %98 = arith.addf %96, %97 : vector<2x32xf32>
    %c0_47 = arith.constant 0 : index
    %99 = arith.index_cast %31 : i32 to index
    %c0_48 = arith.constant 0 : index
    %100 = vector.load %arg15[%c0_47, %99, %c0_48] : memref<2x16x32xf32, #tpu.memory_space<vmem>>, vector<1x2x32xf32>
    %101 = vector.shape_cast %100 : vector<1x2x32xf32> to vector<2x32xf32>
    %102 = vector.shape_cast %69 : vector<2x32xf32> to vector<1x2x32xf32>
    tpu.vector_store %arg15[%c0_47, %99, %c0_48], %102 {strides = array<i32>} : memref<2x16x32xf32, #tpu.memory_space<vmem>>, vector<1x2x32xf32>,
    %c1_49 = arith.constant 1 : index
    %103 = arith.index_cast %34 : i32 to index
    %c0_50 = arith.constant 0 : index
    %104 = vector.load %arg15[%c1_49, %103, %c0_50] : memref<2x16x32xf32, #tpu.memory_space<vmem>>, vector<1x2x32xf32>
    %105 = vector.shape_cast %104 : vector<1x2x32xf32> to vector<2x32xf32>
    %106 = vector.shape_cast %98 : vector<2x32xf32> to vector<1x2x32xf32>
    tpu.vector_store %arg15[%c1_49, %103, %c0_50], %106 {strides = array<i32>} : memref<2x16x32xf32, #tpu.memory_space<vmem>>, vector<1x2x32xf32>,
    %c1_i32 = arith.constant 1 : i32
    %c2_i32_51 = arith.constant 2 : i32
    %107 = arith.muli %c1_i32, %c2_i32_51 : i32
    %108 = tpu.assume_multiple %107, 2 : i32
    %c7_i32_52 = arith.constant 7 : i32
    %109 = arith.subi %c7_i32_52, %c1_i32 : i32
    %c2_i32_53 = arith.constant 2 : i32
    %110 = arith.muli %109, %c2_i32_53 : i32
    %111 = tpu.assume_multiple %110, 2 : i32
    %cst_54 = arith.constant dense<0.000000e+00> : vector<2x96xf32>
    %112 = tpu.matmul %69, %22, %cst_54 {dimension_numbers = #tpu.dot_dimension_numbers<[1], [0], [0], [1], [0, 0, 1, 1], [], []>} : vector<2x32xf32>, vector<32x96xf32>, vector<2x96xf32> -> vector<2x96xf32>
    %113 = vector.broadcast %26 : vector<1x96xf32> to vector<2x96xf32>
    %114 = arith.addf %112, %113 : vector<2x96xf32>
    %cst_55 = arith.constant dense<0.000000e+00> : vector<2x96xf32>
    %115 = tpu.matmul %98, %24, %cst_55 {dimension_numbers = #tpu.dot_dimension_numbers<[1], [0], [0], [1], [0, 0, 1, 1], [], []>} : vector<2x32xf32>, vector<32x96xf32>, vector<2x96xf32> -> vector<2x96xf32>
    %116 = vector.broadcast %28 : vector<1x96xf32> to vector<2x96xf32>
    %117 = arith.addf %115, %116 : vector<2x96xf32>
    %c0_56 = arith.constant 0 : index
    %118 = arith.index_cast %108 : i32 to index
    %c0_57 = arith.constant 0 : index
    %119 = vector.load %arg16[%c0_56, %118, %c0_57] : memref<2x16x96xf32, #tpu.memory_space<vmem>>, vector<1x2x96xf32>
    %120 = vector.shape_cast %119 : vector<1x2x96xf32> to vector<2x96xf32>
    %121 = vector.extract_strided_slice %120 {offsets = [0, 0], sizes = [2, 32], strides = [1, 1]} : vector<2x96xf32> to vector<2x32xf32>
    %122 = vector.extract_strided_slice %114 {offsets = [0, 0], sizes = [2, 32], strides = [1, 1]} : vector<2x96xf32> to vector<2x32xf32>
    %123 = arith.addf %121, %122 : vector<2x32xf32>
    %124 = arith.negf %123 : vector<2x32xf32>
    %125 = math.exp %124 : vector<2x32xf32>
    %cst_58 = arith.constant 1.000000e+00 : f32
    %126 = vector.broadcast %cst_58 : f32 to vector<2x32xf32>
    %127 = arith.addf %126, %125 : vector<2x32xf32>
    %128 = arith.divf %126, %127 : vector<2x32xf32>
    %129 = vector.extract_strided_slice %120 {offsets = [0, 32], sizes = [2, 32], strides = [1, 1]} : vector<2x96xf32> to vector<2x32xf32>
    %130 = vector.extract_strided_slice %114 {offsets = [0, 32], sizes = [2, 32], strides = [1, 1]} : vector<2x96xf32> to vector<2x32xf32>
    %131 = arith.addf %129, %130 : vector<2x32xf32>
    %132 = arith.negf %131 : vector<2x32xf32>
    %133 = math.exp %132 : vector<2x32xf32>
    %cst_59 = arith.constant 1.000000e+00 : f32
    %134 = vector.broadcast %cst_59 : f32 to vector<2x32xf32>
    %135 = arith.addf %134, %133 : vector<2x32xf32>
    %136 = arith.divf %134, %135 : vector<2x32xf32>
    %137 = vector.extract_strided_slice %120 {offsets = [0, 64], sizes = [2, 32], strides = [1, 1]} : vector<2x96xf32> to vector<2x32xf32>
    %138 = vector.extract_strided_slice %114 {offsets = [0, 64], sizes = [2, 32], strides = [1, 1]} : vector<2x96xf32> to vector<2x32xf32>
    %139 = arith.mulf %128, %138 : vector<2x32xf32>
    %140 = arith.addf %137, %139 : vector<2x32xf32>
    %141 = math.tanh %140 : vector<2x32xf32>
    %cst_60 = arith.constant 1.000000e+00 : f32
    %142 = vector.broadcast %cst_60 : f32 to vector<2x32xf32>
    %143 = arith.subf %142, %136 : vector<2x32xf32>
    %144 = arith.mulf %143, %141 : vector<2x32xf32>
    %145 = arith.mulf %136, %69 : vector<2x32xf32>
    %146 = arith.addf %144, %145 : vector<2x32xf32>
    %c1_61 = arith.constant 1 : index
    %147 = arith.index_cast %111 : i32 to index
    %c0_62 = arith.constant 0 : index
    %148 = vector.load %arg16[%c1_61, %147, %c0_62] : memref<2x16x96xf32, #tpu.memory_space<vmem>>, vector<1x2x96xf32>
    %149 = vector.shape_cast %148 : vector<1x2x96xf32> to vector<2x96xf32>
    %150 = vector.extract_strided_slice %149 {offsets = [0, 0], sizes = [2, 32], strides = [1, 1]} : vector<2x96xf32> to vector<2x32xf32>
    %151 = vector.extract_strided_slice %117 {offsets = [0, 0], sizes = [2, 32], strides = [1, 1]} : vector<2x96xf32> to vector<2x32xf32>
    %152 = arith.addf %150, %151 : vector<2x32xf32>
    %153 = arith.negf %152 : vector<2x32xf32>
    %154 = math.exp %153 : vector<2x32xf32>
    %cst_63 = arith.constant 1.000000e+00 : f32
    %155 = vector.broadcast %cst_63 : f32 to vector<2x32xf32>
    %156 = arith.addf %155, %154 : vector<2x32xf32>
    %157 = arith.divf %155, %156 : vector<2x32xf32>
    %158 = vector.extract_strided_slice %149 {offsets = [0, 32], sizes = [2, 32], strides = [1, 1]} : vector<2x96xf32> to vector<2x32xf32>
    %159 = vector.extract_strided_slice %117 {offsets = [0, 32], sizes = [2, 32], strides = [1, 1]} : vector<2x96xf32> to vector<2x32xf32>
    %160 = arith.addf %158, %159 : vector<2x32xf32>
    %161 = arith.negf %160 : vector<2x32xf32>
    %162 = math.exp %161 : vector<2x32xf32>
    %cst_64 = arith.constant 1.000000e+00 : f32
    %163 = vector.broadcast %cst_64 : f32 to vector<2x32xf32>
    %164 = arith.addf %163, %162 : vector<2x32xf32>
    %165 = arith.divf %163, %164 : vector<2x32xf32>
    %166 = vector.extract_strided_slice %149 {offsets = [0, 64], sizes = [2, 32], strides = [1, 1]} : vector<2x96xf32> to vector<2x32xf32>
    %167 = vector.extract_strided_slice %117 {offsets = [0, 64], sizes = [2, 32], strides = [1, 1]} : vector<2x96xf32> to vector<2x32xf32>
    %168 = arith.mulf %157, %167 : vector<2x32xf32>
    %169 = arith.addf %166, %168 : vector<2x32xf32>
    %170 = math.tanh %169 : vector<2x32xf32>
    %cst_65 = arith.constant 1.000000e+00 : f32
    %171 = vector.broadcast %cst_65 : f32 to vector<2x32xf32>
    %172 = arith.subf %171, %165 : vector<2x32xf32>
    %173 = arith.mulf %172, %170 : vector<2x32xf32>
    %174 = arith.mulf %165, %98 : vector<2x32xf32>
    %175 = arith.addf %173, %174 : vector<2x32xf32>
    %c0_66 = arith.constant 0 : index
    %176 = arith.index_cast %108 : i32 to index
    %c0_67 = arith.constant 0 : index
    %177 = vector.load %arg15[%c0_66, %176, %c0_67] : memref<2x16x32xf32, #tpu.memory_space<vmem>>, vector<1x2x32xf32>
    %178 = vector.shape_cast %177 : vector<1x2x32xf32> to vector<2x32xf32>
    %179 = vector.shape_cast %146 : vector<2x32xf32> to vector<1x2x32xf32>
    tpu.vector_store %arg15[%c0_66, %176, %c0_67], %179 {strides = array<i32>} : memref<2x16x32xf32, #tpu.memory_space<vmem>>, vector<1x2x32xf32>,
    %c1_68 = arith.constant 1 : index
    %180 = arith.index_cast %111 : i32 to index
    %c0_69 = arith.constant 0 : index
    %181 = vector.load %arg15[%c1_68, %180, %c0_69] : memref<2x16x32xf32, #tpu.memory_space<vmem>>, vector<1x2x32xf32>
    %182 = vector.shape_cast %181 : vector<1x2x32xf32> to vector<2x32xf32>
    %183 = vector.shape_cast %175 : vector<2x32xf32> to vector<1x2x32xf32>
    tpu.vector_store %arg15[%c1_68, %180, %c0_69], %183 {strides = array<i32>} : memref<2x16x32xf32, #tpu.memory_space<vmem>>, vector<1x2x32xf32>,
    %c2_i32_70 = arith.constant 2 : i32
    %c2_i32_71 = arith.constant 2 : i32
    %184 = arith.muli %c2_i32_70, %c2_i32_71 : i32
    %185 = tpu.assume_multiple %184, 2 : i32
    %c7_i32_72 = arith.constant 7 : i32
    %186 = arith.subi %c7_i32_72, %c2_i32_70 : i32
    %c2_i32_73 = arith.constant 2 : i32
    %187 = arith.muli %186, %c2_i32_73 : i32
    %188 = tpu.assume_multiple %187, 2 : i32
    %cst_74 = arith.constant dense<0.000000e+00> : vector<2x96xf32>
    %189 = tpu.matmul %146, %22, %cst_74 {dimension_numbers = #tpu.dot_dimension_numbers<[1], [0], [0], [1], [0, 0, 1, 1], [], []>} : vector<2x32xf32>, vector<32x96xf32>, vector<2x96xf32> -> vector<2x96xf32>
    %190 = vector.broadcast %26 : vector<1x96xf32> to vector<2x96xf32>
    %191 = arith.addf %189, %190 : vector<2x96xf32>
    %cst_75 = arith.constant dense<0.000000e+00> : vector<2x96xf32>
    %192 = tpu.matmul %175, %24, %cst_75 {dimension_numbers = #tpu.dot_dimension_numbers<[1], [0], [0], [1], [0, 0, 1, 1], [], []>} : vector<2x32xf32>, vector<32x96xf32>, vector<2x96xf32> -> vector<2x96xf32>
    %193 = vector.broadcast %28 : vector<1x96xf32> to vector<2x96xf32>
    %194 = arith.addf %192, %193 : vector<2x96xf32>
    %c0_76 = arith.constant 0 : index
    %195 = arith.index_cast %185 : i32 to index
    %c0_77 = arith.constant 0 : index
    %196 = vector.load %arg16[%c0_76, %195, %c0_77] : memref<2x16x96xf32, #tpu.memory_space<vmem>>, vector<1x2x96xf32>
    %197 = vector.shape_cast %196 : vector<1x2x96xf32> to vector<2x96xf32>
    %198 = vector.extract_strided_slice %197 {offsets = [0, 0], sizes = [2, 32], strides = [1, 1]} : vector<2x96xf32> to vector<2x32xf32>
    %199 = vector.extract_strided_slice %191 {offsets = [0, 0], sizes = [2, 32], strides = [1, 1]} : vector<2x96xf32> to vector<2x32xf32>
    %200 = arith.addf %198, %199 : vector<2x32xf32>
    %201 = arith.negf %200 : vector<2x32xf32>
    %202 = math.exp %201 : vector<2x32xf32>
    %cst_78 = arith.constant 1.000000e+00 : f32
    %203 = vector.broadcast %cst_78 : f32 to vector<2x32xf32>
    %204 = arith.addf %203, %202 : vector<2x32xf32>
    %205 = arith.divf %203, %204 : vector<2x32xf32>
    %206 = vector.extract_strided_slice %197 {offsets = [0, 32], sizes = [2, 32], strides = [1, 1]} : vector<2x96xf32> to vector<2x32xf32>
    %207 = vector.extract_strided_slice %191 {offsets = [0, 32], sizes = [2, 32], strides = [1, 1]} : vector<2x96xf32> to vector<2x32xf32>
    %208 = arith.addf %206, %207 : vector<2x32xf32>
    %209 = arith.negf %208 : vector<2x32xf32>
    %210 = math.exp %209 : vector<2x32xf32>
    %cst_79 = arith.constant 1.000000e+00 : f32
    %211 = vector.broadcast %cst_79 : f32 to vector<2x32xf32>
    %212 = arith.addf %211, %210 : vector<2x32xf32>
    %213 = arith.divf %211, %212 : vector<2x32xf32>
    %214 = vector.extract_strided_slice %197 {offsets = [0, 64], sizes = [2, 32], strides = [1, 1]} : vector<2x96xf32> to vector<2x32xf32>
    %215 = vector.extract_strided_slice %191 {offsets = [0, 64], sizes = [2, 32], strides = [1, 1]} : vector<2x96xf32> to vector<2x32xf32>
    %216 = arith.mulf %205, %215 : vector<2x32xf32>
    %217 = arith.addf %214, %216 : vector<2x32xf32>
    %218 = math.tanh %217 : vector<2x32xf32>
    %cst_80 = arith.constant 1.000000e+00 : f32
    %219 = vector.broadcast %cst_80 : f32 to vector<2x32xf32>
    %220 = arith.subf %219, %213 : vector<2x32xf32>
    %221 = arith.mulf %220, %218 : vector<2x32xf32>
    %222 = arith.mulf %213, %146 : vector<2x32xf32>
    %223 = arith.addf %221, %222 : vector<2x32xf32>
    %c1_81 = arith.constant 1 : index
    %224 = arith.index_cast %188 : i32 to index
    %c0_82 = arith.constant 0 : index
    %225 = vector.load %arg16[%c1_81, %224, %c0_82] : memref<2x16x96xf32, #tpu.memory_space<vmem>>, vector<1x2x96xf32>
    %226 = vector.shape_cast %225 : vector<1x2x96xf32> to vector<2x96xf32>
    %227 = vector.extract_strided_slice %226 {offsets = [0, 0], sizes = [2, 32], strides = [1, 1]} : vector<2x96xf32> to vector<2x32xf32>
    %228 = vector.extract_strided_slice %194 {offsets = [0, 0], sizes = [2, 32], strides = [1, 1]} : vector<2x96xf32> to vector<2x32xf32>
    %229 = arith.addf %227, %228 : vector<2x32xf32>
    %230 = arith.negf %229 : vector<2x32xf32>
    %231 = math.exp %230 : vector<2x32xf32>
    %cst_83 = arith.constant 1.000000e+00 : f32
    %232 = vector.broadcast %cst_83 : f32 to vector<2x32xf32>
    %233 = arith.addf %232, %231 : vector<2x32xf32>
    %234 = arith.divf %232, %233 : vector<2x32xf32>
    %235 = vector.extract_strided_slice %226 {offsets = [0, 32], sizes = [2, 32], strides = [1, 1]} : vector<2x96xf32> to vector<2x32xf32>
    %236 = vector.extract_strided_slice %194 {offsets = [0, 32], sizes = [2, 32], strides = [1, 1]} : vector<2x96xf32> to vector<2x32xf32>
    %237 = arith.addf %235, %236 : vector<2x32xf32>
    %238 = arith.negf %237 : vector<2x32xf32>
    %239 = math.exp %238 : vector<2x32xf32>
    %cst_84 = arith.constant 1.000000e+00 : f32
    %240 = vector.broadcast %cst_84 : f32 to vector<2x32xf32>
    %241 = arith.addf %240, %239 : vector<2x32xf32>
    %242 = arith.divf %240, %241 : vector<2x32xf32>
    %243 = vector.extract_strided_slice %226 {offsets = [0, 64], sizes = [2, 32], strides = [1, 1]} : vector<2x96xf32> to vector<2x32xf32>
    %244 = vector.extract_strided_slice %194 {offsets = [0, 64], sizes = [2, 32], strides = [1, 1]} : vector<2x96xf32> to vector<2x32xf32>
    %245 = arith.mulf %234, %244 : vector<2x32xf32>
    %246 = arith.addf %243, %245 : vector<2x32xf32>
    %247 = math.tanh %246 : vector<2x32xf32>
    %cst_85 = arith.constant 1.000000e+00 : f32
    %248 = vector.broadcast %cst_85 : f32 to vector<2x32xf32>
    %249 = arith.subf %248, %242 : vector<2x32xf32>
    %250 = arith.mulf %249, %247 : vector<2x32xf32>
    %251 = arith.mulf %242, %175 : vector<2x32xf32>
    %252 = arith.addf %250, %251 : vector<2x32xf32>
    %c0_86 = arith.constant 0 : index
    %253 = arith.index_cast %185 : i32 to index
    %c0_87 = arith.constant 0 : index
    %254 = vector.load %arg15[%c0_86, %253, %c0_87] : memref<2x16x32xf32, #tpu.memory_space<vmem>>, vector<1x2x32xf32>
    %255 = vector.shape_cast %254 : vector<1x2x32xf32> to vector<2x32xf32>
    %256 = vector.shape_cast %223 : vector<2x32xf32> to vector<1x2x32xf32>
    tpu.vector_store %arg15[%c0_86, %253, %c0_87], %256 {strides = array<i32>} : memref<2x16x32xf32, #tpu.memory_space<vmem>>, vector<1x2x32xf32>,
    %c1_88 = arith.constant 1 : index
    %257 = arith.index_cast %188 : i32 to index
    %c0_89 = arith.constant 0 : index
    %258 = vector.load %arg15[%c1_88, %257, %c0_89] : memref<2x16x32xf32, #tpu.memory_space<vmem>>, vector<1x2x32xf32>
    %259 = vector.shape_cast %258 : vector<1x2x32xf32> to vector<2x32xf32>
    %260 = vector.shape_cast %252 : vector<2x32xf32> to vector<1x2x32xf32>
    tpu.vector_store %arg15[%c1_88, %257, %c0_89], %260 {strides = array<i32>} : memref<2x16x32xf32, #tpu.memory_space<vmem>>, vector<1x2x32xf32>,
    %c3_i32 = arith.constant 3 : i32
    %c2_i32_90 = arith.constant 2 : i32
    %261 = arith.muli %c3_i32, %c2_i32_90 : i32
    %262 = tpu.assume_multiple %261, 2 : i32
    %c7_i32_91 = arith.constant 7 : i32
    %263 = arith.subi %c7_i32_91, %c3_i32 : i32
    %c2_i32_92 = arith.constant 2 : i32
    %264 = arith.muli %263, %c2_i32_92 : i32
    %265 = tpu.assume_multiple %264, 2 : i32
    %cst_93 = arith.constant dense<0.000000e+00> : vector<2x96xf32>
    %266 = tpu.matmul %223, %22, %cst_93 {dimension_numbers = #tpu.dot_dimension_numbers<[1], [0], [0], [1], [0, 0, 1, 1], [], []>} : vector<2x32xf32>, vector<32x96xf32>, vector<2x96xf32> -> vector<2x96xf32>
    %267 = vector.broadcast %26 : vector<1x96xf32> to vector<2x96xf32>
    %268 = arith.addf %266, %267 : vector<2x96xf32>
    %cst_94 = arith.constant dense<0.000000e+00> : vector<2x96xf32>
    %269 = tpu.matmul %252, %24, %cst_94 {dimension_numbers = #tpu.dot_dimension_numbers<[1], [0], [0], [1], [0, 0, 1, 1], [], []>} : vector<2x32xf32>, vector<32x96xf32>, vector<2x96xf32> -> vector<2x96xf32>
    %270 = vector.broadcast %28 : vector<1x96xf32> to vector<2x96xf32>
    %271 = arith.addf %269, %270 : vector<2x96xf32>
    %c0_95 = arith.constant 0 : index
    %272 = arith.index_cast %262 : i32 to index
    %c0_96 = arith.constant 0 : index
    %273 = vector.load %arg16[%c0_95, %272, %c0_96] : memref<2x16x96xf32, #tpu.memory_space<vmem>>, vector<1x2x96xf32>
    %274 = vector.shape_cast %273 : vector<1x2x96xf32> to vector<2x96xf32>
    %275 = vector.extract_strided_slice %274 {offsets = [0, 0], sizes = [2, 32], strides = [1, 1]} : vector<2x96xf32> to vector<2x32xf32>
    %276 = vector.extract_strided_slice %268 {offsets = [0, 0], sizes = [2, 32], strides = [1, 1]} : vector<2x96xf32> to vector<2x32xf32>
    %277 = arith.addf %275, %276 : vector<2x32xf32>
    %278 = arith.negf %277 : vector<2x32xf32>
    %279 = math.exp %278 : vector<2x32xf32>
    %cst_97 = arith.constant 1.000000e+00 : f32
    %280 = vector.broadcast %cst_97 : f32 to vector<2x32xf32>
    %281 = arith.addf %280, %279 : vector<2x32xf32>
    %282 = arith.divf %280, %281 : vector<2x32xf32>
    %283 = vector.extract_strided_slice %274 {offsets = [0, 32], sizes = [2, 32], strides = [1, 1]} : vector<2x96xf32> to vector<2x32xf32>
    %284 = vector.extract_strided_slice %268 {offsets = [0, 32], sizes = [2, 32], strides = [1, 1]} : vector<2x96xf32> to vector<2x32xf32>
    %285 = arith.addf %283, %284 : vector<2x32xf32>
    %286 = arith.negf %285 : vector<2x32xf32>
    %287 = math.exp %286 : vector<2x32xf32>
    %cst_98 = arith.constant 1.000000e+00 : f32
    %288 = vector.broadcast %cst_98 : f32 to vector<2x32xf32>
    %289 = arith.addf %288, %287 : vector<2x32xf32>
    %290 = arith.divf %288, %289 : vector<2x32xf32>
    %291 = vector.extract_strided_slice %274 {offsets = [0, 64], sizes = [2, 32], strides = [1, 1]} : vector<2x96xf32> to vector<2x32xf32>
    %292 = vector.extract_strided_slice %268 {offsets = [0, 64], sizes = [2, 32], strides = [1, 1]} : vector<2x96xf32> to vector<2x32xf32>
    %293 = arith.mulf %282, %292 : vector<2x32xf32>
    %294 = arith.addf %291, %293 : vector<2x32xf32>
    %295 = math.tanh %294 : vector<2x32xf32>
    %cst_99 = arith.constant 1.000000e+00 : f32
    %296 = vector.broadcast %cst_99 : f32 to vector<2x32xf32>
    %297 = arith.subf %296, %290 : vector<2x32xf32>
    %298 = arith.mulf %297, %295 : vector<2x32xf32>
    %299 = arith.mulf %290, %223 : vector<2x32xf32>
    %300 = arith.addf %298, %299 : vector<2x32xf32>
    %c1_100 = arith.constant 1 : index
    %301 = arith.index_cast %265 : i32 to index
    %c0_101 = arith.constant 0 : index
    %302 = vector.load %arg16[%c1_100, %301, %c0_101] : memref<2x16x96xf32, #tpu.memory_space<vmem>>, vector<1x2x96xf32>
    %303 = vector.shape_cast %302 : vector<1x2x96xf32> to vector<2x96xf32>
    %304 = vector.extract_strided_slice %303 {offsets = [0, 0], sizes = [2, 32], strides = [1, 1]} : vector<2x96xf32> to vector<2x32xf32>
    %305 = vector.extract_strided_slice %271 {offsets = [0, 0], sizes = [2, 32], strides = [1, 1]} : vector<2x96xf32> to vector<2x32xf32>
    %306 = arith.addf %304, %305 : vector<2x32xf32>
    %307 = arith.negf %306 : vector<2x32xf32>
    %308 = math.exp %307 : vector<2x32xf32>
    %cst_102 = arith.constant 1.000000e+00 : f32
    %309 = vector.broadcast %cst_102 : f32 to vector<2x32xf32>
    %310 = arith.addf %309, %308 : vector<2x32xf32>
    %311 = arith.divf %309, %310 : vector<2x32xf32>
    %312 = vector.extract_strided_slice %303 {offsets = [0, 32], sizes = [2, 32], strides = [1, 1]} : vector<2x96xf32> to vector<2x32xf32>
    %313 = vector.extract_strided_slice %271 {offsets = [0, 32], sizes = [2, 32], strides = [1, 1]} : vector<2x96xf32> to vector<2x32xf32>
    %314 = arith.addf %312, %313 : vector<2x32xf32>
    %315 = arith.negf %314 : vector<2x32xf32>
    %316 = math.exp %315 : vector<2x32xf32>
    %cst_103 = arith.constant 1.000000e+00 : f32
    %317 = vector.broadcast %cst_103 : f32 to vector<2x32xf32>
    %318 = arith.addf %317, %316 : vector<2x32xf32>
    %319 = arith.divf %317, %318 : vector<2x32xf32>
    %320 = vector.extract_strided_slice %303 {offsets = [0, 64], sizes = [2, 32], strides = [1, 1]} : vector<2x96xf32> to vector<2x32xf32>
    %321 = vector.extract_strided_slice %271 {offsets = [0, 64], sizes = [2, 32], strides = [1, 1]} : vector<2x96xf32> to vector<2x32xf32>
    %322 = arith.mulf %311, %321 : vector<2x32xf32>
    %323 = arith.addf %320, %322 : vector<2x32xf32>
    %324 = math.tanh %323 : vector<2x32xf32>
    %cst_104 = arith.constant 1.000000e+00 : f32
    %325 = vector.broadcast %cst_104 : f32 to vector<2x32xf32>
    %326 = arith.subf %325, %319 : vector<2x32xf32>
    %327 = arith.mulf %326, %324 : vector<2x32xf32>
    %328 = arith.mulf %319, %252 : vector<2x32xf32>
    %329 = arith.addf %327, %328 : vector<2x32xf32>
    %c0_105 = arith.constant 0 : index
    %330 = arith.index_cast %262 : i32 to index
    %c0_106 = arith.constant 0 : index
    %331 = vector.load %arg15[%c0_105, %330, %c0_106] : memref<2x16x32xf32, #tpu.memory_space<vmem>>, vector<1x2x32xf32>
    %332 = vector.shape_cast %331 : vector<1x2x32xf32> to vector<2x32xf32>
    %333 = vector.shape_cast %300 : vector<2x32xf32> to vector<1x2x32xf32>
    tpu.vector_store %arg15[%c0_105, %330, %c0_106], %333 {strides = array<i32>} : memref<2x16x32xf32, #tpu.memory_space<vmem>>, vector<1x2x32xf32>,
    %c1_107 = arith.constant 1 : index
    %334 = arith.index_cast %265 : i32 to index
    %c0_108 = arith.constant 0 : index
    %335 = vector.load %arg15[%c1_107, %334, %c0_108] : memref<2x16x32xf32, #tpu.memory_space<vmem>>, vector<1x2x32xf32>
    %336 = vector.shape_cast %335 : vector<1x2x32xf32> to vector<2x32xf32>
    %337 = vector.shape_cast %329 : vector<2x32xf32> to vector<1x2x32xf32>
    tpu.vector_store %arg15[%c1_107, %334, %c0_108], %337 {strides = array<i32>} : memref<2x16x32xf32, #tpu.memory_space<vmem>>, vector<1x2x32xf32>,
    %c4_i32 = arith.constant 4 : i32
    %c2_i32_109 = arith.constant 2 : i32
    %338 = arith.muli %c4_i32, %c2_i32_109 : i32
    %339 = tpu.assume_multiple %338, 2 : i32
    %c7_i32_110 = arith.constant 7 : i32
    %340 = arith.subi %c7_i32_110, %c4_i32 : i32
    %c2_i32_111 = arith.constant 2 : i32
    %341 = arith.muli %340, %c2_i32_111 : i32
    %342 = tpu.assume_multiple %341, 2 : i32
    %cst_112 = arith.constant dense<0.000000e+00> : vector<2x96xf32>
    %343 = tpu.matmul %300, %22, %cst_112 {dimension_numbers = #tpu.dot_dimension_numbers<[1], [0], [0], [1], [0, 0, 1, 1], [], []>} : vector<2x32xf32>, vector<32x96xf32>, vector<2x96xf32> -> vector<2x96xf32>
    %344 = vector.broadcast %26 : vector<1x96xf32> to vector<2x96xf32>
    %345 = arith.addf %343, %344 : vector<2x96xf32>
    %cst_113 = arith.constant dense<0.000000e+00> : vector<2x96xf32>
    %346 = tpu.matmul %329, %24, %cst_113 {dimension_numbers = #tpu.dot_dimension_numbers<[1], [0], [0], [1], [0, 0, 1, 1], [], []>} : vector<2x32xf32>, vector<32x96xf32>, vector<2x96xf32> -> vector<2x96xf32>
    %347 = vector.broadcast %28 : vector<1x96xf32> to vector<2x96xf32>
    %348 = arith.addf %346, %347 : vector<2x96xf32>
    %c0_114 = arith.constant 0 : index
    %349 = arith.index_cast %339 : i32 to index
    %c0_115 = arith.constant 0 : index
    %350 = vector.load %arg16[%c0_114, %349, %c0_115] : memref<2x16x96xf32, #tpu.memory_space<vmem>>, vector<1x2x96xf32>
    %351 = vector.shape_cast %350 : vector<1x2x96xf32> to vector<2x96xf32>
    %352 = vector.extract_strided_slice %351 {offsets = [0, 0], sizes = [2, 32], strides = [1, 1]} : vector<2x96xf32> to vector<2x32xf32>
    %353 = vector.extract_strided_slice %345 {offsets = [0, 0], sizes = [2, 32], strides = [1, 1]} : vector<2x96xf32> to vector<2x32xf32>
    %354 = arith.addf %352, %353 : vector<2x32xf32>
    %355 = arith.negf %354 : vector<2x32xf32>
    %356 = math.exp %355 : vector<2x32xf32>
    %cst_116 = arith.constant 1.000000e+00 : f32
    %357 = vector.broadcast %cst_116 : f32 to vector<2x32xf32>
    %358 = arith.addf %357, %356 : vector<2x32xf32>
    %359 = arith.divf %357, %358 : vector<2x32xf32>
    %360 = vector.extract_strided_slice %351 {offsets = [0, 32], sizes = [2, 32], strides = [1, 1]} : vector<2x96xf32> to vector<2x32xf32>
    %361 = vector.extract_strided_slice %345 {offsets = [0, 32], sizes = [2, 32], strides = [1, 1]} : vector<2x96xf32> to vector<2x32xf32>
    %362 = arith.addf %360, %361 : vector<2x32xf32>
    %363 = arith.negf %362 : vector<2x32xf32>
    %364 = math.exp %363 : vector<2x32xf32>
    %cst_117 = arith.constant 1.000000e+00 : f32
    %365 = vector.broadcast %cst_117 : f32 to vector<2x32xf32>
    %366 = arith.addf %365, %364 : vector<2x32xf32>
    %367 = arith.divf %365, %366 : vector<2x32xf32>
    %368 = vector.extract_strided_slice %351 {offsets = [0, 64], sizes = [2, 32], strides = [1, 1]} : vector<2x96xf32> to vector<2x32xf32>
    %369 = vector.extract_strided_slice %345 {offsets = [0, 64], sizes = [2, 32], strides = [1, 1]} : vector<2x96xf32> to vector<2x32xf32>
    %370 = arith.mulf %359, %369 : vector<2x32xf32>
    %371 = arith.addf %368, %370 : vector<2x32xf32>
    %372 = math.tanh %371 : vector<2x32xf32>
    %cst_118 = arith.constant 1.000000e+00 : f32
    %373 = vector.broadcast %cst_118 : f32 to vector<2x32xf32>
    %374 = arith.subf %373, %367 : vector<2x32xf32>
    %375 = arith.mulf %374, %372 : vector<2x32xf32>
    %376 = arith.mulf %367, %300 : vector<2x32xf32>
    %377 = arith.addf %375, %376 : vector<2x32xf32>
    %c1_119 = arith.constant 1 : index
    %378 = arith.index_cast %342 : i32 to index
    %c0_120 = arith.constant 0 : index
    %379 = vector.load %arg16[%c1_119, %378, %c0_120] : memref<2x16x96xf32, #tpu.memory_space<vmem>>, vector<1x2x96xf32>
    %380 = vector.shape_cast %379 : vector<1x2x96xf32> to vector<2x96xf32>
    %381 = vector.extract_strided_slice %380 {offsets = [0, 0], sizes = [2, 32], strides = [1, 1]} : vector<2x96xf32> to vector<2x32xf32>
    %382 = vector.extract_strided_slice %348 {offsets = [0, 0], sizes = [2, 32], strides = [1, 1]} : vector<2x96xf32> to vector<2x32xf32>
    %383 = arith.addf %381, %382 : vector<2x32xf32>
    %384 = arith.negf %383 : vector<2x32xf32>
    %385 = math.exp %384 : vector<2x32xf32>
    %cst_121 = arith.constant 1.000000e+00 : f32
    %386 = vector.broadcast %cst_121 : f32 to vector<2x32xf32>
    %387 = arith.addf %386, %385 : vector<2x32xf32>
    %388 = arith.divf %386, %387 : vector<2x32xf32>
    %389 = vector.extract_strided_slice %380 {offsets = [0, 32], sizes = [2, 32], strides = [1, 1]} : vector<2x96xf32> to vector<2x32xf32>
    %390 = vector.extract_strided_slice %348 {offsets = [0, 32], sizes = [2, 32], strides = [1, 1]} : vector<2x96xf32> to vector<2x32xf32>
    %391 = arith.addf %389, %390 : vector<2x32xf32>
    %392 = arith.negf %391 : vector<2x32xf32>
    %393 = math.exp %392 : vector<2x32xf32>
    %cst_122 = arith.constant 1.000000e+00 : f32
    %394 = vector.broadcast %cst_122 : f32 to vector<2x32xf32>
    %395 = arith.addf %394, %393 : vector<2x32xf32>
    %396 = arith.divf %394, %395 : vector<2x32xf32>
    %397 = vector.extract_strided_slice %380 {offsets = [0, 64], sizes = [2, 32], strides = [1, 1]} : vector<2x96xf32> to vector<2x32xf32>
    %398 = vector.extract_strided_slice %348 {offsets = [0, 64], sizes = [2, 32], strides = [1, 1]} : vector<2x96xf32> to vector<2x32xf32>
    %399 = arith.mulf %388, %398 : vector<2x32xf32>
    %400 = arith.addf %397, %399 : vector<2x32xf32>
    %401 = math.tanh %400 : vector<2x32xf32>
    %cst_123 = arith.constant 1.000000e+00 : f32
    %402 = vector.broadcast %cst_123 : f32 to vector<2x32xf32>
    %403 = arith.subf %402, %396 : vector<2x32xf32>
    %404 = arith.mulf %403, %401 : vector<2x32xf32>
    %405 = arith.mulf %396, %329 : vector<2x32xf32>
    %406 = arith.addf %404, %405 : vector<2x32xf32>
    %c0_124 = arith.constant 0 : index
    %407 = arith.index_cast %339 : i32 to index
    %c0_125 = arith.constant 0 : index
    %408 = vector.load %arg15[%c0_124, %407, %c0_125] : memref<2x16x32xf32, #tpu.memory_space<vmem>>, vector<1x2x32xf32>
    %409 = vector.shape_cast %408 : vector<1x2x32xf32> to vector<2x32xf32>
    %410 = vector.shape_cast %377 : vector<2x32xf32> to vector<1x2x32xf32>
    tpu.vector_store %arg15[%c0_124, %407, %c0_125], %410 {strides = array<i32>} : memref<2x16x32xf32, #tpu.memory_space<vmem>>, vector<1x2x32xf32>,
    %c1_126 = arith.constant 1 : index
    %411 = arith.index_cast %342 : i32 to index
    %c0_127 = arith.constant 0 : index
    %412 = vector.load %arg15[%c1_126, %411, %c0_127] : memref<2x16x32xf32, #tpu.memory_space<vmem>>, vector<1x2x32xf32>
    %413 = vector.shape_cast %412 : vector<1x2x32xf32> to vector<2x32xf32>
    %414 = vector.shape_cast %406 : vector<2x32xf32> to vector<1x2x32xf32>
    tpu.vector_store %arg15[%c1_126, %411, %c0_127], %414 {strides = array<i32>} : memref<2x16x32xf32, #tpu.memory_space<vmem>>, vector<1x2x32xf32>,
    %c5_i32 = arith.constant 5 : i32
    %c2_i32_128 = arith.constant 2 : i32
    %415 = arith.muli %c5_i32, %c2_i32_128 : i32
    %416 = tpu.assume_multiple %415, 2 : i32
    %c7_i32_129 = arith.constant 7 : i32
    %417 = arith.subi %c7_i32_129, %c5_i32 : i32
    %c2_i32_130 = arith.constant 2 : i32
    %418 = arith.muli %417, %c2_i32_130 : i32
    %419 = tpu.assume_multiple %418, 2 : i32
    %cst_131 = arith.constant dense<0.000000e+00> : vector<2x96xf32>
    %420 = tpu.matmul %377, %22, %cst_131 {dimension_numbers = #tpu.dot_dimension_numbers<[1], [0], [0], [1], [0, 0, 1, 1], [], []>} : vector<2x32xf32>, vector<32x96xf32>, vector<2x96xf32> -> vector<2x96xf32>
    %421 = vector.broadcast %26 : vector<1x96xf32> to vector<2x96xf32>
    %422 = arith.addf %420, %421 : vector<2x96xf32>
    %cst_132 = arith.constant dense<0.000000e+00> : vector<2x96xf32>
    %423 = tpu.matmul %406, %24, %cst_132 {dimension_numbers = #tpu.dot_dimension_numbers<[1], [0], [0], [1], [0, 0, 1, 1], [], []>} : vector<2x32xf32>, vector<32x96xf32>, vector<2x96xf32> -> vector<2x96xf32>
    %424 = vector.broadcast %28 : vector<1x96xf32> to vector<2x96xf32>
    %425 = arith.addf %423, %424 : vector<2x96xf32>
    %c0_133 = arith.constant 0 : index
    %426 = arith.index_cast %416 : i32 to index
    %c0_134 = arith.constant 0 : index
    %427 = vector.load %arg16[%c0_133, %426, %c0_134] : memref<2x16x96xf32, #tpu.memory_space<vmem>>, vector<1x2x96xf32>
    %428 = vector.shape_cast %427 : vector<1x2x96xf32> to vector<2x96xf32>
    %429 = vector.extract_strided_slice %428 {offsets = [0, 0], sizes = [2, 32], strides = [1, 1]} : vector<2x96xf32> to vector<2x32xf32>
    %430 = vector.extract_strided_slice %422 {offsets = [0, 0], sizes = [2, 32], strides = [1, 1]} : vector<2x96xf32> to vector<2x32xf32>
    %431 = arith.addf %429, %430 : vector<2x32xf32>
    %432 = arith.negf %431 : vector<2x32xf32>
    %433 = math.exp %432 : vector<2x32xf32>
    %cst_135 = arith.constant 1.000000e+00 : f32
    %434 = vector.broadcast %cst_135 : f32 to vector<2x32xf32>
    %435 = arith.addf %434, %433 : vector<2x32xf32>
    %436 = arith.divf %434, %435 : vector<2x32xf32>
    %437 = vector.extract_strided_slice %428 {offsets = [0, 32], sizes = [2, 32], strides = [1, 1]} : vector<2x96xf32> to vector<2x32xf32>
    %438 = vector.extract_strided_slice %422 {offsets = [0, 32], sizes = [2, 32], strides = [1, 1]} : vector<2x96xf32> to vector<2x32xf32>
    %439 = arith.addf %437, %438 : vector<2x32xf32>
    %440 = arith.negf %439 : vector<2x32xf32>
    %441 = math.exp %440 : vector<2x32xf32>
    %cst_136 = arith.constant 1.000000e+00 : f32
    %442 = vector.broadcast %cst_136 : f32 to vector<2x32xf32>
    %443 = arith.addf %442, %441 : vector<2x32xf32>
    %444 = arith.divf %442, %443 : vector<2x32xf32>
    %445 = vector.extract_strided_slice %428 {offsets = [0, 64], sizes = [2, 32], strides = [1, 1]} : vector<2x96xf32> to vector<2x32xf32>
    %446 = vector.extract_strided_slice %422 {offsets = [0, 64], sizes = [2, 32], strides = [1, 1]} : vector<2x96xf32> to vector<2x32xf32>
    %447 = arith.mulf %436, %446 : vector<2x32xf32>
    %448 = arith.addf %445, %447 : vector<2x32xf32>
    %449 = math.tanh %448 : vector<2x32xf32>
    %cst_137 = arith.constant 1.000000e+00 : f32
    %450 = vector.broadcast %cst_137 : f32 to vector<2x32xf32>
    %451 = arith.subf %450, %444 : vector<2x32xf32>
    %452 = arith.mulf %451, %449 : vector<2x32xf32>
    %453 = arith.mulf %444, %377 : vector<2x32xf32>
    %454 = arith.addf %452, %453 : vector<2x32xf32>
    %c1_138 = arith.constant 1 : index
    %455 = arith.index_cast %419 : i32 to index
    %c0_139 = arith.constant 0 : index
    %456 = vector.load %arg16[%c1_138, %455, %c0_139] : memref<2x16x96xf32, #tpu.memory_space<vmem>>, vector<1x2x96xf32>
    %457 = vector.shape_cast %456 : vector<1x2x96xf32> to vector<2x96xf32>
    %458 = vector.extract_strided_slice %457 {offsets = [0, 0], sizes = [2, 32], strides = [1, 1]} : vector<2x96xf32> to vector<2x32xf32>
    %459 = vector.extract_strided_slice %425 {offsets = [0, 0], sizes = [2, 32], strides = [1, 1]} : vector<2x96xf32> to vector<2x32xf32>
    %460 = arith.addf %458, %459 : vector<2x32xf32>
    %461 = arith.negf %460 : vector<2x32xf32>
    %462 = math.exp %461 : vector<2x32xf32>
    %cst_140 = arith.constant 1.000000e+00 : f32
    %463 = vector.broadcast %cst_140 : f32 to vector<2x32xf32>
    %464 = arith.addf %463, %462 : vector<2x32xf32>
    %465 = arith.divf %463, %464 : vector<2x32xf32>
    %466 = vector.extract_strided_slice %457 {offsets = [0, 32], sizes = [2, 32], strides = [1, 1]} : vector<2x96xf32> to vector<2x32xf32>
    %467 = vector.extract_strided_slice %425 {offsets = [0, 32], sizes = [2, 32], strides = [1, 1]} : vector<2x96xf32> to vector<2x32xf32>
    %468 = arith.addf %466, %467 : vector<2x32xf32>
    %469 = arith.negf %468 : vector<2x32xf32>
    %470 = math.exp %469 : vector<2x32xf32>
    %cst_141 = arith.constant 1.000000e+00 : f32
    %471 = vector.broadcast %cst_141 : f32 to vector<2x32xf32>
    %472 = arith.addf %471, %470 : vector<2x32xf32>
    %473 = arith.divf %471, %472 : vector<2x32xf32>
    %474 = vector.extract_strided_slice %457 {offsets = [0, 64], sizes = [2, 32], strides = [1, 1]} : vector<2x96xf32> to vector<2x32xf32>
    %475 = vector.extract_strided_slice %425 {offsets = [0, 64], sizes = [2, 32], strides = [1, 1]} : vector<2x96xf32> to vector<2x32xf32>
    %476 = arith.mulf %465, %475 : vector<2x32xf32>
    %477 = arith.addf %474, %476 : vector<2x32xf32>
    %478 = math.tanh %477 : vector<2x32xf32>
    %cst_142 = arith.constant 1.000000e+00 : f32
    %479 = vector.broadcast %cst_142 : f32 to vector<2x32xf32>
    %480 = arith.subf %479, %473 : vector<2x32xf32>
    %481 = arith.mulf %480, %478 : vector<2x32xf32>
    %482 = arith.mulf %473, %406 : vector<2x32xf32>
    %483 = arith.addf %481, %482 : vector<2x32xf32>
    %c0_143 = arith.constant 0 : index
    %484 = arith.index_cast %416 : i32 to index
    %c0_144 = arith.constant 0 : index
    %485 = vector.load %arg15[%c0_143, %484, %c0_144] : memref<2x16x32xf32, #tpu.memory_space<vmem>>, vector<1x2x32xf32>
    %486 = vector.shape_cast %485 : vector<1x2x32xf32> to vector<2x32xf32>
    %487 = vector.shape_cast %454 : vector<2x32xf32> to vector<1x2x32xf32>
    tpu.vector_store %arg15[%c0_143, %484, %c0_144], %487 {strides = array<i32>} : memref<2x16x32xf32, #tpu.memory_space<vmem>>, vector<1x2x32xf32>,
    %c1_145 = arith.constant 1 : index
    %488 = arith.index_cast %419 : i32 to index
    %c0_146 = arith.constant 0 : index
    %489 = vector.load %arg15[%c1_145, %488, %c0_146] : memref<2x16x32xf32, #tpu.memory_space<vmem>>, vector<1x2x32xf32>
    %490 = vector.shape_cast %489 : vector<1x2x32xf32> to vector<2x32xf32>
    %491 = vector.shape_cast %483 : vector<2x32xf32> to vector<1x2x32xf32>
    tpu.vector_store %arg15[%c1_145, %488, %c0_146], %491 {strides = array<i32>} : memref<2x16x32xf32, #tpu.memory_space<vmem>>, vector<1x2x32xf32>,
    %c6_i32 = arith.constant 6 : i32
    %c2_i32_147 = arith.constant 2 : i32
    %492 = arith.muli %c6_i32, %c2_i32_147 : i32
    %493 = tpu.assume_multiple %492, 2 : i32
    %c7_i32_148 = arith.constant 7 : i32
    %494 = arith.subi %c7_i32_148, %c6_i32 : i32
    %c2_i32_149 = arith.constant 2 : i32
    %495 = arith.muli %494, %c2_i32_149 : i32
    %496 = tpu.assume_multiple %495, 2 : i32
    %cst_150 = arith.constant dense<0.000000e+00> : vector<2x96xf32>
    %497 = tpu.matmul %454, %22, %cst_150 {dimension_numbers = #tpu.dot_dimension_numbers<[1], [0], [0], [1], [0, 0, 1, 1], [], []>} : vector<2x32xf32>, vector<32x96xf32>, vector<2x96xf32> -> vector<2x96xf32>
    %498 = vector.broadcast %26 : vector<1x96xf32> to vector<2x96xf32>
    %499 = arith.addf %497, %498 : vector<2x96xf32>
    %cst_151 = arith.constant dense<0.000000e+00> : vector<2x96xf32>
    %500 = tpu.matmul %483, %24, %cst_151 {dimension_numbers = #tpu.dot_dimension_numbers<[1], [0], [0], [1], [0, 0, 1, 1], [], []>} : vector<2x32xf32>, vector<32x96xf32>, vector<2x96xf32> -> vector<2x96xf32>
    %501 = vector.broadcast %28 : vector<1x96xf32> to vector<2x96xf32>
    %502 = arith.addf %500, %501 : vector<2x96xf32>
    %c0_152 = arith.constant 0 : index
    %503 = arith.index_cast %493 : i32 to index
    %c0_153 = arith.constant 0 : index
    %504 = vector.load %arg16[%c0_152, %503, %c0_153] : memref<2x16x96xf32, #tpu.memory_space<vmem>>, vector<1x2x96xf32>
    %505 = vector.shape_cast %504 : vector<1x2x96xf32> to vector<2x96xf32>
    %506 = vector.extract_strided_slice %505 {offsets = [0, 0], sizes = [2, 32], strides = [1, 1]} : vector<2x96xf32> to vector<2x32xf32>
    %507 = vector.extract_strided_slice %499 {offsets = [0, 0], sizes = [2, 32], strides = [1, 1]} : vector<2x96xf32> to vector<2x32xf32>
    %508 = arith.addf %506, %507 : vector<2x32xf32>
    %509 = arith.negf %508 : vector<2x32xf32>
    %510 = math.exp %509 : vector<2x32xf32>
    %cst_154 = arith.constant 1.000000e+00 : f32
    %511 = vector.broadcast %cst_154 : f32 to vector<2x32xf32>
    %512 = arith.addf %511, %510 : vector<2x32xf32>
    %513 = arith.divf %511, %512 : vector<2x32xf32>
    %514 = vector.extract_strided_slice %505 {offsets = [0, 32], sizes = [2, 32], strides = [1, 1]} : vector<2x96xf32> to vector<2x32xf32>
    %515 = vector.extract_strided_slice %499 {offsets = [0, 32], sizes = [2, 32], strides = [1, 1]} : vector<2x96xf32> to vector<2x32xf32>
    %516 = arith.addf %514, %515 : vector<2x32xf32>
    %517 = arith.negf %516 : vector<2x32xf32>
    %518 = math.exp %517 : vector<2x32xf32>
    %cst_155 = arith.constant 1.000000e+00 : f32
    %519 = vector.broadcast %cst_155 : f32 to vector<2x32xf32>
    %520 = arith.addf %519, %518 : vector<2x32xf32>
    %521 = arith.divf %519, %520 : vector<2x32xf32>
    %522 = vector.extract_strided_slice %505 {offsets = [0, 64], sizes = [2, 32], strides = [1, 1]} : vector<2x96xf32> to vector<2x32xf32>
    %523 = vector.extract_strided_slice %499 {offsets = [0, 64], sizes = [2, 32], strides = [1, 1]} : vector<2x96xf32> to vector<2x32xf32>
    %524 = arith.mulf %513, %523 : vector<2x32xf32>
    %525 = arith.addf %522, %524 : vector<2x32xf32>
    %526 = math.tanh %525 : vector<2x32xf32>
    %cst_156 = arith.constant 1.000000e+00 : f32
    %527 = vector.broadcast %cst_156 : f32 to vector<2x32xf32>
    %528 = arith.subf %527, %521 : vector<2x32xf32>
    %529 = arith.mulf %528, %526 : vector<2x32xf32>
    %530 = arith.mulf %521, %454 : vector<2x32xf32>
    %531 = arith.addf %529, %530 : vector<2x32xf32>
    %c1_157 = arith.constant 1 : index
    %532 = arith.index_cast %496 : i32 to index
    %c0_158 = arith.constant 0 : index
    %533 = vector.load %arg16[%c1_157, %532, %c0_158] : memref<2x16x96xf32, #tpu.memory_space<vmem>>, vector<1x2x96xf32>
    %534 = vector.shape_cast %533 : vector<1x2x96xf32> to vector<2x96xf32>
    %535 = vector.extract_strided_slice %534 {offsets = [0, 0], sizes = [2, 32], strides = [1, 1]} : vector<2x96xf32> to vector<2x32xf32>
    %536 = vector.extract_strided_slice %502 {offsets = [0, 0], sizes = [2, 32], strides = [1, 1]} : vector<2x96xf32> to vector<2x32xf32>
    %537 = arith.addf %535, %536 : vector<2x32xf32>
    %538 = arith.negf %537 : vector<2x32xf32>
    %539 = math.exp %538 : vector<2x32xf32>
    %cst_159 = arith.constant 1.000000e+00 : f32
    %540 = vector.broadcast %cst_159 : f32 to vector<2x32xf32>
    %541 = arith.addf %540, %539 : vector<2x32xf32>
    %542 = arith.divf %540, %541 : vector<2x32xf32>
    %543 = vector.extract_strided_slice %534 {offsets = [0, 32], sizes = [2, 32], strides = [1, 1]} : vector<2x96xf32> to vector<2x32xf32>
    %544 = vector.extract_strided_slice %502 {offsets = [0, 32], sizes = [2, 32], strides = [1, 1]} : vector<2x96xf32> to vector<2x32xf32>
    %545 = arith.addf %543, %544 : vector<2x32xf32>
    %546 = arith.negf %545 : vector<2x32xf32>
    %547 = math.exp %546 : vector<2x32xf32>
    %cst_160 = arith.constant 1.000000e+00 : f32
    %548 = vector.broadcast %cst_160 : f32 to vector<2x32xf32>
    %549 = arith.addf %548, %547 : vector<2x32xf32>
    %550 = arith.divf %548, %549 : vector<2x32xf32>
    %551 = vector.extract_strided_slice %534 {offsets = [0, 64], sizes = [2, 32], strides = [1, 1]} : vector<2x96xf32> to vector<2x32xf32>
    %552 = vector.extract_strided_slice %502 {offsets = [0, 64], sizes = [2, 32], strides = [1, 1]} : vector<2x96xf32> to vector<2x32xf32>
    %553 = arith.mulf %542, %552 : vector<2x32xf32>
    %554 = arith.addf %551, %553 : vector<2x32xf32>
    %555 = math.tanh %554 : vector<2x32xf32>
    %cst_161 = arith.constant 1.000000e+00 : f32
    %556 = vector.broadcast %cst_161 : f32 to vector<2x32xf32>
    %557 = arith.subf %556, %550 : vector<2x32xf32>
    %558 = arith.mulf %557, %555 : vector<2x32xf32>
    %559 = arith.mulf %550, %483 : vector<2x32xf32>
    %560 = arith.addf %558, %559 : vector<2x32xf32>
    %c0_162 = arith.constant 0 : index
    %561 = arith.index_cast %493 : i32 to index
    %c0_163 = arith.constant 0 : index
    %562 = vector.load %arg15[%c0_162, %561, %c0_163] : memref<2x16x32xf32, #tpu.memory_space<vmem>>, vector<1x2x32xf32>
    %563 = vector.shape_cast %562 : vector<1x2x32xf32> to vector<2x32xf32>
    %564 = vector.shape_cast %531 : vector<2x32xf32> to vector<1x2x32xf32>
    tpu.vector_store %arg15[%c0_162, %561, %c0_163], %564 {strides = array<i32>} : memref<2x16x32xf32, #tpu.memory_space<vmem>>, vector<1x2x32xf32>,
    %c1_164 = arith.constant 1 : index
    %565 = arith.index_cast %496 : i32 to index
    %c0_165 = arith.constant 0 : index
    %566 = vector.load %arg15[%c1_164, %565, %c0_165] : memref<2x16x32xf32, #tpu.memory_space<vmem>>, vector<1x2x32xf32>
    %567 = vector.shape_cast %566 : vector<1x2x32xf32> to vector<2x32xf32>
    %568 = vector.shape_cast %560 : vector<2x32xf32> to vector<1x2x32xf32>
    tpu.vector_store %arg15[%c1_164, %565, %c0_165], %568 {strides = array<i32>} : memref<2x16x32xf32, #tpu.memory_space<vmem>>, vector<1x2x32xf32>,
    %c7_i32_166 = arith.constant 7 : i32
    %c2_i32_167 = arith.constant 2 : i32
    %569 = arith.muli %c7_i32_166, %c2_i32_167 : i32
    %570 = tpu.assume_multiple %569, 2 : i32
    %c7_i32_168 = arith.constant 7 : i32
    %571 = arith.subi %c7_i32_168, %c7_i32_166 : i32
    %c2_i32_169 = arith.constant 2 : i32
    %572 = arith.muli %571, %c2_i32_169 : i32
    %573 = tpu.assume_multiple %572, 2 : i32
    %cst_170 = arith.constant dense<0.000000e+00> : vector<2x96xf32>
    %574 = tpu.matmul %531, %22, %cst_170 {dimension_numbers = #tpu.dot_dimension_numbers<[1], [0], [0], [1], [0, 0, 1, 1], [], []>} : vector<2x32xf32>, vector<32x96xf32>, vector<2x96xf32> -> vector<2x96xf32>
    %575 = vector.broadcast %26 : vector<1x96xf32> to vector<2x96xf32>
    %576 = arith.addf %574, %575 : vector<2x96xf32>
    %cst_171 = arith.constant dense<0.000000e+00> : vector<2x96xf32>
    %577 = tpu.matmul %560, %24, %cst_171 {dimension_numbers = #tpu.dot_dimension_numbers<[1], [0], [0], [1], [0, 0, 1, 1], [], []>} : vector<2x32xf32>, vector<32x96xf32>, vector<2x96xf32> -> vector<2x96xf32>
    %578 = vector.broadcast %28 : vector<1x96xf32> to vector<2x96xf32>
    %579 = arith.addf %577, %578 : vector<2x96xf32>
    %c0_172 = arith.constant 0 : index
    %580 = arith.index_cast %570 : i32 to index
    %c0_173 = arith.constant 0 : index
    %581 = vector.load %arg16[%c0_172, %580, %c0_173] : memref<2x16x96xf32, #tpu.memory_space<vmem>>, vector<1x2x96xf32>
    %582 = vector.shape_cast %581 : vector<1x2x96xf32> to vector<2x96xf32>
    %583 = vector.extract_strided_slice %582 {offsets = [0, 0], sizes = [2, 32], strides = [1, 1]} : vector<2x96xf32> to vector<2x32xf32>
    %584 = vector.extract_strided_slice %576 {offsets = [0, 0], sizes = [2, 32], strides = [1, 1]} : vector<2x96xf32> to vector<2x32xf32>
    %585 = arith.addf %583, %584 : vector<2x32xf32>
    %586 = arith.negf %585 : vector<2x32xf32>
    %587 = math.exp %586 : vector<2x32xf32>
    %cst_174 = arith.constant 1.000000e+00 : f32
    %588 = vector.broadcast %cst_174 : f32 to vector<2x32xf32>
    %589 = arith.addf %588, %587 : vector<2x32xf32>
    %590 = arith.divf %588, %589 : vector<2x32xf32>
    %591 = vector.extract_strided_slice %582 {offsets = [0, 32], sizes = [2, 32], strides = [1, 1]} : vector<2x96xf32> to vector<2x32xf32>
    %592 = vector.extract_strided_slice %576 {offsets = [0, 32], sizes = [2, 32], strides = [1, 1]} : vector<2x96xf32> to vector<2x32xf32>
    %593 = arith.addf %591, %592 : vector<2x32xf32>
    %594 = arith.negf %593 : vector<2x32xf32>
    %595 = math.exp %594 : vector<2x32xf32>
    %cst_175 = arith.constant 1.000000e+00 : f32
    %596 = vector.broadcast %cst_175 : f32 to vector<2x32xf32>
    %597 = arith.addf %596, %595 : vector<2x32xf32>
    %598 = arith.divf %596, %597 : vector<2x32xf32>
    %599 = vector.extract_strided_slice %582 {offsets = [0, 64], sizes = [2, 32], strides = [1, 1]} : vector<2x96xf32> to vector<2x32xf32>
    %600 = vector.extract_strided_slice %576 {offsets = [0, 64], sizes = [2, 32], strides = [1, 1]} : vector<2x96xf32> to vector<2x32xf32>
    %601 = arith.mulf %590, %600 : vector<2x32xf32>
    %602 = arith.addf %599, %601 : vector<2x32xf32>
    %603 = math.tanh %602 : vector<2x32xf32>
    %cst_176 = arith.constant 1.000000e+00 : f32
    %604 = vector.broadcast %cst_176 : f32 to vector<2x32xf32>
    %605 = arith.subf %604, %598 : vector<2x32xf32>
    %606 = arith.mulf %605, %603 : vector<2x32xf32>
    %607 = arith.mulf %598, %531 : vector<2x32xf32>
    %608 = arith.addf %606, %607 : vector<2x32xf32>
    %c1_177 = arith.constant 1 : index
    %609 = arith.index_cast %573 : i32 to index
    %c0_178 = arith.constant 0 : index
    %610 = vector.load %arg16[%c1_177, %609, %c0_178] : memref<2x16x96xf32, #tpu.memory_space<vmem>>, vector<1x2x96xf32>
    %611 = vector.shape_cast %610 : vector<1x2x96xf32> to vector<2x96xf32>
    %612 = vector.extract_strided_slice %611 {offsets = [0, 0], sizes = [2, 32], strides = [1, 1]} : vector<2x96xf32> to vector<2x32xf32>
    %613 = vector.extract_strided_slice %579 {offsets = [0, 0], sizes = [2, 32], strides = [1, 1]} : vector<2x96xf32> to vector<2x32xf32>
    %614 = arith.addf %612, %613 : vector<2x32xf32>
    %615 = arith.negf %614 : vector<2x32xf32>
    %616 = math.exp %615 : vector<2x32xf32>
    %cst_179 = arith.constant 1.000000e+00 : f32
    %617 = vector.broadcast %cst_179 : f32 to vector<2x32xf32>
    %618 = arith.addf %617, %616 : vector<2x32xf32>
    %619 = arith.divf %617, %618 : vector<2x32xf32>
    %620 = vector.extract_strided_slice %611 {offsets = [0, 32], sizes = [2, 32], strides = [1, 1]} : vector<2x96xf32> to vector<2x32xf32>
    %621 = vector.extract_strided_slice %579 {offsets = [0, 32], sizes = [2, 32], strides = [1, 1]} : vector<2x96xf32> to vector<2x32xf32>
    %622 = arith.addf %620, %621 : vector<2x32xf32>
    %623 = arith.negf %622 : vector<2x32xf32>
    %624 = math.exp %623 : vector<2x32xf32>
    %cst_180 = arith.constant 1.000000e+00 : f32
    %625 = vector.broadcast %cst_180 : f32 to vector<2x32xf32>
    %626 = arith.addf %625, %624 : vector<2x32xf32>
    %627 = arith.divf %625, %626 : vector<2x32xf32>
    %628 = vector.extract_strided_slice %611 {offsets = [0, 64], sizes = [2, 32], strides = [1, 1]} : vector<2x96xf32> to vector<2x32xf32>
    %629 = vector.extract_strided_slice %579 {offsets = [0, 64], sizes = [2, 32], strides = [1, 1]} : vector<2x96xf32> to vector<2x32xf32>
    %630 = arith.mulf %619, %629 : vector<2x32xf32>
    %631 = arith.addf %628, %630 : vector<2x32xf32>
    %632 = math.tanh %631 : vector<2x32xf32>
    %cst_181 = arith.constant 1.000000e+00 : f32
    %633 = vector.broadcast %cst_181 : f32 to vector<2x32xf32>
    %634 = arith.subf %633, %627 : vector<2x32xf32>
    %635 = arith.mulf %634, %632 : vector<2x32xf32>
    %636 = arith.mulf %627, %560 : vector<2x32xf32>
    %637 = arith.addf %635, %636 : vector<2x32xf32>
    %c0_182 = arith.constant 0 : index
    %638 = arith.index_cast %570 : i32 to index
    %c0_183 = arith.constant 0 : index
    %639 = vector.load %arg15[%c0_182, %638, %c0_183] : memref<2x16x32xf32, #tpu.memory_space<vmem>>, vector<1x2x32xf32>
    %640 = vector.shape_cast %639 : vector<1x2x32xf32> to vector<2x32xf32>
    %641 = vector.shape_cast %608 : vector<2x32xf32> to vector<1x2x32xf32>
    tpu.vector_store %arg15[%c0_182, %638, %c0_183], %641 {strides = array<i32>} : memref<2x16x32xf32, #tpu.memory_space<vmem>>, vector<1x2x32xf32>,
    %c1_184 = arith.constant 1 : index
    %642 = arith.index_cast %573 : i32 to index
    %c0_185 = arith.constant 0 : index
    %643 = vector.load %arg15[%c1_184, %642, %c0_185] : memref<2x16x32xf32, #tpu.memory_space<vmem>>, vector<1x2x32xf32>
    %644 = vector.shape_cast %643 : vector<1x2x32xf32> to vector<2x32xf32>
    %645 = vector.shape_cast %637 : vector<2x32xf32> to vector<1x2x32xf32>
    tpu.vector_store %arg15[%c1_184, %642, %c0_185], %645 {strides = array<i32>} : memref<2x16x32xf32, #tpu.memory_space<vmem>>, vector<1x2x32xf32>,
    %c8_i32 = arith.constant 8 : i32
    %c0_186 = arith.constant 0 : index
    %c0_187 = arith.constant 0 : index
    %c0_188 = arith.constant 0 : index
    %646 = vector.load %arg15[%c0_186, %c0_187, %c0_188] : memref<2x16x32xf32, #tpu.memory_space<vmem>>, vector<1x16x32xf32>
    %647 = vector.shape_cast %646 : vector<1x16x32xf32> to vector<16x32xf32>
    %c1_189 = arith.constant 1 : index
    %c0_190 = arith.constant 0 : index
    %c0_191 = arith.constant 0 : index
    %648 = vector.load %arg15[%c1_189, %c0_190, %c0_191] : memref<2x16x32xf32, #tpu.memory_space<vmem>>, vector<1x16x32xf32>
    %649 = vector.shape_cast %648 : vector<1x16x32xf32> to vector<16x32xf32>
    %c0_192 = arith.constant 0 : index
    %c0_193 = arith.constant 0 : index
    %c0_194 = arith.constant 0 : index
    %c0_195 = arith.constant 0 : index
    %650 = vector.load %arg6[%c0_192, %c0_193, %c0_194, %c0_195] : memref<2x2x32x96xf32, #tpu.memory_space<vmem>>, vector<1x1x32x96xf32>
    %651 = vector.shape_cast %650 : vector<1x1x32x96xf32> to vector<32x96xf32>
    %cst_196 = arith.constant dense<0.000000e+00> : vector<16x96xf32>
    %652 = tpu.matmul %647, %651, %cst_196 {dimension_numbers = #tpu.dot_dimension_numbers<[1], [0], [0], [1], [0, 0, 1, 1], [], []>} : vector<16x32xf32>, vector<32x96xf32>, vector<16x96xf32> -> vector<16x96xf32>
    %c0_197 = arith.constant 0 : index
    %c1_198 = arith.constant 1 : index
    %c0_199 = arith.constant 0 : index
    %c0_200 = arith.constant 0 : index
    %653 = vector.load %arg6[%c0_197, %c1_198, %c0_199, %c0_200] : memref<2x2x32x96xf32, #tpu.memory_space<vmem>>, vector<1x1x32x96xf32>
    %654 = vector.shape_cast %653 : vector<1x1x32x96xf32> to vector<32x96xf32>
    %cst_201 = arith.constant dense<0.000000e+00> : vector<16x96xf32>
    %655 = tpu.matmul %649, %654, %cst_201 {dimension_numbers = #tpu.dot_dimension_numbers<[1], [0], [0], [1], [0, 0, 1, 1], [], []>} : vector<16x32xf32>, vector<32x96xf32>, vector<16x96xf32> -> vector<16x96xf32>
    %656 = arith.addf %652, %655 : vector<16x96xf32>
    %c0_202 = arith.constant 0 : index
    %c0_203 = arith.constant 0 : index
    %c0_204 = arith.constant 0 : index
    %657 = vector.load %arg8[%c0_202, %c0_203, %c0_204] : memref<2x1x96xf32, #tpu.memory_space<vmem>>, vector<1x1x96xf32>
    %658 = vector.shape_cast %657 : vector<1x1x96xf32> to vector<1x96xf32>
    %659 = vector.broadcast %658 : vector<1x96xf32> to vector<16x96xf32>
    %660 = arith.addf %656, %659 : vector<16x96xf32>
    %c0_205 = arith.constant 0 : index
    %c0_206 = arith.constant 0 : index
    %c0_207 = arith.constant 0 : index
    %661 = vector.load %arg16[%c0_205, %c0_206, %c0_207] : memref<2x16x96xf32, #tpu.memory_space<vmem>>, vector<1x16x96xf32>
    %662 = vector.shape_cast %661 : vector<1x16x96xf32> to vector<16x96xf32>
    %663 = vector.shape_cast %660 : vector<16x96xf32> to vector<1x16x96xf32>
    tpu.vector_store %arg16[%c0_205, %c0_206, %c0_207], %663 {strides = array<i32>} : memref<2x16x96xf32, #tpu.memory_space<vmem>>, vector<1x16x96xf32>,
    %c1_208 = arith.constant 1 : index
    %c0_209 = arith.constant 0 : index
    %c0_210 = arith.constant 0 : index
    %c0_211 = arith.constant 0 : index
    %664 = vector.load %arg6[%c1_208, %c0_209, %c0_210, %c0_211] : memref<2x2x32x96xf32, #tpu.memory_space<vmem>>, vector<1x1x32x96xf32>
    %665 = vector.shape_cast %664 : vector<1x1x32x96xf32> to vector<32x96xf32>
    %cst_212 = arith.constant dense<0.000000e+00> : vector<16x96xf32>
    %666 = tpu.matmul %647, %665, %cst_212 {dimension_numbers = #tpu.dot_dimension_numbers<[1], [0], [0], [1], [0, 0, 1, 1], [], []>} : vector<16x32xf32>, vector<32x96xf32>, vector<16x96xf32> -> vector<16x96xf32>
    %c1_213 = arith.constant 1 : index
    %c1_214 = arith.constant 1 : index
    %c0_215 = arith.constant 0 : index
    %c0_216 = arith.constant 0 : index
    %667 = vector.load %arg6[%c1_213, %c1_214, %c0_215, %c0_216] : memref<2x2x32x96xf32, #tpu.memory_space<vmem>>, vector<1x1x32x96xf32>
    %668 = vector.shape_cast %667 : vector<1x1x32x96xf32> to vector<32x96xf32>
    %cst_217 = arith.constant dense<0.000000e+00> : vector<16x96xf32>
    %669 = tpu.matmul %649, %668, %cst_217 {dimension_numbers = #tpu.dot_dimension_numbers<[1], [0], [0], [1], [0, 0, 1, 1], [], []>} : vector<16x32xf32>, vector<32x96xf32>, vector<16x96xf32> -> vector<16x96xf32>
    %670 = arith.addf %666, %669 : vector<16x96xf32>
    %c1_218 = arith.constant 1 : index
    %c0_219 = arith.constant 0 : index
    %c0_220 = arith.constant 0 : index
    %671 = vector.load %arg8[%c1_218, %c0_219, %c0_220] : memref<2x1x96xf32, #tpu.memory_space<vmem>>, vector<1x1x96xf32>
    %672 = vector.shape_cast %671 : vector<1x1x96xf32> to vector<1x96xf32>
    %673 = vector.broadcast %672 : vector<1x96xf32> to vector<16x96xf32>
    %674 = arith.addf %670, %673 : vector<16x96xf32>
    %c1_221 = arith.constant 1 : index
    %c0_222 = arith.constant 0 : index
    %c0_223 = arith.constant 0 : index
    %675 = vector.load %arg16[%c1_221, %c0_222, %c0_223] : memref<2x16x96xf32, #tpu.memory_space<vmem>>, vector<1x16x96xf32>
    %676 = vector.shape_cast %675 : vector<1x16x96xf32> to vector<16x96xf32>
    %677 = vector.shape_cast %674 : vector<16x96xf32> to vector<1x16x96xf32>
    tpu.vector_store %arg16[%c1_221, %c0_222, %c0_223], %677 {strides = array<i32>} : memref<2x16x96xf32, #tpu.memory_space<vmem>>, vector<1x16x96xf32>,
    %c0_224 = arith.constant 0 : index
    %c0_225 = arith.constant 0 : index
    %c0_226 = arith.constant 0 : index
    %678 = vector.load %arg7[%c0_224, %c0_225, %c0_226] : memref<2x32x96xf32, #tpu.memory_space<vmem>>, vector<1x32x96xf32>
    %679 = vector.shape_cast %678 : vector<1x32x96xf32> to vector<32x96xf32>
    %c0_227 = arith.constant 0 : index
    %c0_228 = arith.constant 0 : index
    %c0_229 = arith.constant 0 : index
    %680 = vector.load %arg9[%c0_227, %c0_228, %c0_229] : memref<2x1x96xf32, #tpu.memory_space<vmem>>, vector<1x1x96xf32>
    %681 = vector.shape_cast %680 : vector<1x1x96xf32> to vector<1x96xf32>
    %c1_230 = arith.constant 1 : index
    %c0_231 = arith.constant 0 : index
    %c0_232 = arith.constant 0 : index
    %682 = vector.load %arg9[%c1_230, %c0_231, %c0_232] : memref<2x1x96xf32, #tpu.memory_space<vmem>>, vector<1x1x96xf32>
    %683 = vector.shape_cast %682 : vector<1x1x96xf32> to vector<1x96xf32>
    %cst_233 = arith.constant 0.000000e+00 : f32
    %684 = vector.broadcast %cst_233 : f32 to vector<2x32xf32>
    %c0_i32_234 = arith.constant 0 : i32
    %c2_i32_235 = arith.constant 2 : i32
    %685 = arith.muli %c0_i32_234, %c2_i32_235 : i32
    %686 = tpu.assume_multiple %685, 2 : i32
    %cst_236 = arith.constant dense<0.000000e+00> : vector<2x96xf32>
    %687 = tpu.matmul %684, %679, %cst_236 {dimension_numbers = #tpu.dot_dimension_numbers<[1], [0], [0], [1], [0, 0, 1, 1], [], []>} : vector<2x32xf32>, vector<32x96xf32>, vector<2x96xf32> -> vector<2x96xf32>
    %688 = vector.broadcast %681 : vector<1x96xf32> to vector<2x96xf32>
    %689 = arith.addf %687, %688 : vector<2x96xf32>
    %c0_237 = arith.constant 0 : index
    %690 = arith.index_cast %686 : i32 to index
    %c0_238 = arith.constant 0 : index
    %691 = vector.load %arg16[%c0_237, %690, %c0_238] : memref<2x16x96xf32, #tpu.memory_space<vmem>>, vector<1x2x96xf32>
    %692 = vector.shape_cast %691 : vector<1x2x96xf32> to vector<2x96xf32>
    %693 = vector.extract_strided_slice %692 {offsets = [0, 0], sizes = [2, 32], strides = [1, 1]} : vector<2x96xf32> to vector<2x32xf32>
    %694 = vector.extract_strided_slice %689 {offsets = [0, 0], sizes = [2, 32], strides = [1, 1]} : vector<2x96xf32> to vector<2x32xf32>
    %695 = arith.addf %693, %694 : vector<2x32xf32>
    %696 = arith.negf %695 : vector<2x32xf32>
    %697 = math.exp %696 : vector<2x32xf32>
    %cst_239 = arith.constant 1.000000e+00 : f32
    %698 = vector.broadcast %cst_239 : f32 to vector<2x32xf32>
    %699 = arith.addf %698, %697 : vector<2x32xf32>
    %700 = arith.divf %698, %699 : vector<2x32xf32>
    %701 = vector.extract_strided_slice %692 {offsets = [0, 32], sizes = [2, 32], strides = [1, 1]} : vector<2x96xf32> to vector<2x32xf32>
    %702 = vector.extract_strided_slice %689 {offsets = [0, 32], sizes = [2, 32], strides = [1, 1]} : vector<2x96xf32> to vector<2x32xf32>
    %703 = arith.addf %701, %702 : vector<2x32xf32>
    %704 = arith.negf %703 : vector<2x32xf32>
    %705 = math.exp %704 : vector<2x32xf32>
    %cst_240 = arith.constant 1.000000e+00 : f32
    %706 = vector.broadcast %cst_240 : f32 to vector<2x32xf32>
    %707 = arith.addf %706, %705 : vector<2x32xf32>
    %708 = arith.divf %706, %707 : vector<2x32xf32>
    %709 = vector.extract_strided_slice %692 {offsets = [0, 64], sizes = [2, 32], strides = [1, 1]} : vector<2x96xf32> to vector<2x32xf32>
    %710 = vector.extract_strided_slice %689 {offsets = [0, 64], sizes = [2, 32], strides = [1, 1]} : vector<2x96xf32> to vector<2x32xf32>
    %711 = arith.mulf %700, %710 : vector<2x32xf32>
    %712 = arith.addf %709, %711 : vector<2x32xf32>
    %713 = math.tanh %712 : vector<2x32xf32>
    %cst_241 = arith.constant 1.000000e+00 : f32
    %714 = vector.broadcast %cst_241 : f32 to vector<2x32xf32>
    %715 = arith.subf %714, %708 : vector<2x32xf32>
    %716 = arith.mulf %715, %713 : vector<2x32xf32>
    %717 = arith.mulf %708, %684 : vector<2x32xf32>
    %718 = arith.addf %716, %717 : vector<2x32xf32>
    %c1_i32_242 = arith.constant 1 : i32
    %c2_i32_243 = arith.constant 2 : i32
    %719 = arith.muli %c1_i32_242, %c2_i32_243 : i32
    %720 = tpu.assume_multiple %719, 2 : i32
    %cst_244 = arith.constant dense<0.000000e+00> : vector<2x96xf32>
    %721 = tpu.matmul %718, %679, %cst_244 {dimension_numbers = #tpu.dot_dimension_numbers<[1], [0], [0], [1], [0, 0, 1, 1], [], []>} : vector<2x32xf32>, vector<32x96xf32>, vector<2x96xf32> -> vector<2x96xf32>
    %722 = vector.broadcast %681 : vector<1x96xf32> to vector<2x96xf32>
    %723 = arith.addf %721, %722 : vector<2x96xf32>
    %c0_245 = arith.constant 0 : index
    %724 = arith.index_cast %720 : i32 to index
    %c0_246 = arith.constant 0 : index
    %725 = vector.load %arg16[%c0_245, %724, %c0_246] : memref<2x16x96xf32, #tpu.memory_space<vmem>>, vector<1x2x96xf32>
    %726 = vector.shape_cast %725 : vector<1x2x96xf32> to vector<2x96xf32>
    %727 = vector.extract_strided_slice %726 {offsets = [0, 0], sizes = [2, 32], strides = [1, 1]} : vector<2x96xf32> to vector<2x32xf32>
    %728 = vector.extract_strided_slice %723 {offsets = [0, 0], sizes = [2, 32], strides = [1, 1]} : vector<2x96xf32> to vector<2x32xf32>
    %729 = arith.addf %727, %728 : vector<2x32xf32>
    %730 = arith.negf %729 : vector<2x32xf32>
    %731 = math.exp %730 : vector<2x32xf32>
    %cst_247 = arith.constant 1.000000e+00 : f32
    %732 = vector.broadcast %cst_247 : f32 to vector<2x32xf32>
    %733 = arith.addf %732, %731 : vector<2x32xf32>
    %734 = arith.divf %732, %733 : vector<2x32xf32>
    %735 = vector.extract_strided_slice %726 {offsets = [0, 32], sizes = [2, 32], strides = [1, 1]} : vector<2x96xf32> to vector<2x32xf32>
    %736 = vector.extract_strided_slice %723 {offsets = [0, 32], sizes = [2, 32], strides = [1, 1]} : vector<2x96xf32> to vector<2x32xf32>
    %737 = arith.addf %735, %736 : vector<2x32xf32>
    %738 = arith.negf %737 : vector<2x32xf32>
    %739 = math.exp %738 : vector<2x32xf32>
    %cst_248 = arith.constant 1.000000e+00 : f32
    %740 = vector.broadcast %cst_248 : f32 to vector<2x32xf32>
    %741 = arith.addf %740, %739 : vector<2x32xf32>
    %742 = arith.divf %740, %741 : vector<2x32xf32>
    %743 = vector.extract_strided_slice %726 {offsets = [0, 64], sizes = [2, 32], strides = [1, 1]} : vector<2x96xf32> to vector<2x32xf32>
    %744 = vector.extract_strided_slice %723 {offsets = [0, 64], sizes = [2, 32], strides = [1, 1]} : vector<2x96xf32> to vector<2x32xf32>
    %745 = arith.mulf %734, %744 : vector<2x32xf32>
    %746 = arith.addf %743, %745 : vector<2x32xf32>
    %747 = math.tanh %746 : vector<2x32xf32>
    %cst_249 = arith.constant 1.000000e+00 : f32
    %748 = vector.broadcast %cst_249 : f32 to vector<2x32xf32>
    %749 = arith.subf %748, %742 : vector<2x32xf32>
    %750 = arith.mulf %749, %747 : vector<2x32xf32>
    %751 = arith.mulf %742, %718 : vector<2x32xf32>
    %752 = arith.addf %750, %751 : vector<2x32xf32>
    %c2_i32_250 = arith.constant 2 : i32
    %c2_i32_251 = arith.constant 2 : i32
    %753 = arith.muli %c2_i32_250, %c2_i32_251 : i32
    %754 = tpu.assume_multiple %753, 2 : i32
    %cst_252 = arith.constant dense<0.000000e+00> : vector<2x96xf32>
    %755 = tpu.matmul %752, %679, %cst_252 {dimension_numbers = #tpu.dot_dimension_numbers<[1], [0], [0], [1], [0, 0, 1, 1], [], []>} : vector<2x32xf32>, vector<32x96xf32>, vector<2x96xf32> -> vector<2x96xf32>
    %756 = vector.broadcast %681 : vector<1x96xf32> to vector<2x96xf32>
    %757 = arith.addf %755, %756 : vector<2x96xf32>
    %c0_253 = arith.constant 0 : index
    %758 = arith.index_cast %754 : i32 to index
    %c0_254 = arith.constant 0 : index
    %759 = vector.load %arg16[%c0_253, %758, %c0_254] : memref<2x16x96xf32, #tpu.memory_space<vmem>>, vector<1x2x96xf32>
    %760 = vector.shape_cast %759 : vector<1x2x96xf32> to vector<2x96xf32>
    %761 = vector.extract_strided_slice %760 {offsets = [0, 0], sizes = [2, 32], strides = [1, 1]} : vector<2x96xf32> to vector<2x32xf32>
    %762 = vector.extract_strided_slice %757 {offsets = [0, 0], sizes = [2, 32], strides = [1, 1]} : vector<2x96xf32> to vector<2x32xf32>
    %763 = arith.addf %761, %762 : vector<2x32xf32>
    %764 = arith.negf %763 : vector<2x32xf32>
    %765 = math.exp %764 : vector<2x32xf32>
    %cst_255 = arith.constant 1.000000e+00 : f32
    %766 = vector.broadcast %cst_255 : f32 to vector<2x32xf32>
    %767 = arith.addf %766, %765 : vector<2x32xf32>
    %768 = arith.divf %766, %767 : vector<2x32xf32>
    %769 = vector.extract_strided_slice %760 {offsets = [0, 32], sizes = [2, 32], strides = [1, 1]} : vector<2x96xf32> to vector<2x32xf32>
    %770 = vector.extract_strided_slice %757 {offsets = [0, 32], sizes = [2, 32], strides = [1, 1]} : vector<2x96xf32> to vector<2x32xf32>
    %771 = arith.addf %769, %770 : vector<2x32xf32>
    %772 = arith.negf %771 : vector<2x32xf32>
    %773 = math.exp %772 : vector<2x32xf32>
    %cst_256 = arith.constant 1.000000e+00 : f32
    %774 = vector.broadcast %cst_256 : f32 to vector<2x32xf32>
    %775 = arith.addf %774, %773 : vector<2x32xf32>
    %776 = arith.divf %774, %775 : vector<2x32xf32>
    %777 = vector.extract_strided_slice %760 {offsets = [0, 64], sizes = [2, 32], strides = [1, 1]} : vector<2x96xf32> to vector<2x32xf32>
    %778 = vector.extract_strided_slice %757 {offsets = [0, 64], sizes = [2, 32], strides = [1, 1]} : vector<2x96xf32> to vector<2x32xf32>
    %779 = arith.mulf %768, %778 : vector<2x32xf32>
    %780 = arith.addf %777, %779 : vector<2x32xf32>
    %781 = math.tanh %780 : vector<2x32xf32>
    %cst_257 = arith.constant 1.000000e+00 : f32
    %782 = vector.broadcast %cst_257 : f32 to vector<2x32xf32>
    %783 = arith.subf %782, %776 : vector<2x32xf32>
    %784 = arith.mulf %783, %781 : vector<2x32xf32>
    %785 = arith.mulf %776, %752 : vector<2x32xf32>
    %786 = arith.addf %784, %785 : vector<2x32xf32>
    %c3_i32_258 = arith.constant 3 : i32
    %c2_i32_259 = arith.constant 2 : i32
    %787 = arith.muli %c3_i32_258, %c2_i32_259 : i32
    %788 = tpu.assume_multiple %787, 2 : i32
    %cst_260 = arith.constant dense<0.000000e+00> : vector<2x96xf32>
    %789 = tpu.matmul %786, %679, %cst_260 {dimension_numbers = #tpu.dot_dimension_numbers<[1], [0], [0], [1], [0, 0, 1, 1], [], []>} : vector<2x32xf32>, vector<32x96xf32>, vector<2x96xf32> -> vector<2x96xf32>
    %790 = vector.broadcast %681 : vector<1x96xf32> to vector<2x96xf32>
    %791 = arith.addf %789, %790 : vector<2x96xf32>
    %c0_261 = arith.constant 0 : index
    %792 = arith.index_cast %788 : i32 to index
    %c0_262 = arith.constant 0 : index
    %793 = vector.load %arg16[%c0_261, %792, %c0_262] : memref<2x16x96xf32, #tpu.memory_space<vmem>>, vector<1x2x96xf32>
    %794 = vector.shape_cast %793 : vector<1x2x96xf32> to vector<2x96xf32>
    %795 = vector.extract_strided_slice %794 {offsets = [0, 0], sizes = [2, 32], strides = [1, 1]} : vector<2x96xf32> to vector<2x32xf32>
    %796 = vector.extract_strided_slice %791 {offsets = [0, 0], sizes = [2, 32], strides = [1, 1]} : vector<2x96xf32> to vector<2x32xf32>
    %797 = arith.addf %795, %796 : vector<2x32xf32>
    %798 = arith.negf %797 : vector<2x32xf32>
    %799 = math.exp %798 : vector<2x32xf32>
    %cst_263 = arith.constant 1.000000e+00 : f32
    %800 = vector.broadcast %cst_263 : f32 to vector<2x32xf32>
    %801 = arith.addf %800, %799 : vector<2x32xf32>
    %802 = arith.divf %800, %801 : vector<2x32xf32>
    %803 = vector.extract_strided_slice %794 {offsets = [0, 32], sizes = [2, 32], strides = [1, 1]} : vector<2x96xf32> to vector<2x32xf32>
    %804 = vector.extract_strided_slice %791 {offsets = [0, 32], sizes = [2, 32], strides = [1, 1]} : vector<2x96xf32> to vector<2x32xf32>
    %805 = arith.addf %803, %804 : vector<2x32xf32>
    %806 = arith.negf %805 : vector<2x32xf32>
    %807 = math.exp %806 : vector<2x32xf32>
    %cst_264 = arith.constant 1.000000e+00 : f32
    %808 = vector.broadcast %cst_264 : f32 to vector<2x32xf32>
    %809 = arith.addf %808, %807 : vector<2x32xf32>
    %810 = arith.divf %808, %809 : vector<2x32xf32>
    %811 = vector.extract_strided_slice %794 {offsets = [0, 64], sizes = [2, 32], strides = [1, 1]} : vector<2x96xf32> to vector<2x32xf32>
    %812 = vector.extract_strided_slice %791 {offsets = [0, 64], sizes = [2, 32], strides = [1, 1]} : vector<2x96xf32> to vector<2x32xf32>
    %813 = arith.mulf %802, %812 : vector<2x32xf32>
    %814 = arith.addf %811, %813 : vector<2x32xf32>
    %815 = math.tanh %814 : vector<2x32xf32>
    %cst_265 = arith.constant 1.000000e+00 : f32
    %816 = vector.broadcast %cst_265 : f32 to vector<2x32xf32>
    %817 = arith.subf %816, %810 : vector<2x32xf32>
    %818 = arith.mulf %817, %815 : vector<2x32xf32>
    %819 = arith.mulf %810, %786 : vector<2x32xf32>
    %820 = arith.addf %818, %819 : vector<2x32xf32>
    %c4_i32_266 = arith.constant 4 : i32
    %c2_i32_267 = arith.constant 2 : i32
    %821 = arith.muli %c4_i32_266, %c2_i32_267 : i32
    %822 = tpu.assume_multiple %821, 2 : i32
    %cst_268 = arith.constant dense<0.000000e+00> : vector<2x96xf32>
    %823 = tpu.matmul %820, %679, %cst_268 {dimension_numbers = #tpu.dot_dimension_numbers<[1], [0], [0], [1], [0, 0, 1, 1], [], []>} : vector<2x32xf32>, vector<32x96xf32>, vector<2x96xf32> -> vector<2x96xf32>
    %824 = vector.broadcast %681 : vector<1x96xf32> to vector<2x96xf32>
    %825 = arith.addf %823, %824 : vector<2x96xf32>
    %c0_269 = arith.constant 0 : index
    %826 = arith.index_cast %822 : i32 to index
    %c0_270 = arith.constant 0 : index
    %827 = vector.load %arg16[%c0_269, %826, %c0_270] : memref<2x16x96xf32, #tpu.memory_space<vmem>>, vector<1x2x96xf32>
    %828 = vector.shape_cast %827 : vector<1x2x96xf32> to vector<2x96xf32>
    %829 = vector.extract_strided_slice %828 {offsets = [0, 0], sizes = [2, 32], strides = [1, 1]} : vector<2x96xf32> to vector<2x32xf32>
    %830 = vector.extract_strided_slice %825 {offsets = [0, 0], sizes = [2, 32], strides = [1, 1]} : vector<2x96xf32> to vector<2x32xf32>
    %831 = arith.addf %829, %830 : vector<2x32xf32>
    %832 = arith.negf %831 : vector<2x32xf32>
    %833 = math.exp %832 : vector<2x32xf32>
    %cst_271 = arith.constant 1.000000e+00 : f32
    %834 = vector.broadcast %cst_271 : f32 to vector<2x32xf32>
    %835 = arith.addf %834, %833 : vector<2x32xf32>
    %836 = arith.divf %834, %835 : vector<2x32xf32>
    %837 = vector.extract_strided_slice %828 {offsets = [0, 32], sizes = [2, 32], strides = [1, 1]} : vector<2x96xf32> to vector<2x32xf32>
    %838 = vector.extract_strided_slice %825 {offsets = [0, 32], sizes = [2, 32], strides = [1, 1]} : vector<2x96xf32> to vector<2x32xf32>
    %839 = arith.addf %837, %838 : vector<2x32xf32>
    %840 = arith.negf %839 : vector<2x32xf32>
    %841 = math.exp %840 : vector<2x32xf32>
    %cst_272 = arith.constant 1.000000e+00 : f32
    %842 = vector.broadcast %cst_272 : f32 to vector<2x32xf32>
    %843 = arith.addf %842, %841 : vector<2x32xf32>
    %844 = arith.divf %842, %843 : vector<2x32xf32>
    %845 = vector.extract_strided_slice %828 {offsets = [0, 64], sizes = [2, 32], strides = [1, 1]} : vector<2x96xf32> to vector<2x32xf32>
    %846 = vector.extract_strided_slice %825 {offsets = [0, 64], sizes = [2, 32], strides = [1, 1]} : vector<2x96xf32> to vector<2x32xf32>
    %847 = arith.mulf %836, %846 : vector<2x32xf32>
    %848 = arith.addf %845, %847 : vector<2x32xf32>
    %849 = math.tanh %848 : vector<2x32xf32>
    %cst_273 = arith.constant 1.000000e+00 : f32
    %850 = vector.broadcast %cst_273 : f32 to vector<2x32xf32>
    %851 = arith.subf %850, %844 : vector<2x32xf32>
    %852 = arith.mulf %851, %849 : vector<2x32xf32>
    %853 = arith.mulf %844, %820 : vector<2x32xf32>
    %854 = arith.addf %852, %853 : vector<2x32xf32>
    %c5_i32_274 = arith.constant 5 : i32
    %c2_i32_275 = arith.constant 2 : i32
    %855 = arith.muli %c5_i32_274, %c2_i32_275 : i32
    %856 = tpu.assume_multiple %855, 2 : i32
    %cst_276 = arith.constant dense<0.000000e+00> : vector<2x96xf32>
    %857 = tpu.matmul %854, %679, %cst_276 {dimension_numbers = #tpu.dot_dimension_numbers<[1], [0], [0], [1], [0, 0, 1, 1], [], []>} : vector<2x32xf32>, vector<32x96xf32>, vector<2x96xf32> -> vector<2x96xf32>
    %858 = vector.broadcast %681 : vector<1x96xf32> to vector<2x96xf32>
    %859 = arith.addf %857, %858 : vector<2x96xf32>
    %c0_277 = arith.constant 0 : index
    %860 = arith.index_cast %856 : i32 to index
    %c0_278 = arith.constant 0 : index
    %861 = vector.load %arg16[%c0_277, %860, %c0_278] : memref<2x16x96xf32, #tpu.memory_space<vmem>>, vector<1x2x96xf32>
    %862 = vector.shape_cast %861 : vector<1x2x96xf32> to vector<2x96xf32>
    %863 = vector.extract_strided_slice %862 {offsets = [0, 0], sizes = [2, 32], strides = [1, 1]} : vector<2x96xf32> to vector<2x32xf32>
    %864 = vector.extract_strided_slice %859 {offsets = [0, 0], sizes = [2, 32], strides = [1, 1]} : vector<2x96xf32> to vector<2x32xf32>
    %865 = arith.addf %863, %864 : vector<2x32xf32>
    %866 = arith.negf %865 : vector<2x32xf32>
    %867 = math.exp %866 : vector<2x32xf32>
    %cst_279 = arith.constant 1.000000e+00 : f32
    %868 = vector.broadcast %cst_279 : f32 to vector<2x32xf32>
    %869 = arith.addf %868, %867 : vector<2x32xf32>
    %870 = arith.divf %868, %869 : vector<2x32xf32>
    %871 = vector.extract_strided_slice %862 {offsets = [0, 32], sizes = [2, 32], strides = [1, 1]} : vector<2x96xf32> to vector<2x32xf32>
    %872 = vector.extract_strided_slice %859 {offsets = [0, 32], sizes = [2, 32], strides = [1, 1]} : vector<2x96xf32> to vector<2x32xf32>
    %873 = arith.addf %871, %872 : vector<2x32xf32>
    %874 = arith.negf %873 : vector<2x32xf32>
    %875 = math.exp %874 : vector<2x32xf32>
    %cst_280 = arith.constant 1.000000e+00 : f32
    %876 = vector.broadcast %cst_280 : f32 to vector<2x32xf32>
    %877 = arith.addf %876, %875 : vector<2x32xf32>
    %878 = arith.divf %876, %877 : vector<2x32xf32>
    %879 = vector.extract_strided_slice %862 {offsets = [0, 64], sizes = [2, 32], strides = [1, 1]} : vector<2x96xf32> to vector<2x32xf32>
    %880 = vector.extract_strided_slice %859 {offsets = [0, 64], sizes = [2, 32], strides = [1, 1]} : vector<2x96xf32> to vector<2x32xf32>
    %881 = arith.mulf %870, %880 : vector<2x32xf32>
    %882 = arith.addf %879, %881 : vector<2x32xf32>
    %883 = math.tanh %882 : vector<2x32xf32>
    %cst_281 = arith.constant 1.000000e+00 : f32
    %884 = vector.broadcast %cst_281 : f32 to vector<2x32xf32>
    %885 = arith.subf %884, %878 : vector<2x32xf32>
    %886 = arith.mulf %885, %883 : vector<2x32xf32>
    %887 = arith.mulf %878, %854 : vector<2x32xf32>
    %888 = arith.addf %886, %887 : vector<2x32xf32>
    %c6_i32_282 = arith.constant 6 : i32
    %c2_i32_283 = arith.constant 2 : i32
    %889 = arith.muli %c6_i32_282, %c2_i32_283 : i32
    %890 = tpu.assume_multiple %889, 2 : i32
    %cst_284 = arith.constant dense<0.000000e+00> : vector<2x96xf32>
    %891 = tpu.matmul %888, %679, %cst_284 {dimension_numbers = #tpu.dot_dimension_numbers<[1], [0], [0], [1], [0, 0, 1, 1], [], []>} : vector<2x32xf32>, vector<32x96xf32>, vector<2x96xf32> -> vector<2x96xf32>
    %892 = vector.broadcast %681 : vector<1x96xf32> to vector<2x96xf32>
    %893 = arith.addf %891, %892 : vector<2x96xf32>
    %c0_285 = arith.constant 0 : index
    %894 = arith.index_cast %890 : i32 to index
    %c0_286 = arith.constant 0 : index
    %895 = vector.load %arg16[%c0_285, %894, %c0_286] : memref<2x16x96xf32, #tpu.memory_space<vmem>>, vector<1x2x96xf32>
    %896 = vector.shape_cast %895 : vector<1x2x96xf32> to vector<2x96xf32>
    %897 = vector.extract_strided_slice %896 {offsets = [0, 0], sizes = [2, 32], strides = [1, 1]} : vector<2x96xf32> to vector<2x32xf32>
    %898 = vector.extract_strided_slice %893 {offsets = [0, 0], sizes = [2, 32], strides = [1, 1]} : vector<2x96xf32> to vector<2x32xf32>
    %899 = arith.addf %897, %898 : vector<2x32xf32>
    %900 = arith.negf %899 : vector<2x32xf32>
    %901 = math.exp %900 : vector<2x32xf32>
    %cst_287 = arith.constant 1.000000e+00 : f32
    %902 = vector.broadcast %cst_287 : f32 to vector<2x32xf32>
    %903 = arith.addf %902, %901 : vector<2x32xf32>
    %904 = arith.divf %902, %903 : vector<2x32xf32>
    %905 = vector.extract_strided_slice %896 {offsets = [0, 32], sizes = [2, 32], strides = [1, 1]} : vector<2x96xf32> to vector<2x32xf32>
    %906 = vector.extract_strided_slice %893 {offsets = [0, 32], sizes = [2, 32], strides = [1, 1]} : vector<2x96xf32> to vector<2x32xf32>
    %907 = arith.addf %905, %906 : vector<2x32xf32>
    %908 = arith.negf %907 : vector<2x32xf32>
    %909 = math.exp %908 : vector<2x32xf32>
    %cst_288 = arith.constant 1.000000e+00 : f32
    %910 = vector.broadcast %cst_288 : f32 to vector<2x32xf32>
    %911 = arith.addf %910, %909 : vector<2x32xf32>
    %912 = arith.divf %910, %911 : vector<2x32xf32>
    %913 = vector.extract_strided_slice %896 {offsets = [0, 64], sizes = [2, 32], strides = [1, 1]} : vector<2x96xf32> to vector<2x32xf32>
    %914 = vector.extract_strided_slice %893 {offsets = [0, 64], sizes = [2, 32], strides = [1, 1]} : vector<2x96xf32> to vector<2x32xf32>
    %915 = arith.mulf %904, %914 : vector<2x32xf32>
    %916 = arith.addf %913, %915 : vector<2x32xf32>
    %917 = math.tanh %916 : vector<2x32xf32>
    %cst_289 = arith.constant 1.000000e+00 : f32
    %918 = vector.broadcast %cst_289 : f32 to vector<2x32xf32>
    %919 = arith.subf %918, %912 : vector<2x32xf32>
    %920 = arith.mulf %919, %917 : vector<2x32xf32>
    %921 = arith.mulf %912, %888 : vector<2x32xf32>
    %922 = arith.addf %920, %921 : vector<2x32xf32>
    %c7_i32_290 = arith.constant 7 : i32
    %c2_i32_291 = arith.constant 2 : i32
    %923 = arith.muli %c7_i32_290, %c2_i32_291 : i32
    %924 = tpu.assume_multiple %923, 2 : i32
    %cst_292 = arith.constant dense<0.000000e+00> : vector<2x96xf32>
    %925 = tpu.matmul %922, %679, %cst_292 {dimension_numbers = #tpu.dot_dimension_numbers<[1], [0], [0], [1], [0, 0, 1, 1], [], []>} : vector<2x32xf32>, vector<32x96xf32>, vector<2x96xf32> -> vector<2x96xf32>
    %926 = vector.broadcast %681 : vector<1x96xf32> to vector<2x96xf32>
    %927 = arith.addf %925, %926 : vector<2x96xf32>
    %c0_293 = arith.constant 0 : index
    %928 = arith.index_cast %924 : i32 to index
    %c0_294 = arith.constant 0 : index
    %929 = vector.load %arg16[%c0_293, %928, %c0_294] : memref<2x16x96xf32, #tpu.memory_space<vmem>>, vector<1x2x96xf32>
    %930 = vector.shape_cast %929 : vector<1x2x96xf32> to vector<2x96xf32>
    %931 = vector.extract_strided_slice %930 {offsets = [0, 0], sizes = [2, 32], strides = [1, 1]} : vector<2x96xf32> to vector<2x32xf32>
    %932 = vector.extract_strided_slice %927 {offsets = [0, 0], sizes = [2, 32], strides = [1, 1]} : vector<2x96xf32> to vector<2x32xf32>
    %933 = arith.addf %931, %932 : vector<2x32xf32>
    %934 = arith.negf %933 : vector<2x32xf32>
    %935 = math.exp %934 : vector<2x32xf32>
    %cst_295 = arith.constant 1.000000e+00 : f32
    %936 = vector.broadcast %cst_295 : f32 to vector<2x32xf32>
    %937 = arith.addf %936, %935 : vector<2x32xf32>
    %938 = arith.divf %936, %937 : vector<2x32xf32>
    %939 = vector.extract_strided_slice %930 {offsets = [0, 32], sizes = [2, 32], strides = [1, 1]} : vector<2x96xf32> to vector<2x32xf32>
    %940 = vector.extract_strided_slice %927 {offsets = [0, 32], sizes = [2, 32], strides = [1, 1]} : vector<2x96xf32> to vector<2x32xf32>
    %941 = arith.addf %939, %940 : vector<2x32xf32>
    %942 = arith.negf %941 : vector<2x32xf32>
    %943 = math.exp %942 : vector<2x32xf32>
    %cst_296 = arith.constant 1.000000e+00 : f32
    %944 = vector.broadcast %cst_296 : f32 to vector<2x32xf32>
    %945 = arith.addf %944, %943 : vector<2x32xf32>
    %946 = arith.divf %944, %945 : vector<2x32xf32>
    %947 = vector.extract_strided_slice %930 {offsets = [0, 64], sizes = [2, 32], strides = [1, 1]} : vector<2x96xf32> to vector<2x32xf32>
    %948 = vector.extract_strided_slice %927 {offsets = [0, 64], sizes = [2, 32], strides = [1, 1]} : vector<2x96xf32> to vector<2x32xf32>
    %949 = arith.mulf %938, %948 : vector<2x32xf32>
    %950 = arith.addf %947, %949 : vector<2x32xf32>
    %951 = math.tanh %950 : vector<2x32xf32>
    %cst_297 = arith.constant 1.000000e+00 : f32
    %952 = vector.broadcast %cst_297 : f32 to vector<2x32xf32>
    %953 = arith.subf %952, %946 : vector<2x32xf32>
    %954 = arith.mulf %953, %951 : vector<2x32xf32>
    %955 = arith.mulf %946, %922 : vector<2x32xf32>
    %956 = arith.addf %954, %955 : vector<2x32xf32>
    %c8_i32_298 = arith.constant 8 : i32
    %c1_299 = arith.constant 1 : index
    %c14 = arith.constant 14 : index
    %c0_300 = arith.constant 0 : index
    %957 = vector.load %arg16[%c1_299, %c14, %c0_300] : memref<2x16x96xf32, #tpu.memory_space<vmem>>, vector<1x2x96xf32>
    %958 = vector.shape_cast %957 : vector<1x2x96xf32> to vector<2x96xf32>
    %cst_301 = arith.constant 0.000000e+00 : f32
    %959 = vector.broadcast %cst_301 : f32 to vector<2x32xf32>
    %960 = vector.extract_strided_slice %958 {offsets = [0, 0], sizes = [2, 32], strides = [1, 1]} : vector<2x96xf32> to vector<2x32xf32>
    %961 = vector.extract_strided_slice %683 {offsets = [0, 0], sizes = [1, 32], strides = [1, 1]} : vector<1x96xf32> to vector<1x32xf32>
    %962 = vector.broadcast %961 : vector<1x32xf32> to vector<2x32xf32>
    %963 = arith.addf %960, %962 : vector<2x32xf32>
    %964 = arith.negf %963 : vector<2x32xf32>
    %965 = math.exp %964 : vector<2x32xf32>
    %cst_302 = arith.constant 1.000000e+00 : f32
    %966 = vector.broadcast %cst_302 : f32 to vector<2x32xf32>
    %967 = arith.addf %966, %965 : vector<2x32xf32>
    %968 = arith.divf %966, %967 : vector<2x32xf32>
    %969 = vector.extract_strided_slice %958 {offsets = [0, 32], sizes = [2, 32], strides = [1, 1]} : vector<2x96xf32> to vector<2x32xf32>
    %970 = vector.extract_strided_slice %683 {offsets = [0, 32], sizes = [1, 32], strides = [1, 1]} : vector<1x96xf32> to vector<1x32xf32>
    %971 = vector.broadcast %970 : vector<1x32xf32> to vector<2x32xf32>
    %972 = arith.addf %969, %971 : vector<2x32xf32>
    %973 = arith.negf %972 : vector<2x32xf32>
    %974 = math.exp %973 : vector<2x32xf32>
    %cst_303 = arith.constant 1.000000e+00 : f32
    %975 = vector.broadcast %cst_303 : f32 to vector<2x32xf32>
    %976 = arith.addf %975, %974 : vector<2x32xf32>
    %977 = arith.divf %975, %976 : vector<2x32xf32>
    %978 = vector.extract_strided_slice %958 {offsets = [0, 64], sizes = [2, 32], strides = [1, 1]} : vector<2x96xf32> to vector<2x32xf32>
    %979 = vector.extract_strided_slice %683 {offsets = [0, 64], sizes = [1, 32], strides = [1, 1]} : vector<1x96xf32> to vector<1x32xf32>
    %980 = vector.broadcast %979 : vector<1x32xf32> to vector<2x32xf32>
    %981 = arith.mulf %968, %980 : vector<2x32xf32>
    %982 = arith.addf %978, %981 : vector<2x32xf32>
    %983 = math.tanh %982 : vector<2x32xf32>
    %cst_304 = arith.constant 1.000000e+00 : f32
    %984 = vector.broadcast %cst_304 : f32 to vector<2x32xf32>
    %985 = arith.subf %984, %977 : vector<2x32xf32>
    %986 = arith.mulf %985, %983 : vector<2x32xf32>
    %987 = arith.mulf %977, %959 : vector<2x32xf32>
    %988 = arith.addf %986, %987 : vector<2x32xf32>
    %cst_305 = arith.constant dense<0.000000e+00> : vector<2xf32>
    %989 = vector.multi_reduction <add>, %956, %cst_305 [1] : vector<2x32xf32> to vector<2xf32>
    %990 = vector.shape_cast %989 : vector<2xf32> to vector<2x1xf32>
    %cst_306 = arith.constant dense<0.000000e+00> : vector<2xf32>
    %991 = vector.multi_reduction <add>, %988, %cst_306 [1] : vector<2x32xf32> to vector<2xf32>
    %992 = vector.shape_cast %991 : vector<2xf32> to vector<2x1xf32>
    %993 = arith.addf %990, %992 : vector<2x1xf32>
    %cst_307 = arith.constant 1.562500e-02 : f32
    %994 = vector.broadcast %cst_307 : f32 to vector<2x1xf32>
    %995 = arith.mulf %993, %994 : vector<2x1xf32>
    %996 = vector.broadcast %995 : vector<2x1xf32> to vector<2x32xf32>
    %997 = arith.subf %956, %996 : vector<2x32xf32>
    %998 = vector.broadcast %995 : vector<2x1xf32> to vector<2x32xf32>
    %999 = arith.subf %988, %998 : vector<2x32xf32>
    %1000 = arith.mulf %997, %997 : vector<2x32xf32>
    %cst_308 = arith.constant dense<0.000000e+00> : vector<2xf32>
    %1001 = vector.multi_reduction <add>, %1000, %cst_308 [1] : vector<2x32xf32> to vector<2xf32>
    %1002 = vector.shape_cast %1001 : vector<2xf32> to vector<2x1xf32>
    %1003 = arith.mulf %999, %999 : vector<2x32xf32>
    %cst_309 = arith.constant dense<0.000000e+00> : vector<2xf32>
    %1004 = vector.multi_reduction <add>, %1003, %cst_309 [1] : vector<2x32xf32> to vector<2xf32>
    %1005 = vector.shape_cast %1004 : vector<2xf32> to vector<2x1xf32>
    %1006 = arith.addf %1002, %1005 : vector<2x1xf32>
    %cst_310 = arith.constant 1.562500e-02 : f32
    %1007 = vector.broadcast %cst_310 : f32 to vector<2x1xf32>
    %1008 = arith.mulf %1006, %1007 : vector<2x1xf32>
    %cst_311 = arith.constant 9.99999974E-6 : f32
    %1009 = vector.broadcast %cst_311 : f32 to vector<2x1xf32>
    %1010 = arith.addf %1008, %1009 : vector<2x1xf32>
    %1011 = math.rsqrt %1010 : vector<2x1xf32>
    %1012 = vector.broadcast %1011 : vector<2x1xf32> to vector<2x32xf32>
    %1013 = arith.mulf %997, %1012 : vector<2x32xf32>
    %c0_312 = arith.constant 0 : index
    %c0_313 = arith.constant 0 : index
    %c0_314 = arith.constant 0 : index
    %1014 = vector.load %arg10[%c0_312, %c0_313, %c0_314] : memref<2x1x32xf32, #tpu.memory_space<vmem>>, vector<1x1x32xf32>
    %1015 = vector.shape_cast %1014 : vector<1x1x32xf32> to vector<1x32xf32>
    %1016 = vector.broadcast %1015 : vector<1x32xf32> to vector<2x32xf32>
    %1017 = arith.mulf %1013, %1016 : vector<2x32xf32>
    %c0_315 = arith.constant 0 : index
    %c0_316 = arith.constant 0 : index
    %c0_317 = arith.constant 0 : index
    %1018 = vector.load %arg11[%c0_315, %c0_316, %c0_317] : memref<2x1x32xf32, #tpu.memory_space<vmem>>, vector<1x1x32xf32>
    %1019 = vector.shape_cast %1018 : vector<1x1x32xf32> to vector<1x32xf32>
    %1020 = vector.broadcast %1019 : vector<1x32xf32> to vector<2x32xf32>
    %1021 = arith.addf %1017, %1020 : vector<2x32xf32>
    %1022 = vector.broadcast %1011 : vector<2x1xf32> to vector<2x32xf32>
    %1023 = arith.mulf %999, %1022 : vector<2x32xf32>
    %c1_318 = arith.constant 1 : index
    %c0_319 = arith.constant 0 : index
    %c0_320 = arith.constant 0 : index
    %1024 = vector.load %arg10[%c1_318, %c0_319, %c0_320] : memref<2x1x32xf32, #tpu.memory_space<vmem>>, vector<1x1x32xf32>
    %1025 = vector.shape_cast %1024 : vector<1x1x32xf32> to vector<1x32xf32>
    %1026 = vector.broadcast %1025 : vector<1x32xf32> to vector<2x32xf32>
    %1027 = arith.mulf %1023, %1026 : vector<2x32xf32>
    %c1_321 = arith.constant 1 : index
    %c0_322 = arith.constant 0 : index
    %c0_323 = arith.constant 0 : index
    %1028 = vector.load %arg11[%c1_321, %c0_322, %c0_323] : memref<2x1x32xf32, #tpu.memory_space<vmem>>, vector<1x1x32xf32>
    %1029 = vector.shape_cast %1028 : vector<1x1x32xf32> to vector<1x32xf32>
    %1030 = vector.broadcast %1029 : vector<1x32xf32> to vector<2x32xf32>
    %1031 = arith.addf %1027, %1030 : vector<2x32xf32>
    %c0_324 = arith.constant 0 : index
    %c0_325 = arith.constant 0 : index
    %c0_326 = arith.constant 0 : index
    %1032 = vector.load %arg12[%c0_324, %c0_325, %c0_326] : memref<2x32x8xf32, #tpu.memory_space<vmem>>, vector<1x32x8xf32>
    %1033 = vector.shape_cast %1032 : vector<1x32x8xf32> to vector<32x8xf32>
    %cst_327 = arith.constant dense<0.000000e+00> : vector<2x8xf32>
    %1034 = tpu.matmul %1021, %1033, %cst_327 {dimension_numbers = #tpu.dot_dimension_numbers<[1], [0], [0], [1], [0, 0, 1, 1], [], []>} : vector<2x32xf32>, vector<32x8xf32>, vector<2x8xf32> -> vector<2x8xf32>
    %c1_328 = arith.constant 1 : index
    %c0_329 = arith.constant 0 : index
    %c0_330 = arith.constant 0 : index
    %1035 = vector.load %arg12[%c1_328, %c0_329, %c0_330] : memref<2x32x8xf32, #tpu.memory_space<vmem>>, vector<1x32x8xf32>
    %1036 = vector.shape_cast %1035 : vector<1x32x8xf32> to vector<32x8xf32>
    %cst_331 = arith.constant dense<0.000000e+00> : vector<2x8xf32>
    %1037 = tpu.matmul %1031, %1036, %cst_331 {dimension_numbers = #tpu.dot_dimension_numbers<[1], [0], [0], [1], [0, 0, 1, 1], [], []>} : vector<2x32xf32>, vector<32x8xf32>, vector<2x8xf32> -> vector<2x8xf32>
    %1038 = arith.addf %1034, %1037 : vector<2x8xf32>
    %c0_332 = arith.constant 0 : index
    %c0_333 = arith.constant 0 : index
    %1039 = vector.load %arg13[%c0_332, %c0_333] : memref<1x8xf32, #tpu.memory_space<vmem>>, vector<1x8xf32>
    %1040 = vector.broadcast %1039 : vector<1x8xf32> to vector<2x8xf32>
    %1041 = arith.addf %1038, %1040 : vector<2x8xf32>
    %cst_334 = arith.constant 0.000000e+00 : f32
    %1042 = vector.broadcast %cst_334 : f32 to vector<2x8xf32>
    %1043 = arith.maximumf %1041, %1042 : vector<2x8xf32>
    %c0_335 = arith.constant 0 : index
    %c0_336 = arith.constant 0 : index
    %1044 = vector.load %arg14[%c0_335, %c0_336] : memref<2x8xf32, #tpu.memory_space<vmem>>, vector<2x8xf32>
    tpu.vector_store %arg14[%c0_335, %c0_336], %1043 {strides = array<i32>} : memref<2x8xf32, #tpu.memory_space<vmem>>, vector<2x8xf32>,
    return
  }
  func.func @transform_0(%arg0: i32) -> (i32, i32) {
    %c0_i32 = arith.constant 0 : i32
    %c0_i32_0 = arith.constant 0 : i32
    %c0_i32_1 = arith.constant 0 : i32
    return %c0_i32, %c0_i32_0 : i32, i32
  }
  func.func @transform_1(%arg0: i32) -> (i32, i32, i32, i32) {
    %c0_i32 = arith.constant 0 : i32
    %c0_i32_0 = arith.constant 0 : i32
    %c0_i32_1 = arith.constant 0 : i32
    %c0_i32_2 = arith.constant 0 : i32
    %c0_i32_3 = arith.constant 0 : i32
    return %c0_i32, %c0_i32_0, %c0_i32_1, %c0_i32_2 : i32, i32, i32, i32
  }
  func.func @transform_2(%arg0: i32) -> (i32, i32, i32) {
    %c0_i32 = arith.constant 0 : i32
    %c0_i32_0 = arith.constant 0 : i32
    %c0_i32_1 = arith.constant 0 : i32
    %c0_i32_2 = arith.constant 0 : i32
    return %c0_i32, %c0_i32_0, %c0_i32_1 : i32, i32, i32
  }
  func.func @transform_3(%arg0: i32) -> (i32, i32, i32) {
    %c0_i32 = arith.constant 0 : i32
    %c0_i32_0 = arith.constant 0 : i32
    %c0_i32_1 = arith.constant 0 : i32
    %c0_i32_2 = arith.constant 0 : i32
    return %c0_i32, %c0_i32_0, %c0_i32_1 : i32, i32, i32
  }
  func.func @transform_4(%arg0: i32) -> (i32, i32, i32) {
    %c0_i32 = arith.constant 0 : i32
    %c0_i32_0 = arith.constant 0 : i32
    %c0_i32_1 = arith.constant 0 : i32
    %c0_i32_2 = arith.constant 0 : i32
    return %c0_i32, %c0_i32_0, %c0_i32_1 : i32, i32, i32
  }
  func.func @transform_5(%arg0: i32) -> (i32, i32, i32, i32) {
    %c0_i32 = arith.constant 0 : i32
    %c0_i32_0 = arith.constant 0 : i32
    %c0_i32_1 = arith.constant 0 : i32
    %c0_i32_2 = arith.constant 0 : i32
    %c0_i32_3 = arith.constant 0 : i32
    return %c0_i32, %c0_i32_0, %c0_i32_1, %c0_i32_2 : i32, i32, i32, i32
  }
  func.func @transform_6(%arg0: i32) -> (i32, i32, i32) {
    %c0_i32 = arith.constant 0 : i32
    %c0_i32_0 = arith.constant 0 : i32
    %c0_i32_1 = arith.constant 0 : i32
    %c0_i32_2 = arith.constant 0 : i32
    return %c0_i32, %c0_i32_0, %c0_i32_1 : i32, i32, i32
  }
  func.func @transform_7(%arg0: i32) -> (i32, i32, i32) {
    %c0_i32 = arith.constant 0 : i32
    %c0_i32_0 = arith.constant 0 : i32
    %c0_i32_1 = arith.constant 0 : i32
    %c0_i32_2 = arith.constant 0 : i32
    return %c0_i32, %c0_i32_0, %c0_i32_1 : i32, i32, i32
  }
  func.func @transform_8(%arg0: i32) -> (i32, i32, i32) {
    %c0_i32 = arith.constant 0 : i32
    %c0_i32_0 = arith.constant 0 : i32
    %c0_i32_1 = arith.constant 0 : i32
    %c0_i32_2 = arith.constant 0 : i32
    return %c0_i32, %c0_i32_0, %c0_i32_1 : i32, i32, i32
  }
  func.func @transform_9(%arg0: i32) -> (i32, i32, i32) {
    %c0_i32 = arith.constant 0 : i32
    %c0_i32_0 = arith.constant 0 : i32
    %c0_i32_1 = arith.constant 0 : i32
    %c0_i32_2 = arith.constant 0 : i32
    return %c0_i32, %c0_i32_0, %c0_i32_1 : i32, i32, i32
  }
  func.func @transform_10(%arg0: i32) -> (i32, i32, i32) {
    %c0_i32 = arith.constant 0 : i32
    %c0_i32_0 = arith.constant 0 : i32
    %c0_i32_1 = arith.constant 0 : i32
    %c0_i32_2 = arith.constant 0 : i32
    return %c0_i32, %c0_i32_0, %c0_i32_1 : i32, i32, i32
  }
  func.func @transform_11(%arg0: i32) -> (i32, i32, i32) {
    %c0_i32 = arith.constant 0 : i32
    %c0_i32_0 = arith.constant 0 : i32
    %c0_i32_1 = arith.constant 0 : i32
    %c0_i32_2 = arith.constant 0 : i32
    return %c0_i32, %c0_i32_0, %c0_i32_1 : i32, i32, i32
  }
  func.func @transform_12(%arg0: i32) -> (i32, i32) {
    %c0_i32 = arith.constant 0 : i32
    %c0_i32_0 = arith.constant 0 : i32
    %c0_i32_1 = arith.constant 0 : i32
    return %c0_i32, %c0_i32_0 : i32, i32
  }
  func.func @transform_13(%arg0: i32) -> (i32, i32) {
    %c0_i32 = arith.constant 0 : i32
    %c0_i32_0 = arith.constant 0 : i32
    %c0_i32_1 = arith.constant 0 : i32
    return %c0_i32, %c0_i32_0 : i32, i32
  }
}

</mosaic_0001>

<bundles_post_ra>
// kernel: gru_model_forward.1
= control target key start
LH: loop header
LB: loop body
LE: loop exit
PB: predicated region body
PF: predicated region fallthrough
CT: control target
= control target key end

     0   :  { %18 = vsyncpa [#allocation5], 0  ;;  %s5239_s0 = inlined_call_operand.vmem [shape: f32[16,16], index: 0, kind: input, shape index: {}]   ;;  %s5240_s1 = inlined_call_operand.hbm [shape: f32[2,1,16,96], index: 1, kind: input, shape index: {}]   ;;  %s5241_s2 = inlined_call_operand.hbm [shape: f32[2,32,96], index: 2, kind: input, shape index: {}]   ;;  %s5242_s3 = inlined_call_operand.vmem [shape: f32[2,1,96], index: 3, kind: input, shape index: {}]   ;;  %s5243_s4 = inlined_call_operand.vmem [shape: f32[2,1,96], index: 4, kind: input, shape index: {}]   ;;  %s5244_s5 = inlined_call_operand.vmem [shape: f32[2,2,32,96], index: 5, kind: input, shape index: {}]   ;;  %s5245_s6 = inlined_call_operand.hbm [shape: f32[2,32,96], index: 6, kind: input, shape index: {}]   ;;  %s5246_s7 = inlined_call_operand.vmem [shape: f32[2,1,96], index: 7, kind: input, shape index: {}]   ;;  %s5247_s8 = inlined_call_operand.vmem [shape: f32[2,1,96], index: 8, kind: input, shape index: {}]   ;;  %s5248_s9 = inlined_call_operand.vmem [shape: f32[2,1,32], index: 9, kind: input, shape index: {}]   ;;  %s5249_s10 = inlined_call_operand.vmem [shape: f32[2,1,32], index: 10, kind: input, shape index: {}]   ;;  %s5250_s11 = inlined_call_operand.vmem [shape: f32[2,32,8], index: 11, kind: input, shape index: {}]   ;;  %s5251_s12 = inlined_call_operand.vmem [shape: f32[1,8], index: 12, kind: input, shape index: {}]   ;;  %s5252_s13 = inlined_call_operand.hbm [shape: f32[2,8], index: 13, kind: output, shape index: {}]  }
   0x1   :  { %19 = vsyncpa [#allocation8], 0 }
   0x2   :  { %20 = vsyncpa [#allocation6], 0  ;;  %s4556_s25 = smov [#allocation7]   ;;  %s4557_s27 = smov [#allocation4]  }
   0x3   :  { %s40_s26 = sshll.u32 %s4556_s25, 4  ;;  %s28_s28 = sshll.u32 %s4557_s27, 4  ;;  %s41_s26 = int_to_ptr.vmem [resolvable:$true] %s40_s26  ;;  %s4638_s28 = int_to_ptr.vmem [resolvable:$true] %s28_s28 }
   0x4   :  { %s4462_s14 = scalar_lea.hbm %s5241_s2, 1024 }
   0x5   :  { %p4463_p0 = scmp.ne.s32.totalorder %s5241_s2, %s4462_s14  ;;  %p4466_p1 = scmp.lt.u32.totalorder %s4462_s14, %s5241_s2 }
   0x7   :  { %p4468_p2 = pnand %p4466_p1, %p4463_p0 }
   0x9   :  { %4471 = shalt.err (!%p4468_p2)
}
   0xa   :  { %s4472_s19 = scalar_lea.vmem %s41_s26, 1024  ;;  %p4477_p4 = scmp.lt.s32.totalorder %s41_s26, %s41_s26 }
   0xb   :  { %p4473_p3 = scmp.ne.s32.totalorder %s41_s26, %s4472_s19  ;;  %p4478_p5 = scmp.lt.s32.totalorder %s4472_s19, %s4472_s19 }
   0xd   :  { %p4479_p6 = por %p4478_p5, %p4477_p4 }
   0xf   :  { %p4480_p7 = pnand %p4479_p6, %p4473_p3 }
  0x11   :  { %4483 = shalt.err (!%p4480_p7)
}
  0x12   :  { %s4558_s20 = smov 128   ;;  %s4559_s21 = smov 8  }
  0x13   :  { %46 = dma.hbm_to_vmem [thread:$0]  %s5241_s2, 1024, %s41_s26, [#allocation8], %s4558_s20, %s4558_s20, %s4559_s21  }
  0x14   :  { %s4484_s27 = scalar_lea.hbm %s5240_s1, 512 }
  0x15   :  { %p4485_p8 = scmp.ne.s32.totalorder %s5240_s1, %s4484_s27  ;;  %p4488_p9 = scmp.lt.u32.totalorder %s4484_s27, %s5240_s1 }
  0x17   :  { %p4490_p10 = pnand %p4488_p9, %p4485_p8 }
  0x19   :  { %4493 = shalt.err (!%p4490_p10)
}
  0x1a   :  { %s4494_s16 = scalar_lea.vmem %s4638_s28, 512  ;;  %p4499_p12 = scmp.lt.s32.totalorder %s4638_s28, %s4638_s28 }
  0x1b   :  { %p4495_p11 = scmp.ne.s32.totalorder %s4638_s28, %s4494_s16  ;;  %p4500_p13 = scmp.lt.s32.totalorder %s4494_s16, %s4494_s16 }
  0x1d   :  { %p4501_p0 = por %p4500_p13, %p4499_p12 }
  0x1f   :  { %p4502_p1 = pnand %p4501_p0, %p4495_p11 }
  0x21   :  { %4505 = shalt.err (!%p4502_p1)
}
  0x22   :  { %34 = dma.hbm_to_vmem [thread:$0]  %s5240_s1, 512, %s4638_s28, [#allocation5], %s4558_s20, %s4558_s20, %s4559_s21  }
  0x23   :  { %s4560_s17 = smov [#allocation9]   ;;  %s4506_s23 = scalar_lea.hbm %s5245_s6, 1024 }
  0x24   :  { %s58_s18 = sshll.u32 %s4560_s17, 4  ;;  %p4507_p2 = scmp.ne.s32.totalorder %s5245_s6, %s4506_s23  ;;  %s59_s18 = int_to_ptr.vmem [resolvable:$true] %s58_s18 }
  0x25   :  { %p4510_p3 = scmp.lt.u32.totalorder %s4506_s23, %s5245_s6 }
  0x27   :  { %p4512_p4 = pnand %p4510_p3, %p4507_p2 }
  0x29   :  { %4515 = shalt.err (!%p4512_p4)
}
  0x2a   :  { %s4516_s30 = scalar_lea.vmem %s59_s18, 1024  ;;  %p4521_p6 = scmp.lt.s32.totalorder %s59_s18, %s59_s18 }
  0x2b   :  { %p4517_p5 = scmp.ne.s32.totalorder %s59_s18, %s4516_s30  ;;  %p4522_p7 = scmp.lt.s32.totalorder %s4516_s30, %s4516_s30 }
  0x2d   :  { %p4523_p8 = por %p4522_p7, %p4521_p6 }
  0x2f   :  { %p4524_p9 = pnand %p4523_p8, %p4517_p5 }
  0x31   :  { %4527 = shalt.err (!%p4524_p9)
}
  0x32   :  { %64 = dma.hbm_to_vmem [thread:$0]  %s5245_s6, 1024, %s59_s18, [#allocation8], %s4558_s20, %s4558_s20, %s4559_s21  }
  0x33   :  { %4550 = dma.done.wait [#allocation5], 512  }
  0x34   :  { %4551 = vsyncadd [#allocation5], 4294966784 }
  0x35   :  { %4552 = dma.done.wait [#allocation8], 2048  }
  0x36   :  { %4553 = vsyncadd [#allocation8], 4294965248  ;;  %vm97_vm0 = vcmask 130048   ;;  %v183_v0 = vld [vmem:[#allocation4 + $0x10] sm:$0xff]  ;;  %v184_v1 = vld [vmem:[#allocation4 + $0x18] sm:$0xff]  ;;  %v4561_v13 = vmov 0.0|0.0  }
  0x37   :  { %v86_v2 = vld [vmem:[%s5239_s0] sm:$0xff]  ;;  %v4102_v3 = vpack.c.bf16 %v184_v1, %v183_v0  ;;  %v89_v5 = vld [vmem:[#allocation4 + $0x8] sm:$0xff]  ;;  %v278_v15 = vld [vmem:[#allocation7 + $0x30] sm:$0xff]  ;;  %vm4562_vm1 = vmmov 0   ;;  %v4563_v21 = vmov 0.0   ;;  %vm179_vm2 = vcmask 785408  }
  0x38   :  { %3765 = vmatprep.mubr.msk.f32.mxu1 %vm97_vm0, %v86_v2  ;;  %v88_v4 = vld [vmem:[#allocation4] sm:$0xff]  ;;  %3758 = vmatprep.mubr.msk.f32.mxu0 %vm97_vm0, %v86_v2  ;;  %v277_v8 = vld [vmem:[#allocation7 + $0x28] sm:$0xff]  ;;  %v279_v16 = vld [vmem:[#allocation7 + $0x38] sm:$0xff]  ;;  %s4564_s19 = smov 64   ;;  %vm499_vm3 = vcmask 254976   ;;  %vm289_vm4 = vcmask 261120  }
  0x39   :  { %v4098_v6 = vpack.c.bf16 %v89_v5, %v88_v4  ;;  %v276_v7 = vld [vmem:[#allocation7 + $0x20] sm:$0xff]  ;;  %4103 = vmatprep.subr.bf16.mxu1 %v4102_v3  ;;  %v272_v10 = vld [vmem:[#allocation7 + $0x8] sm:$0xff]  ;;  %v273_v17 = vld [vmem:[#allocation7 + $0x10] sm:$0xff]  ;;  %v4707_v19 = vpack.c.bf16 %v279_v16, %v278_v15  ;;  %s4566_s26 = smov 32   ;;  %s4567_s2 = smov [#allocation10]   ;;  %vm3463_vm5 = vcmask 58368  }
  0x3a   :  { %v271_v9 = vld [vmem:[#allocation7] sm:$0xff]  ;;  %4105 = vmatpush3.bf16.msra.mxu1 %v4102_v3  ;;  %v87_v11 = vld [vmem:[%s5239_s0 + $0x8] sm:$0xff]  ;;  %v4698_v12 = vpack.c.bf16 %v277_v8, %v276_v7  ;;  %v274_v18 = vld [vmem:[#allocation7 + $0x18] sm:$0xff] }
  0x3b   :  { %4099 = vmatprep.subr.bf16.mxu0 %v4098_v6  ;;  %4112 = vmatprep.subr.bf16.mxu1 %v4561_v13  ;;  %v4701_v14 = vpack.c.bf16 %v272_v10, %v271_v9  ;;  %v4711_v20 = vpack.c.bf16 %v274_v18, %v273_v17  ;;  %v3501_v22 = vld [vmem:[%s5242_s3 + $0x1] ss:$0 sm:$0xff]  ;;  %v3497_v23 = vld [vmem:[%s5242_s3] ss:$0 sm:$0xff] }
  0x3c   :  { %4101 = vmatpush3.bf16.msra.mxu0 %v4098_v6  ;;  %v4749_v32 = vld [vmem:[%s5243_s4 + $0x1] ss:$0 sm:$0xff]  ;;  %v4754_v34 = vld [vmem:[%s5243_s4] ss:$0 sm:$0xff]  ;;  %s4565_s4 = smov 96  }
  0x3d   :  { %4106 = vmatprep.subr.bf16.mxu0 %v4561_v13  ;;  %3766 = vmatmul.mubr.msk.f32.vlgmr.msra.gmra.mrb[0].mxu1 %vm97_vm0, %v87_v11 }
  0x3e   :  { %4114 = vmatpush3.bf16.msra.mxu1 %v4698_v12  ;;  %3787 = vmatprep.mubr.msk.f32.mxu1 %vm4562_vm1, %v4563_v21 }
  0x3f   :  { %3759 = vmatmul.mubr.msk.f32.vlgmr.msra.gmra.mrb[0].mxu0 %vm97_vm0, %v87_v11  ;;  %4115 = vmatprep.subr.bf16.mxu1 %v4561_v13 }
  0x40   :  { %4108 = vmatpush3.bf16.msra.mxu0 %v4701_v14  ;;  %3776 = vmatprep.mubr.msk.f32.mxu0 %vm4562_vm1, %v4563_v21 }
  0x41   :  { %4109 = vmatprep.subr.bf16.mxu0 %v4561_v13 }
  0x42   :  { %4117 = vmatpush3.bf16.msra.mxu1 %v4707_v19 }
  0x43   :  { %4124 = vmatprep.subr.bf16.mxu1 %v4561_v13 }
  0x44   :  { %4111 = vmatpush3.bf16.msra.mxu0 %v4711_v20 }
  0x45   :  { %4118 = vmatprep.subr.bf16.mxu0 %v4561_v13  ;;  %3788 = vmatmul.mubr.f32.vlgmr.msra.gmra.mrb[2].mxu1 %v4563_v21 }
  0x46   :  { %4126 = vmatpush3.bf16.msra.mxu1 %v4698_v12  ;;  %3809 = vmatprep.mubr.msk.f32.mxu1 %vm4562_vm1, %v4563_v21 }
  0x47   :  { %3777 = vmatmul.mubr.f32.vlgmr.msra.gmra.mrb[2].mxu0 %v4563_v21  ;;  %4127 = vmatprep.subr.bf16.mxu1 %v4561_v13 }
  0x48   :  { %4120 = vmatpush3.bf16.msra.mxu0 %v4701_v14  ;;  %3798 = vmatprep.mubr.msk.f32.mxu0 %vm4562_vm1, %v4563_v21 }
  0x49   :  { %4121 = vmatprep.subr.bf16.mxu0 %v4561_v13 }
  0x4a   :  { %4129 = vmatpush3.bf16.msra.mxu1 %v4707_v19 }
  0x4b   :  { %4136 = vmatprep.subr.bf16.mxu1 %v4561_v13 }
  0x4c   :  { %4123 = vmatpush3.bf16.msra.mxu0 %v4711_v20 }
  0x4d   :  { %4130 = vmatprep.subr.bf16.mxu0 %v4561_v13 }
 0x110   :  { %v3767_v24 = vpop.f32.mrb[0].mxu1 }
 0x111   :  { %v265_v25 = vadd.f32 %v3767_v24, %v3501_v22  ;;  %v259_v26 = vpop.f32.mrb[1].mxu1 }
 0x112   :  { %v3760_v27 = vpop.f32.mrb[0].mxu0  ;;  %v260_v28 = vadd.f32 %v3501_v22, %v259_v26 }
 0x113   :  { %v176_v29 = vadd.f32 %v3760_v27, %v3497_v23  ;;  %v170_v30 = vpop.f32.mrb[1].mxu0  ;;  %270 = vst.msk [vmem:[#allocation3 + $0x18] sm:$0xff] %vm179_vm2, %v265_v25 }
 0x114   :  { %v171_v31 = vadd.f32 %v3497_v23, %v170_v30  ;;  %269 = vst.msk [vmem:[#allocation3 + $0x10] sm:$0xff] %vm179_vm2, %v260_v28 }
 0x115   :  { %181 = vst.msk [vmem:[#allocation3 + $0x8] sm:$0xff] %vm179_vm2, %v176_v29 }
 0x116   :  { %180 = vst.msk [vmem:[#allocation3] sm:$0xff] %vm179_vm2, %v171_v31 }
 0x118   :  { %v435_v33 = vpop.f32.mrb[2].mxu1 }
 0x119   :  { %v436_v35 = vadd.f32 %v4749_v32, %v435_v33  ;;  %v3789_v36 = vpop.f32.mrb[3].mxu1 }
 0x11a   :  { %v359_v37 = vpop.f32.mrb[2].mxu0  ;;  %v468_v40 = vld [vmem:[#allocation3 + $0x1e] sm:$0x3]  ;;  %v681_v22 = vld [vmem:[#allocation3 + $0x1c] sm:$0x3] }
 0x11b   :  { %v3778_v38 = vpop.f32.mrb[3].mxu0  ;;  %477 = vrot.lane.b32.xlu0 %v436_v35, %s4564_s19  ;;  %v360_v39 = vadd.f32 %v4754_v34, %v359_v37  ;;  %v469_v41 = vadd.f32 %v468_v40, %v436_v35 }
 0x11d   :  { %v439_v42 = vld [vmem:[#allocation3] sm:$0x3]  ;;  %v3508_v43 = vmul.f32 -1.442695, %v469_v41  ;;  %v652_v24 = vld [vmem:[#allocation3 + $0x2] sm:$0x3] }
 0x11e   :  { %v440_v44 = vadd.f32 %v439_v42, %v360_v39 }
 0x11f   :  { %448 = vrot.lane.b32.xlu0 %v360_v39, %s4564_s19  ;;  %4310 = vpow2.f32 %v3508_v43 }
 0x120   :  { %v3507_v45 = vmul.f32 -1.442695, %v440_v44 }
 0x122   :  { %4312 = vpow2.f32 %v3507_v45 }
 0x129   :  { %v4311_v46 = vpop.eup %4310 }
 0x12a   :  { %v473_v47 = vadd.f32 1.0, %v4311_v46 }
 0x12c   :  { %v4313_v48 = vpop.eup %4312  ;;  %4314 = vrcp.f32 %v473_v47 }
 0x12d   :  { %v444_v49 = vadd.f32 1.0, %v4313_v48 }
 0x12f   :  { %4316 = vrcp.f32 %v444_v49 }
 0x136   :  { %v4315_v50 = vpop.eup %4314 }
 0x137   :  { %v487_v62 = vsub.f32 1.0, %v4315_v50  ;;  %v493_v0 = vmul.f32 0.0, %v4315_v50 }
 0x139   :  { %v4317_v53 = vpop.eup %4316 }
 0x13a   :  { %v458_v3 = vsub.f32 1.0, %v4317_v53  ;;  %v464_v5 = vmul.f32 0.0, %v4317_v53 }
 0x18d   :  { %v478_v51 = vpop.permute.xlu0 %477 }
 0x18e   :  { %v480_v52 = vmul.f32 %v4315_v50, %v478_v51 }
 0x190   :  { %482 = vrot.lane.b32.xlu1 %v480_v52, %s4564_s19 }
 0x191   :  { %v449_v54 = vpop.permute.xlu0 %448 }
 0x192   :  { %v451_v55 = vmul.f32 %v4317_v53, %v449_v54 }
 0x194   :  { %453 = vrot.lane.b32.xlu1 %v451_v55, %s4564_s19 }
 0x202   :  { %v483_v56 = vpop.permute.xlu1 %482 }
 0x203   :  { %v485_v57 = vadd.f32 %v483_v56, %v468_v40 }
 0x205   :  { %4318 = vtanh.f32 %v485_v57 }
 0x206   :  { %v454_v58 = vpop.permute.xlu1 %453 }
 0x207   :  { %v456_v59 = vadd.f32 %v454_v58, %v439_v42 }
 0x209   :  { %4320 = vtanh.f32 %v456_v59 }
 0x20f   :  { %v4319_v60 = vpop.eup %4318 }
 0x210   :  { %489 = vrot.lane.b32.xlu0 %v4319_v60, %s4565_s4 }
 0x213   :  { %v4321_v61 = vpop.eup %4320 }
 0x214   :  { %460 = vrot.lane.b32.xlu1 %v4321_v61, %s4565_s4 }
 0x282   :  { %v490_v63 = vpop.permute.xlu0 %489 }
 0x283   :  { %v492_v1 = vmul.f32 %v490_v63, %v487_v62 }
 0x285   :  { %v4764_v2 = vadd.f32 %v493_v0, %v492_v1  ;;  %v894_v0 = vld [vmem:[#allocation3 + $0x1a] sm:$0x3] }
 0x286   :  { %v461_v4 = vpop.permute.xlu1 %460 }
 0x287   :  { %v463_v6 = vmul.f32 %v461_v4, %v458_v3  ;;  %502 = vrot.lane.b32.xlu0 %v4764_v2, %s4565_s4 }
 0x289   :  { %v4768_v7 = vadd.f32 %v464_v5, %v463_v6 }
 0x28b   :  { %496 = vrot.lane.b32.xlu1 %v4768_v7, %s4565_s4 }
 0x2f9   :  { %v503_v8 = vpop.permute.xlu0 %502 }
 0x2fa   :  { %506 = vst.msk [vmem:[#allocation2 + $0x1e] sm:$0x3] %vm499_vm3, %v503_v8  ;;  %3810 = vmatmul.mubr.msk.f32.vlgmr.msra.gmra.mrb[4].mxu1 %vm289_vm4, %v503_v8 }
 0x2fb   :  { %4138 = vmatpush3.bf16.msra.mxu1 %v4698_v12  ;;  %3831 = vmatprep.mubr.msk.f32.mxu1 %vm4562_vm1, %v4563_v21 }
 0x2fc   :  { %4139 = vmatprep.subr.bf16.mxu1 %v4561_v13 }
 0x2fd   :  { %v497_v9 = vpop.permute.xlu1 %496 }
 0x2fe   :  { %500 = vst.msk [vmem:[#allocation2] sm:$0x3] %vm499_vm3, %v497_v9  ;;  %3799 = vmatmul.mubr.msk.f32.vlgmr.msra.gmra.mrb[4].mxu0 %vm289_vm4, %v497_v9 }
 0x2ff   :  { %4132 = vmatpush3.bf16.msra.mxu0 %v4701_v14  ;;  %4141 = vmatpush3.bf16.msra.mxu1 %v4707_v19 }
 0x300   :  { %4133 = vmatprep.subr.bf16.mxu0 %v4561_v13  ;;  %3820 = vmatprep.mubr.msk.f32.mxu0 %vm4562_vm1, %v4563_v21 }
 0x301   :  { %4148 = vmatprep.subr.bf16.mxu1 %v4561_v13 }
 0x303   :  { %4135 = vmatpush3.bf16.msra.mxu0 %v4711_v20 }
 0x304   :  { %4142 = vmatprep.subr.bf16.mxu0 %v4561_v13 }
 0x3cd   :  { %v647_v10 = vpop.f32.mrb[4].mxu1 }
 0x3ce   :  { %v648_v11 = vadd.f32 %v4749_v32, %v647_v10  ;;  %v3811_v15 = vpop.f32.mrb[5].mxu1 }
 0x3d0   :  { %690 = vrot.lane.b32.xlu0 %v648_v11, %s4564_s19  ;;  %v682_v23 = vadd.f32 %v681_v22, %v648_v11 }
 0x3d1   :  { %v575_v16 = vpop.f32.mrb[4].mxu0 }
 0x3d2   :  { %v576_v17 = vadd.f32 %v4754_v34, %v575_v16  ;;  %v3800_v18 = vpop.f32.mrb[5].mxu0  ;;  %v3512_v25 = vmul.f32 -1.442695, %v682_v23 }
 0x3d4   :  { %661 = vrot.lane.b32.xlu1 %v576_v17, %s4564_s19  ;;  %v653_v26 = vadd.f32 %v652_v24, %v576_v17  ;;  %4322 = vpow2.f32 %v3512_v25 }
 0x3d6   :  { %v3511_v27 = vmul.f32 -1.442695, %v653_v26 }
 0x3d8   :  { %4324 = vpow2.f32 %v3511_v27 }
 0x3de   :  { %v4323_v28 = vpop.eup %4322 }
 0x3df   :  { %v686_v29 = vadd.f32 1.0, %v4323_v28 }
 0x3e1   :  { %4326 = vrcp.f32 %v686_v29 }
 0x3e2   :  { %v4325_v30 = vpop.eup %4324 }
 0x3e3   :  { %v657_v31 = vadd.f32 1.0, %v4325_v30 }
 0x3e5   :  { %4328 = vrcp.f32 %v657_v31 }
 0x3eb   :  { %v4327_v33 = vpop.eup %4326 }
 0x3ec   :  { %v700_v46 = vsub.f32 1.0, %v4327_v33  ;;  %v706_v48 = vmul.f32 %v4327_v33, %v4764_v2  ;;  %v865_v2 = vld [vmem:[#allocation3 + $0x4] sm:$0x3] }
 0x3ef   :  { %v4329_v37 = vpop.eup %4328 }
 0x3f0   :  { %v671_v51 = vsub.f32 1.0, %v4329_v37  ;;  %v677_v53 = vmul.f32 %v4329_v37, %v4768_v7 }
 0x442   :  { %v691_v35 = vpop.permute.xlu0 %690 }
 0x443   :  { %v693_v36 = vmul.f32 %v4327_v33, %v691_v35 }
 0x445   :  { %695 = vrot.lane.b32.xlu0 %v693_v36, %s4564_s19 }
 0x446   :  { %v662_v38 = vpop.permute.xlu1 %661 }
 0x447   :  { %v664_v39 = vmul.f32 %v4329_v37, %v662_v38 }
 0x449   :  { %666 = vrot.lane.b32.xlu1 %v664_v39, %s4564_s19 }
 0x4b7   :  { %v696_v40 = vpop.permute.xlu0 %695 }
 0x4b8   :  { %v698_v41 = vadd.f32 %v696_v40, %v681_v22 }
 0x4ba   :  { %4330 = vtanh.f32 %v698_v41 }
 0x4bb   :  { %v667_v42 = vpop.permute.xlu1 %666 }
 0x4bc   :  { %v669_v43 = vadd.f32 %v667_v42, %v652_v24 }
 0x4be   :  { %4332 = vtanh.f32 %v669_v43 }
 0x4c4   :  { %v4331_v44 = vpop.eup %4330 }
 0x4c5   :  { %702 = vrot.lane.b32.xlu0 %v4331_v44, %s4565_s4 }
 0x4c8   :  { %v4333_v45 = vpop.eup %4332 }
 0x4c9   :  { %673 = vrot.lane.b32.xlu1 %v4333_v45, %s4565_s4 }
 0x537   :  { %v703_v47 = vpop.permute.xlu0 %702 }
 0x538   :  { %v705_v49 = vmul.f32 %v703_v47, %v700_v46 }
 0x53a   :  { %v4797_v50 = vadd.f32 %v706_v48, %v705_v49  ;;  %v1107_v48 = vld [vmem:[#allocation3 + $0x18] sm:$0x3] }
 0x53b   :  { %v674_v52 = vpop.permute.xlu1 %673 }
 0x53c   :  { %v676_v54 = vmul.f32 %v674_v52, %v671_v51  ;;  %715 = vrot.lane.b32.xlu0 %v4797_v50, %s4565_s4 }
 0x53e   :  { %v4802_v55 = vadd.f32 %v677_v53, %v676_v54 }
 0x540   :  { %709 = vrot.lane.b32.xlu1 %v4802_v55, %s4565_s4 }
 0x5ae   :  { %v716_v56 = vpop.permute.xlu0 %715 }
 0x5af   :  { %719 = vst.msk [vmem:[#allocation2 + $0x1c] sm:$0x3] %vm499_vm3, %v716_v56  ;;  %3832 = vmatmul.mubr.msk.f32.vlgmr.msra.gmra.mrb[6].mxu1 %vm289_vm4, %v716_v56 }
 0x5b0   :  { %4150 = vmatpush3.bf16.msra.mxu1 %v4698_v12  ;;  %3853 = vmatprep.mubr.msk.f32.mxu1 %vm4562_vm1, %v4563_v21 }
 0x5b1   :  { %4151 = vmatprep.subr.bf16.mxu1 %v4561_v13 }
 0x5b2   :  { %v710_v57 = vpop.permute.xlu1 %709 }
 0x5b3   :  { %713 = vst.msk [vmem:[#allocation2 + $0x2] sm:$0x3] %vm499_vm3, %v710_v57  ;;  %3821 = vmatmul.mubr.msk.f32.vlgmr.msra.gmra.mrb[6].mxu0 %vm289_vm4, %v710_v57 }
 0x5b4   :  { %4144 = vmatpush3.bf16.msra.mxu0 %v4701_v14  ;;  %4153 = vmatpush3.bf16.msra.mxu1 %v4707_v19 }
 0x5b5   :  { %4145 = vmatprep.subr.bf16.mxu0 %v4561_v13  ;;  %3842 = vmatprep.mubr.msk.f32.mxu0 %vm4562_vm1, %v4563_v21 }
 0x5b6   :  { %4160 = vmatprep.subr.bf16.mxu1 %v4561_v13 }
 0x5b8   :  { %4147 = vmatpush3.bf16.msra.mxu0 %v4711_v20 }
 0x5b9   :  { %4154 = vmatprep.subr.bf16.mxu0 %v4561_v13 }
 0x682   :  { %v860_v58 = vpop.f32.mrb[6].mxu1 }
 0x683   :  { %v861_v59 = vadd.f32 %v4749_v32, %v860_v58  ;;  %v3833_v60 = vpop.f32.mrb[7].mxu1 }
 0x685   :  { %903 = vrot.lane.b32.xlu0 %v861_v59, %s4564_s19  ;;  %v895_v1 = vadd.f32 %v894_v0, %v861_v59 }
 0x686   :  { %v788_v61 = vpop.f32.mrb[6].mxu0 }
 0x687   :  { %v789_v62 = vadd.f32 %v4754_v34, %v788_v61  ;;  %v3822_v63 = vpop.f32.mrb[7].mxu0  ;;  %v3516_v3 = vmul.f32 -1.442695, %v895_v1 }
 0x689   :  { %874 = vrot.lane.b32.xlu1 %v789_v62, %s4564_s19  ;;  %v866_v4 = vadd.f32 %v865_v2, %v789_v62  ;;  %4334 = vpow2.f32 %v3516_v3 }
 0x68b   :  { %v3515_v5 = vmul.f32 -1.442695, %v866_v4 }
 0x68d   :  { %4336 = vpow2.f32 %v3515_v5 }
 0x693   :  { %v4335_v6 = vpop.eup %4334 }
 0x694   :  { %v899_v7 = vadd.f32 1.0, %v4335_v6 }
 0x696   :  { %4338 = vrcp.f32 %v899_v7 }
 0x697   :  { %v4337_v8 = vpop.eup %4336 }
 0x698   :  { %v870_v9 = vadd.f32 1.0, %v4337_v8 }
 0x69a   :  { %4340 = vrcp.f32 %v870_v9 }
 0x6a0   :  { %v4339_v10 = vpop.eup %4338 }
 0x6a1   :  { %v913_v28 = vsub.f32 1.0, %v4339_v10  ;;  %v919_v30 = vmul.f32 %v4339_v10, %v4797_v50  ;;  %v1078_v50 = vld [vmem:[#allocation3 + $0x6] sm:$0x3] }
 0x6a4   :  { %v4341_v16 = vpop.eup %4340 }
 0x6a5   :  { %v884_v35 = vsub.f32 1.0, %v4341_v16  ;;  %v890_v37 = vmul.f32 %v4341_v16, %v4802_v55 }
 0x6f7   :  { %v904_v11 = vpop.permute.xlu0 %903 }
 0x6f8   :  { %v906_v15 = vmul.f32 %v4339_v10, %v904_v11 }
 0x6fa   :  { %908 = vrot.lane.b32.xlu0 %v906_v15, %s4564_s19 }
 0x6fb   :  { %v875_v17 = vpop.permute.xlu1 %874 }
 0x6fc   :  { %v877_v18 = vmul.f32 %v4341_v16, %v875_v17 }
 0x6fe   :  { %879 = vrot.lane.b32.xlu1 %v877_v18, %s4564_s19 }
 0x76c   :  { %v909_v22 = vpop.permute.xlu0 %908 }
 0x76d   :  { %v911_v23 = vadd.f32 %v909_v22, %v894_v0 }
 0x76f   :  { %4342 = vtanh.f32 %v911_v23 }
 0x770   :  { %v880_v24 = vpop.permute.xlu1 %879 }
 0x771   :  { %v882_v25 = vadd.f32 %v880_v24, %v865_v2 }
 0x773   :  { %4344 = vtanh.f32 %v882_v25 }
 0x779   :  { %v4343_v26 = vpop.eup %4342 }
 0x77a   :  { %915 = vrot.lane.b32.xlu0 %v4343_v26, %s4565_s4 }
 0x77d   :  { %v4345_v27 = vpop.eup %4344 }
 0x77e   :  { %886 = vrot.lane.b32.xlu1 %v4345_v27, %s4565_s4 }
 0x7ec   :  { %v916_v29 = vpop.permute.xlu0 %915 }
 0x7ed   :  { %v918_v31 = vmul.f32 %v916_v29, %v913_v28 }
 0x7ef   :  { %v4831_v33 = vadd.f32 %v919_v30, %v918_v31  ;;  %v1320_v30 = vld [vmem:[#allocation3 + $0x16] sm:$0x3] }
 0x7f0   :  { %v887_v36 = vpop.permute.xlu1 %886 }
 0x7f1   :  { %v889_v38 = vmul.f32 %v887_v36, %v884_v35  ;;  %928 = vrot.lane.b32.xlu0 %v4831_v33, %s4565_s4 }
 0x7f3   :  { %v4836_v39 = vadd.f32 %v890_v37, %v889_v38 }
 0x7f5   :  { %922 = vrot.lane.b32.xlu1 %v4836_v39, %s4565_s4 }
 0x863   :  { %v929_v40 = vpop.permute.xlu0 %928 }
 0x864   :  { %932 = vst.msk [vmem:[#allocation2 + $0x1a] sm:$0x3] %vm499_vm3, %v929_v40  ;;  %3854 = vmatmul.mubr.msk.f32.vlgmr.msra.gmra.mrb[8].mxu1 %vm289_vm4, %v929_v40 }
 0x865   :  { %4162 = vmatpush3.bf16.msra.mxu1 %v4698_v12  ;;  %3875 = vmatprep.mubr.msk.f32.mxu1 %vm4562_vm1, %v4563_v21 }
 0x866   :  { %4163 = vmatprep.subr.bf16.mxu1 %v4561_v13 }
 0x867   :  { %v923_v41 = vpop.permute.xlu1 %922 }
 0x868   :  { %926 = vst.msk [vmem:[#allocation2 + $0x4] sm:$0x3] %vm499_vm3, %v923_v41  ;;  %3843 = vmatmul.mubr.msk.f32.vlgmr.msra.gmra.mrb[8].mxu0 %vm289_vm4, %v923_v41 }
 0x869   :  { %4156 = vmatpush3.bf16.msra.mxu0 %v4701_v14  ;;  %4165 = vmatpush3.bf16.msra.mxu1 %v4707_v19 }
 0x86a   :  { %4157 = vmatprep.subr.bf16.mxu0 %v4561_v13  ;;  %3864 = vmatprep.mubr.msk.f32.mxu0 %vm4562_vm1, %v4563_v21 }
 0x86b   :  { %4172 = vmatprep.subr.bf16.mxu1 %v4561_v13 }
 0x86d   :  { %4159 = vmatpush3.bf16.msra.mxu0 %v4711_v20 }
 0x86e   :  { %4166 = vmatprep.subr.bf16.mxu0 %v4561_v13 }
 0x937   :  { %v1073_v42 = vpop.f32.mrb[8].mxu1 }
 0x938   :  { %v1074_v43 = vadd.f32 %v4749_v32, %v1073_v42  ;;  %v3855_v44 = vpop.f32.mrb[9].mxu1 }
 0x93a   :  { %1116 = vrot.lane.b32.xlu0 %v1074_v43, %s4564_s19  ;;  %v1108_v49 = vadd.f32 %v1107_v48, %v1074_v43 }
 0x93b   :  { %v1001_v45 = vpop.f32.mrb[8].mxu0 }
 0x93c   :  { %v1002_v46 = vadd.f32 %v4754_v34, %v1001_v45  ;;  %v3844_v47 = vpop.f32.mrb[9].mxu0  ;;  %v3520_v51 = vmul.f32 -1.442695, %v1108_v49 }
 0x93e   :  { %1087 = vrot.lane.b32.xlu1 %v1002_v46, %s4564_s19  ;;  %v1079_v52 = vadd.f32 %v1078_v50, %v1002_v46  ;;  %4346 = vpow2.f32 %v3520_v51 }
 0x940   :  { %v3519_v53 = vmul.f32 -1.442695, %v1079_v52 }
 0x942   :  { %4348 = vpow2.f32 %v3519_v53 }
 0x948   :  { %v4347_v54 = vpop.eup %4346 }
 0x949   :  { %v1112_v55 = vadd.f32 1.0, %v4347_v54 }
 0x94b   :  { %4350 = vrcp.f32 %v1112_v55 }
 0x94c   :  { %v4349_v56 = vpop.eup %4348 }
 0x94d   :  { %v1083_v57 = vadd.f32 1.0, %v4349_v56 }
 0x94f   :  { %4352 = vrcp.f32 %v1083_v57 }
 0x955   :  { %v4351_v58 = vpop.eup %4350 }
 0x956   :  { %v1126_v6 = vsub.f32 1.0, %v4351_v58  ;;  %v1132_v8 = vmul.f32 %v4351_v58, %v4831_v33  ;;  %v1291_v33 = vld [vmem:[#allocation3 + $0x8] sm:$0x3] }
 0x959   :  { %v4353_v61 = vpop.eup %4352 }
 0x95a   :  { %v1097_v11 = vsub.f32 1.0, %v4353_v61  ;;  %v1103_v16 = vmul.f32 %v4353_v61, %v4836_v39 }
 0x9ac   :  { %v1117_v59 = vpop.permute.xlu0 %1116 }
 0x9ad   :  { %v1119_v60 = vmul.f32 %v4351_v58, %v1117_v59 }
 0x9af   :  { %1121 = vrot.lane.b32.xlu0 %v1119_v60, %s4564_s19 }
 0x9b0   :  { %v1088_v62 = vpop.permute.xlu1 %1087 }
 0x9b1   :  { %v1090_v63 = vmul.f32 %v4353_v61, %v1088_v62 }
 0x9b3   :  { %1092 = vrot.lane.b32.xlu1 %v1090_v63, %s4564_s19 }
 0xa21   :  { %v1122_v0 = vpop.permute.xlu0 %1121 }
 0xa22   :  { %v1124_v1 = vadd.f32 %v1122_v0, %v1107_v48 }
 0xa24   :  { %4354 = vtanh.f32 %v1124_v1 }
 0xa25   :  { %v1093_v2 = vpop.permute.xlu1 %1092 }
 0xa26   :  { %v1095_v3 = vadd.f32 %v1093_v2, %v1078_v50 }
 0xa28   :  { %4356 = vtanh.f32 %v1095_v3 }
 0xa2e   :  { %v4355_v4 = vpop.eup %4354 }
 0xa2f   :  { %1128 = vrot.lane.b32.xlu0 %v4355_v4, %s4565_s4 }
 0xa32   :  { %v4357_v5 = vpop.eup %4356 }
 0xa33   :  { %1099 = vrot.lane.b32.xlu1 %v4357_v5, %s4565_s4 }
 0xaa1   :  { %v1129_v7 = vpop.permute.xlu0 %1128 }
 0xaa2   :  { %v1131_v9 = vmul.f32 %v1129_v7, %v1126_v6 }
 0xaa4   :  { %v4865_v10 = vadd.f32 %v1132_v8, %v1131_v9  ;;  %v1533_v8 = vld [vmem:[#allocation3 + $0x14] sm:$0x3] }
 0xaa5   :  { %v1100_v15 = vpop.permute.xlu1 %1099 }
 0xaa6   :  { %v1102_v17 = vmul.f32 %v1100_v15, %v1097_v11  ;;  %1141 = vrot.lane.b32.xlu0 %v4865_v10, %s4565_s4 }
 0xaa8   :  { %v4870_v18 = vadd.f32 %v1103_v16, %v1102_v17 }
 0xaaa   :  { %1135 = vrot.lane.b32.xlu1 %v4870_v18, %s4565_s4 }
 0xb18   :  { %v1142_v22 = vpop.permute.xlu0 %1141 }
 0xb19   :  { %1145 = vst.msk [vmem:[#allocation2 + $0x18] sm:$0x3] %vm499_vm3, %v1142_v22  ;;  %3876 = vmatmul.mubr.msk.f32.vlgmr.msra.gmra.mrb[10].mxu1 %vm289_vm4, %v1142_v22 }
 0xb1a   :  { %4174 = vmatpush3.bf16.msra.mxu1 %v4698_v12  ;;  %3897 = vmatprep.mubr.msk.f32.mxu1 %vm4562_vm1, %v4563_v21 }
 0xb1b   :  { %4175 = vmatprep.subr.bf16.mxu1 %v4561_v13 }
 0xb1c   :  { %v1136_v23 = vpop.permute.xlu1 %1135 }
 0xb1d   :  { %1139 = vst.msk [vmem:[#allocation2 + $0x6] sm:$0x3] %vm499_vm3, %v1136_v23  ;;  %3865 = vmatmul.mubr.msk.f32.vlgmr.msra.gmra.mrb[10].mxu0 %vm289_vm4, %v1136_v23 }
 0xb1e   :  { %4168 = vmatpush3.bf16.msra.mxu0 %v4701_v14  ;;  %4177 = vmatpush3.bf16.msra.mxu1 %v4707_v19 }
 0xb1f   :  { %4169 = vmatprep.subr.bf16.mxu0 %v4561_v13  ;;  %3886 = vmatprep.mubr.msk.f32.mxu0 %vm4562_vm1, %v4563_v21 }
 0xb20   :  { %4184 = vmatprep.subr.bf16.mxu1 %v4561_v13 }
 0xb22   :  { %4171 = vmatpush3.bf16.msra.mxu0 %v4711_v20 }
 0xb23   :  { %4178 = vmatprep.subr.bf16.mxu0 %v4561_v13 }
 0xbec   :  { %v1286_v24 = vpop.f32.mrb[10].mxu1 }
 0xbed   :  { %v1287_v25 = vadd.f32 %v4749_v32, %v1286_v24  ;;  %v3877_v26 = vpop.f32.mrb[11].mxu1 }
 0xbef   :  { %1329 = vrot.lane.b32.xlu0 %v1287_v25, %s4564_s19  ;;  %v1321_v31 = vadd.f32 %v1320_v30, %v1287_v25 }
 0xbf0   :  { %v1214_v27 = vpop.f32.mrb[10].mxu0 }
 0xbf1   :  { %v1215_v28 = vadd.f32 %v4754_v34, %v1214_v27  ;;  %v3866_v29 = vpop.f32.mrb[11].mxu0  ;;  %v3524_v35 = vmul.f32 -1.442695, %v1321_v31 }
 0xbf3   :  { %1300 = vrot.lane.b32.xlu1 %v1215_v28, %s4564_s19  ;;  %v1292_v36 = vadd.f32 %v1291_v33, %v1215_v28  ;;  %4358 = vpow2.f32 %v3524_v35 }
 0xbf5   :  { %v3523_v37 = vmul.f32 -1.442695, %v1292_v36 }
 0xbf7   :  { %4360 = vpow2.f32 %v3523_v37 }
 0xbfd   :  { %v4359_v38 = vpop.eup %4358 }
 0xbfe   :  { %v1325_v39 = vadd.f32 1.0, %v4359_v38 }
 0xc00   :  { %4362 = vrcp.f32 %v1325_v39 }
 0xc01   :  { %v4361_v40 = vpop.eup %4360 }
 0xc02   :  { %v1296_v41 = vadd.f32 1.0, %v4361_v40 }
 0xc04   :  { %4364 = vrcp.f32 %v1296_v41 }
 0xc0a   :  { %v4363_v42 = vpop.eup %4362 }
 0xc0b   :  { %v1339_v54 = vsub.f32 1.0, %v4363_v42  ;;  %v1345_v56 = vmul.f32 %v4363_v42, %v4865_v10  ;;  %v1504_v10 = vld [vmem:[#allocation3 + $0xa] sm:$0x3] }
 0xc0e   :  { %v4365_v45 = vpop.eup %4364 }
 0xc0f   :  { %v1310_v59 = vsub.f32 1.0, %v4365_v45  ;;  %v1316_v61 = vmul.f32 %v4365_v45, %v4870_v18 }
 0xc61   :  { %v1330_v43 = vpop.permute.xlu0 %1329 }
 0xc62   :  { %v1332_v44 = vmul.f32 %v4363_v42, %v1330_v43 }
 0xc64   :  { %1334 = vrot.lane.b32.xlu0 %v1332_v44, %s4564_s19 }
 0xc65   :  { %v1301_v46 = vpop.permute.xlu1 %1300 }
 0xc66   :  { %v1303_v47 = vmul.f32 %v4365_v45, %v1301_v46 }
 0xc68   :  { %1305 = vrot.lane.b32.xlu1 %v1303_v47, %s4564_s19 }
 0xcd6   :  { %v1335_v48 = vpop.permute.xlu0 %1334 }
 0xcd7   :  { %v1337_v49 = vadd.f32 %v1335_v48, %v1320_v30 }
 0xcd9   :  { %4366 = vtanh.f32 %v1337_v49 }
 0xcda   :  { %v1306_v50 = vpop.permute.xlu1 %1305 }
 0xcdb   :  { %v1308_v51 = vadd.f32 %v1306_v50, %v1291_v33 }
 0xcdd   :  { %4368 = vtanh.f32 %v1308_v51 }
 0xce3   :  { %v4367_v52 = vpop.eup %4366 }
 0xce4   :  { %1341 = vrot.lane.b32.xlu0 %v4367_v52, %s4565_s4 }
 0xce7   :  { %v4369_v53 = vpop.eup %4368 }
 0xce8   :  { %1312 = vrot.lane.b32.xlu1 %v4369_v53, %s4565_s4 }
 0xd56   :  { %v1342_v55 = vpop.permute.xlu0 %1341 }
 0xd57   :  { %v1344_v57 = vmul.f32 %v1342_v55, %v1339_v54  ;;  %v1717_v55 = vld [vmem:[#allocation3 + $0xc] sm:$0x3] }
 0xd59   :  { %v4899_v58 = vadd.f32 %v1345_v56, %v1344_v57 }
 0xd5a   :  { %v1313_v60 = vpop.permute.xlu1 %1312 }
 0xd5b   :  { %v1315_v62 = vmul.f32 %v1313_v60, %v1310_v59  ;;  %1354 = vrot.lane.b32.xlu0 %v4899_v58, %s4565_s4 }
 0xd5d   :  { %v4904_v63 = vadd.f32 %v1316_v61, %v1315_v62 }
 0xd5f   :  { %1348 = vrot.lane.b32.xlu1 %v4904_v63, %s4565_s4 }
 0xdcd   :  { %v1355_v0 = vpop.permute.xlu0 %1354 }
 0xdce   :  { %1358 = vst.msk [vmem:[#allocation2 + $0x16] sm:$0x3] %vm499_vm3, %v1355_v0  ;;  %3898 = vmatmul.mubr.msk.f32.vlgmr.msra.gmra.mrb[12].mxu1 %vm289_vm4, %v1355_v0 }
 0xdcf   :  { %4186 = vmatpush3.bf16.msra.mxu1 %v4698_v12  ;;  %3919 = vmatprep.mubr.msk.f32.mxu1 %vm4562_vm1, %v4563_v21 }
 0xdd0   :  { %4187 = vmatprep.subr.bf16.mxu1 %v4561_v13 }
 0xdd1   :  { %v1349_v1 = vpop.permute.xlu1 %1348 }
 0xdd2   :  { %1352 = vst.msk [vmem:[#allocation2 + $0x8] sm:$0x3] %vm499_vm3, %v1349_v1  ;;  %3887 = vmatmul.mubr.msk.f32.vlgmr.msra.gmra.mrb[12].mxu0 %vm289_vm4, %v1349_v1 }
 0xdd3   :  { %4180 = vmatpush3.bf16.msra.mxu0 %v4701_v14  ;;  %4189 = vmatpush3.bf16.msra.mxu1 %v4707_v19 }
 0xdd4   :  { %4181 = vmatprep.subr.bf16.mxu0 %v4561_v13  ;;  %3908 = vmatprep.mubr.msk.f32.mxu0 %vm4562_vm1, %v4563_v21 }
 0xdd5   :  { %4196 = vmatprep.subr.bf16.mxu1 %v4561_v13 }
 0xdd7   :  { %4183 = vmatpush3.bf16.msra.mxu0 %v4711_v20 }
 0xdd8   :  { %4190 = vmatprep.subr.bf16.mxu0 %v4561_v13 }
 0xea1   :  { %v1499_v2 = vpop.f32.mrb[12].mxu1 }
 0xea2   :  { %v1500_v3 = vadd.f32 %v4749_v32, %v1499_v2  ;;  %v3899_v4 = vpop.f32.mrb[13].mxu1 }
 0xea4   :  { %1542 = vrot.lane.b32.xlu0 %v1500_v3, %s4564_s19  ;;  %v1534_v9 = vadd.f32 %v1533_v8, %v1500_v3 }
 0xea5   :  { %v1427_v5 = vpop.f32.mrb[12].mxu0 }
 0xea6   :  { %v1428_v6 = vadd.f32 %v4754_v34, %v1427_v5  ;;  %v3888_v7 = vpop.f32.mrb[13].mxu0  ;;  %v3528_v11 = vmul.f32 -1.442695, %v1534_v9 }
 0xea8   :  { %1513 = vrot.lane.b32.xlu1 %v1428_v6, %s4564_s19  ;;  %v1505_v15 = vadd.f32 %v1504_v10, %v1428_v6  ;;  %4370 = vpow2.f32 %v3528_v11 }
 0xeaa   :  { %v3527_v16 = vmul.f32 -1.442695, %v1505_v15 }
 0xeac   :  { %4372 = vpow2.f32 %v3527_v16 }
 0xeb2   :  { %v4371_v17 = vpop.eup %4370 }
 0xeb3   :  { %v1538_v18 = vadd.f32 1.0, %v4371_v17 }
 0xeb5   :  { %4374 = vrcp.f32 %v1538_v18 }
 0xeb6   :  { %v4373_v22 = vpop.eup %4372 }
 0xeb7   :  { %v1509_v23 = vadd.f32 1.0, %v4373_v22 }
 0xeb9   :  { %4376 = vrcp.f32 %v1509_v23 }
 0xebf   :  { %v4375_v24 = vpop.eup %4374 }
 0xec0   :  { %v1552_v38 = vsub.f32 1.0, %v4375_v24  ;;  %v1558_v40 = vmul.f32 %v4375_v24, %v4899_v58 }
 0xec3   :  { %v4377_v27 = vpop.eup %4376 }
 0xec4   :  { %v1523_v43 = vsub.f32 1.0, %v4377_v27  ;;  %v1529_v45 = vmul.f32 %v4377_v27, %v4904_v63 }
 0xf16   :  { %v1543_v25 = vpop.permute.xlu0 %1542 }
 0xf17   :  { %v1545_v26 = vmul.f32 %v4375_v24, %v1543_v25 }
 0xf19   :  { %1547 = vrot.lane.b32.xlu0 %v1545_v26, %s4564_s19 }
 0xf1a   :  { %v1514_v28 = vpop.permute.xlu1 %1513 }
 0xf1b   :  { %v1516_v29 = vmul.f32 %v4377_v27, %v1514_v28 }
 0xf1d   :  { %1518 = vrot.lane.b32.xlu1 %v1516_v29, %s4564_s19 }
 0xf8b   :  { %v1548_v30 = vpop.permute.xlu0 %1547 }
 0xf8c   :  { %v1550_v31 = vadd.f32 %v1548_v30, %v1533_v8 }
 0xf8e   :  { %4378 = vtanh.f32 %v1550_v31 }
 0xf8f   :  { %v1519_v33 = vpop.permute.xlu1 %1518 }
 0xf90   :  { %v1521_v35 = vadd.f32 %v1519_v33, %v1504_v10 }
 0xf92   :  { %4380 = vtanh.f32 %v1521_v35 }
 0xf98   :  { %v4379_v36 = vpop.eup %4378 }
 0xf99   :  { %1554 = vrot.lane.b32.xlu0 %v4379_v36, %s4565_s4  ;;  %v1959_v36 = vld [vmem:[#allocation3 + $0x10] sm:$0x3] }
 0xf9c   :  { %v4381_v37 = vpop.eup %4380 }
 0xf9d   :  { %1525 = vrot.lane.b32.xlu1 %v4381_v37, %s4565_s4 }
0x100b   :  { %v1555_v39 = vpop.permute.xlu0 %1554 }
0x100c   :  { %v1557_v41 = vmul.f32 %v1555_v39, %v1552_v38  ;;  %v1930_v38 = vld [vmem:[#allocation3 + $0xe] sm:$0x3] }
0x100e   :  { %v4933_v42 = vadd.f32 %v1558_v40, %v1557_v41 }
0x100f   :  { %v1526_v44 = vpop.permute.xlu1 %1525 }
0x1010   :  { %v1528_v46 = vmul.f32 %v1526_v44, %v1523_v43  ;;  %1567 = vrot.lane.b32.xlu0 %v4933_v42, %s4565_s4 }
0x1012   :  { %v4938_v47 = vadd.f32 %v1529_v45, %v1528_v46 }
0x1014   :  { %1561 = vrot.lane.b32.xlu1 %v4938_v47, %s4565_s4 }
0x1082   :  { %v1568_v48 = vpop.permute.xlu0 %1567 }
0x1083   :  { %1571 = vst.msk [vmem:[#allocation2 + $0x14] sm:$0x3] %vm499_vm3, %v1568_v48  ;;  %3920 = vmatmul.mubr.msk.f32.vlgmr.msra.gmra.mrb[14].mxu1 %vm289_vm4, %v1568_v48 }
0x1084   :  { %4198 = vmatpush3.bf16.msra.mxu1 %v4698_v12  ;;  %3941 = vmatprep.mubr.msk.f32.mxu1 %vm4562_vm1, %v4563_v21 }
0x1085   :  { %4199 = vmatprep.subr.bf16.mxu1 %v4561_v13 }
0x1086   :  { %v1562_v49 = vpop.permute.xlu1 %1561 }
0x1087   :  { %1565 = vst.msk [vmem:[#allocation2 + $0xa] sm:$0x3] %vm499_vm3, %v1562_v49  ;;  %3909 = vmatmul.mubr.msk.f32.vlgmr.msra.gmra.mrb[14].mxu0 %vm289_vm4, %v1562_v49 }
0x1088   :  { %4192 = vmatpush3.bf16.msra.mxu0 %v4701_v14  ;;  %4201 = vmatpush3.bf16.msra.mxu1 %v4707_v19  ;;  %v1746_v14 = vld [vmem:[#allocation3 + $0x12] sm:$0x3] }
0x1089   :  { %4193 = vmatprep.subr.bf16.mxu0 %v4561_v13  ;;  %3930 = vmatprep.mubr.msk.f32.mxu0 %vm4562_vm1, %v4563_v21 }
0x108c   :  { %4195 = vmatpush3.bf16.msra.mxu0 %v4711_v20 }
0x1156   :  { %v1712_v12 = vpop.f32.mrb[14].mxu1 }
0x1157   :  { %v1713_v50 = vadd.f32 %v4749_v32, %v1712_v12  ;;  %v3921_v51 = vpop.f32.mrb[15].mxu1 }
0x1159   :  { %1755 = vrot.lane.b32.xlu0 %v1713_v50, %s4564_s19  ;;  %v1747_v19 = vadd.f32 %v1746_v14, %v1713_v50 }
0x115a   :  { %v1640_v52 = vpop.f32.mrb[14].mxu0 }
0x115b   :  { %v1641_v53 = vadd.f32 %v4754_v34, %v1640_v52  ;;  %v3910_v54 = vpop.f32.mrb[15].mxu0  ;;  %v3532_v56 = vmul.f32 -1.442695, %v1747_v19  ;;  %v3538_v19 = vld [vmem:[%s5244_s5 + $0x28] sm:$0xff] }
0x115d   :  { %1726 = vrot.lane.b32.xlu1 %v1641_v53, %s4564_s19  ;;  %v1718_v57 = vadd.f32 %v1717_v55, %v1641_v53  ;;  %4382 = vpow2.f32 %v3532_v56 }
0x115f   :  { %v3531_v58 = vmul.f32 -1.442695, %v1718_v57  ;;  %v3551_v57 = vld [vmem:[%s5244_s5 + $0x68] sm:$0xff] }
0x1161   :  { %4384 = vpow2.f32 %v3531_v58 }
0x1167   :  { %v4383_v20 = vpop.eup %4382 }
0x1168   :  { %v1751_v59 = vadd.f32 1.0, %v4383_v20  ;;  %v3539_v20 = vld [vmem:[%s5244_s5 + $0x30] sm:$0xff] }
0x116a   :  { %4386 = vrcp.f32 %v1751_v59  ;;  %v3540_v59 = vld [vmem:[%s5244_s5 + $0x38] sm:$0xff] }
0x116b   :  { %v4385_v60 = vpop.eup %4384 }
0x116c   :  { %v1722_v61 = vadd.f32 1.0, %v4385_v60  ;;  %v3552_v60 = vld [vmem:[%s5244_s5 + $0x70] sm:$0xff] }
0x116e   :  { %4388 = vrcp.f32 %v1722_v61  ;;  %v4206_v61 = vpack.c.bf16 %v3540_v59, %v3539_v20 }
0x1174   :  { %v4387_v62 = vpop.eup %4386 }
0x1175   :  { %v1765_v10 = vsub.f32 1.0, %v4387_v62  ;;  %v1771_v15 = vmul.f32 %v4387_v62, %v4933_v42 }
0x1178   :  { %v4389_v1 = vpop.eup %4388 }
0x1179   :  { %v1736_v18 = vsub.f32 1.0, %v4389_v1  ;;  %v1742_v23 = vmul.f32 %v4389_v1, %v4938_v47 }
0x11cb   :  { %v1756_v63 = vpop.permute.xlu0 %1755 }
0x11cc   :  { %v1758_v0 = vmul.f32 %v4387_v62, %v1756_v63  ;;  %v3553_v62 = vld [vmem:[%s5244_s5 + $0x78] sm:$0xff] }
0x11cd   :  { %v4222_v63 = vpack.c.bf16 %v3553_v62, %v3552_v60 }
0x11ce   :  { %1760 = vrot.lane.b32.xlu0 %v1758_v0, %s4564_s19 }
0x11cf   :  { %v1727_v2 = vpop.permute.xlu1 %1726 }
0x11d0   :  { %v1729_v3 = vmul.f32 %v4389_v1, %v1727_v2  ;;  %v2003_v2 = vld [vmem:[%s5244_s5] sm:$0xff] }
0x11d2   :  { %1731 = vrot.lane.b32.xlu1 %v1729_v3, %s4564_s19  ;;  %v2004_v3 = vld [vmem:[%s5244_s5 + $0x8] sm:$0xff] }
0x1240   :  { %v1761_v4 = vpop.permute.xlu0 %1760 }
0x1241   :  { %v1763_v5 = vadd.f32 %v1761_v4, %v1746_v14  ;;  %v3537_v14 = vld [vmem:[%s5244_s5 + $0x20] sm:$0xff] }
0x1242   :  { %v4202_v56 = vpack.c.bf16 %v3538_v19, %v3537_v14 }
0x1243   :  { %4390 = vtanh.f32 %v1763_v5 }
0x1244   :  { %v1732_v6 = vpop.permute.xlu1 %1731  ;;  %4203 = vmatprep.subr.bf16.mxu0 %v4202_v56 }
0x1245   :  { %v1734_v7 = vadd.f32 %v1732_v6, %v1717_v55  ;;  %v3550_v55 = vld [vmem:[%s5244_s5 + $0x60] sm:$0xff]  ;;  %v4210_v6 = vpack.c.bf16 %v2004_v3, %v2003_v2 }
0x1246   :  { %v4218_v58 = vpack.c.bf16 %v3551_v57, %v3550_v55 }
0x1247   :  { %4392 = vtanh.f32 %v1734_v7  ;;  %v3546_v7 = vld [vmem:[%s5244_s5 + $0x40] sm:$0xff] }
0x1248   :  { %4219 = vmatprep.subr.bf16.mxu1 %v4218_v58 }
0x124d   :  { %v4391_v8 = vpop.eup %4390 }
0x124e   :  { %1767 = vrot.lane.b32.xlu0 %v4391_v8, %s4565_s4  ;;  %v3547_v8 = vld [vmem:[%s5244_s5 + $0x48] sm:$0xff] }
0x1251   :  { %v4393_v9 = vpop.eup %4392 }
0x1252   :  { %1738 = vrot.lane.b32.xlu1 %v4393_v9, %s4565_s4 }
0x12c0   :  { %v1768_v11 = vpop.permute.xlu0 %1767 }
0x12c1   :  { %v1770_v16 = vmul.f32 %v1768_v11, %v1765_v10  ;;  %v4226_v11 = vpack.c.bf16 %v3547_v8, %v3546_v7 }
0x12c3   :  { %v4965_v17 = vadd.f32 %v1771_v15, %v1770_v16 }
0x12c4   :  { %v1739_v22 = vpop.permute.xlu1 %1738 }
0x12c5   :  { %v1741_v24 = vmul.f32 %v1739_v22, %v1736_v18  ;;  %1780 = vrot.lane.b32.xlu0 %v4965_v17, %s4565_s4 }
0x12c7   :  { %v4970_v25 = vadd.f32 %v1742_v23, %v1741_v24  ;;  %v2005_v24 = vld [vmem:[%s5244_s5 + $0x10] sm:$0xff] }
0x12c9   :  { %1774 = vrot.lane.b32.xlu1 %v4970_v25, %s4565_s4 }
0x1337   :  { %v1781_v26 = vpop.permute.xlu0 %1780 }
0x1338   :  { %1784 = vst.msk [vmem:[#allocation2 + $0x12] sm:$0x3] %vm499_vm3, %v1781_v26  ;;  %3942 = vmatmul.mubr.msk.f32.vlgmr.msra.gmra.mrb[16].mxu1 %vm289_vm4, %v1781_v26  ;;  %v3548_v26 = vld [vmem:[%s5244_s5 + $0x50] sm:$0xff] }
0x1339   :  { %4221 = vmatpush3.bf16.msra.mxu1 %v4218_v58 }
0x133a   :  { %4223 = vmatprep.subr.bf16.mxu1 %v4222_v63 }
0x133b   :  { %v1775_v27 = vpop.permute.xlu1 %1774 }
0x133c   :  { %1778 = vst.msk [vmem:[#allocation2 + $0xc] sm:$0x3] %vm499_vm3, %v1775_v27  ;;  %3931 = vmatmul.mubr.msk.f32.vlgmr.msra.gmra.mrb[16].mxu0 %vm289_vm4, %v1775_v27  ;;  %v3549_v27 = vld [vmem:[%s5244_s5 + $0x58] sm:$0xff] }
0x133d   :  { %4205 = vmatpush3.bf16.msra.mxu0 %v4202_v56  ;;  %4225 = vmatpush3.bf16.msra.mxu1 %v4222_v63 }
0x133e   :  { %4207 = vmatprep.subr.bf16.mxu0 %v4206_v61  ;;  %4227 = vmatprep.subr.bf16.mxu1 %v4226_v11 }
0x1341   :  { %4209 = vmatpush3.bf16.msra.mxu0 %v4206_v61 }
0x1342   :  { %4211 = vmatprep.subr.bf16.mxu0 %v4210_v6 }
0x140b   :  { %v1925_v28 = vpop.f32.mrb[16].mxu1 }
0x140c   :  { %v1926_v29 = vadd.f32 %v4749_v32, %v1925_v28  ;;  %v3943_v30 = vpop.f32.mrb[17].mxu1 }
0x140e   :  { %1968 = vrot.lane.b32.xlu0 %v1926_v29, %s4564_s19  ;;  %v1960_v37 = vadd.f32 %v1959_v36, %v1926_v29  ;;  %v2002_v29 = vld [vmem:[#allocation2 + $0x18] sm:$0xff] }
0x140f   :  { %v1853_v31 = vpop.f32.mrb[16].mxu0 }
0x1410   :  { %v1854_v33 = vadd.f32 %v4754_v34, %v1853_v31  ;;  %v3932_v35 = vpop.f32.mrb[17].mxu0  ;;  %v3536_v39 = vmul.f32 -1.442695, %v1960_v37  ;;  %v4230_v31 = vpack.c.bf16 %v3549_v27, %v3548_v26 }
0x1411   :  { %v2357_v35 = vld [vmem:[#allocation9] sm:$0xff] }
0x1412   :  { %1939 = vrot.lane.b32.xlu1 %v1854_v33, %s4564_s19  ;;  %v1931_v40 = vadd.f32 %v1930_v38, %v1854_v33  ;;  %4394 = vpow2.f32 %v3536_v39  ;;  %v1998_v33 = vld [vmem:[#allocation2] sm:$0xff]  ;;  %v2360_v39 = vld [vmem:[#allocation9 + $0x18] sm:$0xff] }
0x1414   :  { %v3535_v41 = vmul.f32 -1.442695, %v1931_v40 }
0x1416   :  { %4396 = vpow2.f32 %v3535_v41 }
0x141c   :  { %v4395_v42 = vpop.eup %4394 }
0x141d   :  { %v1964_v43 = vadd.f32 1.0, %v4395_v42  ;;  %v3545_v42 = vld [vmem:[%s5246_s7] ss:$0 sm:$0xff] }
0x141f   :  { %4398 = vrcp.f32 %v1964_v43  ;;  %v3559_v43 = vld [vmem:[%s5246_s7 + $0x1] ss:$0 sm:$0xff] }
0x1420   :  { %v4397_v32 = vpop.eup %4396 }
0x1421   :  { %v1935_v44 = vadd.f32 1.0, %v4397_v32 }
0x1423   :  { %4400 = vrcp.f32 %v1935_v44 }
0x1429   :  { %v4399_v45 = vpop.eup %4398 }
0x142a   :  { %v1978_v0 = vsub.f32 1.0, %v4399_v45  ;;  %v1984_v4 = vmul.f32 %v4399_v45, %v4965_v17 }
0x142d   :  { %v4401_v47 = vpop.eup %4400 }
0x142e   :  { %v1949_v10 = vsub.f32 1.0, %v4401_v47  ;;  %v1955_v16 = vmul.f32 %v4401_v47, %v4970_v25  ;;  %v2006_v25 = vld [vmem:[%s5244_s5 + $0x18] sm:$0xff] }
0x142f   :  { %v4214_v30 = vpack.c.bf16 %v2006_v25, %v2005_v24 }
0x1480   :  { %v1969_v46 = vpop.permute.xlu0 %1968 }
0x1481   :  { %v1971_v34 = vmul.f32 %v4399_v45, %v1969_v46 }
0x1483   :  { %1973 = vrot.lane.b32.xlu0 %v1971_v34, %s4564_s19 }
0x1484   :  { %v1940_v48 = vpop.permute.xlu1 %1939 }
0x1485   :  { %v1942_v49 = vmul.f32 %v4401_v47, %v1940_v48 }
0x1487   :  { %1944 = vrot.lane.b32.xlu1 %v1942_v49, %s4564_s19 }
0x14f5   :  { %v1974_v12 = vpop.permute.xlu0 %1973 }
0x14f6   :  { %v1976_v50 = vadd.f32 %v1974_v12, %v1959_v36  ;;  %v2358_v36 = vld [vmem:[#allocation9 + $0x8] sm:$0xff]  ;;  %v5086_v12 = vld [vmem:[%s5247_s8] ss:$0 sm:$0xff] }
0x14f7   :  { %v5046_v37 = vpack.c.bf16 %v2358_v36, %v2357_v35 }
0x14f8   :  { %4402 = vtanh.f32 %v1976_v50 }
0x14f9   :  { %v1945_v51 = vpop.permute.xlu1 %1944 }
0x14fa   :  { %v1947_v52 = vadd.f32 %v1945_v51, %v1930_v38  ;;  %v2359_v38 = vld [vmem:[#allocation9 + $0x10] sm:$0xff] }
0x14fb   :  { %v5053_v41 = vpack.c.bf16 %v2360_v39, %v2359_v38 }
0x14fc   :  { %4404 = vtanh.f32 %v1947_v52 }
0x1502   :  { %v4403_v53 = vpop.eup %4402 }
0x1503   :  { %1980 = vrot.lane.b32.xlu0 %v4403_v53, %s4565_s4 }
0x1506   :  { %v4405_v54 = vpop.eup %4404 }
0x1507   :  { %1951 = vrot.lane.b32.xlu1 %v4405_v54, %s4565_s4 }
0x1575   :  { %v1981_v1 = vpop.permute.xlu0 %1980 }
0x1576   :  { %v1983_v5 = vmul.f32 %v1981_v1, %v1978_v0 }
0x1578   :  { %v1985_v9 = vadd.f32 %v1984_v4, %v1983_v5 }
0x1579   :  { %v1952_v15 = vpop.permute.xlu1 %1951 }
0x157a   :  { %v1954_v18 = vmul.f32 %v1952_v15, %v1949_v10  ;;  %1993 = vrot.lane.b32.xlu0 %v1985_v9, %s4565_s4 }
0x157c   :  { %v1956_v17 = vadd.f32 %v1955_v16, %v1954_v18 }
0x157e   :  { %1987 = vrot.lane.b32.xlu1 %v1956_v17, %s4565_s4 }
0x15ec   :  { %v1994_v22 = vpop.permute.xlu0 %1993 }
0x15ed   :  { %1997 = vst.msk [vmem:[#allocation2 + $0x10] sm:$0x3] %vm499_vm3, %v1994_v22 }
0x15f0   :  { %v1988_v23 = vpop.permute.xlu1 %1987 }
0x15f1   :  { %1991 = vst.msk [vmem:[#allocation2 + $0xe] sm:$0x3] %vm499_vm3, %v1988_v23 }
0x15f4   :  { %v2001_v28 = vld [vmem:[#allocation2 + $0x10] sm:$0xff] }
0x15f5   :  { %3952 = vmatprep.mubr.msk.f32.mxu0 %vm289_vm4, %v2001_v28  ;;  %3974 = vmatprep.mubr.msk.f32.mxu1 %vm289_vm4, %v2001_v28 }
0x15f6   :  { %3953 = vmatmul.mubr.msk.f32.vlgmr.msra.gmra.mrb[18].mxu0 %vm289_vm4, %v2002_v29  ;;  %3975 = vmatmul.mubr.msk.f32.vlgmr.msra.gmra.mrb[18].mxu1 %vm289_vm4, %v2002_v29 }
0x15f7   :  { %4213 = vmatpush3.bf16.msra.mxu0 %v4210_v6  ;;  %3963 = vmatprep.mubr.msk.f32.mxu0 %vm289_vm4, %v1998_v33 }
0x15f8   :  { %4229 = vmatpush3.bf16.msra.mxu1 %v4226_v11  ;;  %3985 = vmatprep.mubr.msk.f32.mxu1 %vm289_vm4, %v1998_v33  ;;  %v1999_v40 = vld [vmem:[#allocation2 + $0x8] sm:$0xff] }
0x15f9   :  { %4215 = vmatprep.subr.bf16.mxu0 %v4214_v30  ;;  %4231 = vmatprep.subr.bf16.mxu1 %v4230_v31 }
0x15fb   :  { %4217 = vmatpush3.bf16.msra.mxu0 %v4214_v30 }
0x15fc   :  { %4233 = vmatpush3.bf16.msra.mxu1 %v4230_v31  ;;  %4234 = vmatprep.subr.bf16.mxu0 %v4561_v13 }
0x15fd   :  { %4240 = vmatprep.subr.bf16.mxu1 %v4561_v13 }
0x15fe   :  { %3964 = vmatmul.mubr.msk.f32.vlgmr.msra.gmra.mrb[18].mxu0 %vm289_vm4, %v1999_v40 }
0x15ff   :  { %3986 = vmatmul.mubr.msk.f32.vlgmr.msra.gmra.mrb[18].mxu1 %vm289_vm4, %v1999_v40  ;;  %4236 = vmatpush3.bf16.msra.mxu0 %v5046_v37 }
0x1600   :  { %4237 = vmatprep.subr.bf16.mxu0 %v4561_v13  ;;  %3996 = vmatprep.mubr.msk.f32.mxu0 %vm4562_vm1, %v4563_v21 }
0x1601   :  { %4242 = vmatpush3.bf16.msra.mxu1 %v5046_v37  ;;  %4007 = vmatprep.mubr.msk.f32.mxu1 %vm4562_vm1, %v4563_v21 }
0x1602   :  { %4243 = vmatprep.subr.bf16.mxu1 %v4561_v13 }
0x1603   :  { %4239 = vmatpush3.bf16.msra.mxu0 %v5053_v41 }
0x1604   :  { %4246 = vmatprep.subr.bf16.mxu0 %v4561_v13 }
0x1605   :  { %4245 = vmatpush3.bf16.msra.mxu1 %v5053_v41 }
0x1606   :  { %3997 = vmatmul.mubr.f32.vlgmr.msra.gmra.mrb[20].mxu0 %v4563_v21  ;;  %4252 = vmatprep.subr.bf16.mxu1 %v4561_v13 }
0x1607   :  { %4248 = vmatpush3.bf16.msra.mxu0 %v5046_v37  ;;  %4018 = vmatprep.mubr.msk.f32.mxu0 %vm4562_vm1, %v4563_v21 }
0x1608   :  { %4249 = vmatprep.subr.bf16.mxu0 %v4561_v13 }
0x160b   :  { %4251 = vmatpush3.bf16.msra.mxu0 %v5053_v41 }
0x160c   :  { %4258 = vmatprep.subr.bf16.mxu0 %v4561_v13 }
0x16d1   :  { %v3965_v32 = vpop.f32.mrb[18].mxu0 }
0x16d2   :  { %v2182_v44 = vadd.f32 %v3965_v32, %v3545_v42  ;;  %v3987_v45 = vpop.f32.mrb[18].mxu1  ;;  %v2165_v46 = vpop.f32.mrb[19].mxu0 }
0x16d3   :  { %v2354_v34 = vadd.f32 %v3987_v45, %v3559_v43  ;;  %v2181_v47 = vadd.f32 %v3545_v42, %v2165_v46  ;;  %v2336_v48 = vpop.f32.mrb[19].mxu1 }
0x16d4   :  { %2184 = vst.msk [vmem:[#allocation3 + $0x8] sm:$0xff] %vm179_vm2, %v2182_v44  ;;  %v2353_v49 = vadd.f32 %v3559_v43, %v2336_v48 }
0x16d5   :  { %2356 = vst.msk [vmem:[#allocation3 + $0x18] sm:$0xff] %vm179_vm2, %v2354_v34  ;;  %2183 = vst.msk [vmem:[#allocation3] sm:$0xff] %vm179_vm2, %v2181_v47 }
0x16d6   :  { %2355 = vst.msk [vmem:[#allocation3 + $0x10] sm:$0xff] %vm179_vm2, %v2353_v49 }
0x16d9   :  { %v2436_v50 = vpop.f32.mrb[20].mxu0 }
0x16da   :  { %v2437_v51 = vadd.f32 %v5086_v12, %v2436_v50  ;;  %v3998_v52 = vpop.f32.mrb[21].mxu0 }
0x16dc   :  { %2449 = vrot.lane.b32.xlu0 %v2437_v51, %s4564_s19  ;;  %v2440_v53 = vld [vmem:[#allocation3] sm:$0x3]  ;;  %v2542_v6 = vld [vmem:[#allocation3 + $0x2] sm:$0x3]  ;;  %v2644_v33 = vld [vmem:[#allocation3 + $0x4] sm:$0x3] }
0x16dd   :  { %v2441_v54 = vadd.f32 %v2440_v53, %v2437_v51 }
0x16df   :  { %v3562_v14 = vmul.f32 -1.442695, %v2441_v54  ;;  %v2746_v54 = vld [vmem:[#allocation3 + $0x6] sm:$0x3] }
0x16e1   :  { %4406 = vpow2.f32 %v3562_v14 }
0x16eb   :  { %v4407_v19 = vpop.eup %4406 }
0x16ec   :  { %v2445_v55 = vadd.f32 1.0, %v4407_v19 }
0x16ee   :  { %4408 = vrcp.f32 %v2445_v55 }
0x16f8   :  { %v4409_v56 = vpop.eup %4408 }
0x16f9   :  { %v2459_v61 = vsub.f32 1.0, %v4409_v56  ;;  %v2465_v63 = vmul.f32 0.0, %v4409_v56 }
0x174e   :  { %v2450_v57 = vpop.permute.xlu0 %2449 }
0x174f   :  { %v2452_v58 = vmul.f32 %v4409_v56, %v2450_v57 }
0x1751   :  { %2454 = vrot.lane.b32.xlu1 %v2452_v58, %s4564_s19 }
0x17c3   :  { %v2455_v20 = vpop.permute.xlu1 %2454 }
0x17c4   :  { %v2457_v59 = vadd.f32 %v2455_v20, %v2440_v53 }
0x17c6   :  { %4410 = vtanh.f32 %v2457_v59 }
0x17d0   :  { %v4411_v60 = vpop.eup %4410 }
0x17d1   :  { %2461 = vrot.lane.b32.xlu0 %v4411_v60, %s4565_s4 }
0x1843   :  { %v2462_v62 = vpop.permute.xlu0 %2461 }
0x1844   :  { %v2464_v0 = vmul.f32 %v2462_v62, %v2459_v61 }
0x1846   :  { %v2466_v1 = vadd.f32 %v2465_v63, %v2464_v0 }
0x1848   :  { %2468 = vrot.lane.b32.xlu1 %v2466_v1, %s4565_s4 }
0x18ba   :  { %v2469_v2 = vpop.permute.xlu1 %2468 }
0x18bb   :  { %4008 = vmatmul.mubr.msk.f32.vlgmr.msra.gmra.mrb[20].mxu1 %vm289_vm4, %v2469_v2 }
0x18bc   :  { %4254 = vmatpush3.bf16.msra.mxu1 %v5046_v37  ;;  %4029 = vmatprep.mubr.msk.f32.mxu1 %vm4562_vm1, %v4563_v21 }
0x18bd   :  { %4255 = vmatprep.subr.bf16.mxu1 %v4561_v13 }
0x18c0   :  { %4257 = vmatpush3.bf16.msra.mxu1 %v5053_v41 }
0x18c1   :  { %4264 = vmatprep.subr.bf16.mxu1 %v4561_v13 }
0x198e   :  { %v2538_v3 = vpop.f32.mrb[20].mxu1 }
0x198f   :  { %v2539_v4 = vadd.f32 %v5086_v12, %v2538_v3  ;;  %v4009_v5 = vpop.f32.mrb[21].mxu1 }
0x1991   :  { %2551 = vrot.lane.b32.xlu0 %v2539_v4, %s4564_s19  ;;  %v2543_v7 = vadd.f32 %v2542_v6, %v2539_v4 }
0x1993   :  { %v3564_v8 = vmul.f32 -1.442695, %v2543_v7  ;;  %v2848_v7 = vld [vmem:[#allocation3 + $0x8] sm:$0x3] }
0x1995   :  { %4412 = vpow2.f32 %v3564_v8 }
0x199f   :  { %v4413_v9 = vpop.eup %4412 }
0x19a0   :  { %v2547_v10 = vadd.f32 1.0, %v4413_v9 }
0x19a2   :  { %4414 = vrcp.f32 %v2547_v10 }
0x19ac   :  { %v4415_v11 = vpop.eup %4414 }
0x19ad   :  { %v2561_v23 = vsub.f32 1.0, %v4415_v11  ;;  %v2567_v25 = vmul.f32 %v4415_v11, %v2466_v1 }
0x1a03   :  { %v2552_v15 = vpop.permute.xlu0 %2551 }
0x1a04   :  { %v2554_v16 = vmul.f32 %v4415_v11, %v2552_v15 }
0x1a06   :  { %2556 = vrot.lane.b32.xlu1 %v2554_v16, %s4564_s19 }
0x1a78   :  { %v2557_v18 = vpop.permute.xlu1 %2556 }
0x1a79   :  { %v2559_v17 = vadd.f32 %v2557_v18, %v2542_v6 }
0x1a7b   :  { %4416 = vtanh.f32 %v2559_v17 }
0x1a85   :  { %v4417_v22 = vpop.eup %4416 }
0x1a86   :  { %2563 = vrot.lane.b32.xlu0 %v4417_v22, %s4565_s4 }
0x1af8   :  { %v2564_v24 = vpop.permute.xlu0 %2563 }
0x1af9   :  { %v2566_v26 = vmul.f32 %v2564_v24, %v2561_v23 }
0x1afb   :  { %v2568_v27 = vadd.f32 %v2567_v25, %v2566_v26 }
0x1afd   :  { %2570 = vrot.lane.b32.xlu1 %v2568_v27, %s4565_s4 }
0x1b6f   :  { %v2571_v28 = vpop.permute.xlu1 %2570 }
0x1b70   :  { %4019 = vmatmul.mubr.msk.f32.vlgmr.msra.gmra.mrb[22].mxu0 %vm289_vm4, %v2571_v28 }
0x1b71   :  { %4260 = vmatpush3.bf16.msra.mxu0 %v5046_v37  ;;  %4040 = vmatprep.mubr.msk.f32.mxu0 %vm4562_vm1, %v4563_v21 }
0x1b72   :  { %4261 = vmatprep.subr.bf16.mxu0 %v4561_v13 }
0x1b75   :  { %4263 = vmatpush3.bf16.msra.mxu0 %v5053_v41 }
0x1b76   :  { %4270 = vmatprep.subr.bf16.mxu0 %v4561_v13 }
0x1c43   :  { %v2640_v29 = vpop.f32.mrb[22].mxu0 }
0x1c44   :  { %v2641_v30 = vadd.f32 %v5086_v12, %v2640_v29  ;;  %v4020_v31 = vpop.f32.mrb[23].mxu0 }
0x1c46   :  { %2653 = vrot.lane.b32.xlu0 %v2641_v30, %s4564_s19  ;;  %v2645_v35 = vadd.f32 %v2644_v33, %v2641_v30 }
0x1c48   :  { %v3566_v36 = vmul.f32 -1.442695, %v2645_v35  ;;  %v2950_v35 = vld [vmem:[#allocation3 + $0xa] sm:$0x3] }
0x1c4a   :  { %4418 = vpow2.f32 %v3566_v36 }
0x1c54   :  { %v4419_v38 = vpop.eup %4418 }
0x1c55   :  { %v2649_v39 = vadd.f32 1.0, %v4419_v38 }
0x1c57   :  { %4420 = vrcp.f32 %v2649_v39 }
0x1c61   :  { %v4421_v40 = vpop.eup %4420 }
0x1c62   :  { %v2663_v46 = vsub.f32 1.0, %v4421_v40  ;;  %v2669_v47 = vmul.f32 %v4421_v40, %v2568_v27 }
0x1cb8   :  { %v2654_v42 = vpop.permute.xlu0 %2653 }
0x1cb9   :  { %v2656_v43 = vmul.f32 %v4421_v40, %v2654_v42 }
0x1cbb   :  { %2658 = vrot.lane.b32.xlu1 %v2656_v43, %s4564_s19 }
0x1d2d   :  { %v2659_v32 = vpop.permute.xlu1 %2658 }
0x1d2e   :  { %v2661_v44 = vadd.f32 %v2659_v32, %v2644_v33 }
0x1d30   :  { %4422 = vtanh.f32 %v2661_v44 }
0x1d3a   :  { %v4423_v45 = vpop.eup %4422 }
0x1d3b   :  { %2665 = vrot.lane.b32.xlu0 %v4423_v45, %s4565_s4 }
0x1dad   :  { %v2666_v34 = vpop.permute.xlu0 %2665 }
0x1dae   :  { %v2668_v48 = vmul.f32 %v2666_v34, %v2663_v46 }
0x1db0   :  { %v2670_v49 = vadd.f32 %v2669_v47, %v2668_v48 }
0x1db2   :  { %2672 = vrot.lane.b32.xlu1 %v2670_v49, %s4565_s4 }
0x1e24   :  { %v2673_v50 = vpop.permute.xlu1 %2672 }
0x1e25   :  { %4030 = vmatmul.mubr.msk.f32.vlgmr.msra.gmra.mrb[22].mxu1 %vm289_vm4, %v2673_v50 }
0x1e26   :  { %4266 = vmatpush3.bf16.msra.mxu1 %v5046_v37  ;;  %4051 = vmatprep.mubr.msk.f32.mxu1 %vm4562_vm1, %v4563_v21 }
0x1e27   :  { %4267 = vmatprep.subr.bf16.mxu1 %v4561_v13 }
0x1e2a   :  { %4269 = vmatpush3.bf16.msra.mxu1 %v5053_v41 }
0x1e2b   :  { %4276 = vmatprep.subr.bf16.mxu1 %v4561_v13 }
0x1ef8   :  { %v2742_v51 = vpop.f32.mrb[22].mxu1 }
0x1ef9   :  { %v2743_v52 = vadd.f32 %v5086_v12, %v2742_v51  ;;  %v4031_v53 = vpop.f32.mrb[23].mxu1 }
0x1efa   :  { %v3052_v53 = vld [vmem:[#allocation3 + $0xc] sm:$0x3] }
0x1efb   :  { %2755 = vrot.lane.b32.xlu0 %v2743_v52, %s4564_s19  ;;  %v2747_v14 = vadd.f32 %v2746_v54, %v2743_v52 }
0x1efd   :  { %v3568_v19 = vmul.f32 -1.442695, %v2747_v14 }
0x1eff   :  { %4424 = vpow2.f32 %v3568_v19 }
0x1f09   :  { %v4425_v55 = vpop.eup %4424 }
0x1f0a   :  { %v2751_v56 = vadd.f32 1.0, %v4425_v55 }
0x1f0c   :  { %4426 = vrcp.f32 %v2751_v56 }
0x1f16   :  { %v4427_v57 = vpop.eup %4426 }
0x1f17   :  { %v2765_v62 = vsub.f32 1.0, %v4427_v57  ;;  %v2771_v0 = vmul.f32 %v4427_v57, %v2670_v49 }
0x1f6d   :  { %v2756_v58 = vpop.permute.xlu0 %2755 }
0x1f6e   :  { %v2758_v20 = vmul.f32 %v4427_v57, %v2756_v58 }
0x1f70   :  { %2760 = vrot.lane.b32.xlu1 %v2758_v20, %s4564_s19 }
0x1fe2   :  { %v2761_v59 = vpop.permute.xlu1 %2760 }
0x1fe3   :  { %v2763_v60 = vadd.f32 %v2761_v59, %v2746_v54 }
0x1fe5   :  { %4428 = vtanh.f32 %v2763_v60 }
0x1fef   :  { %v4429_v61 = vpop.eup %4428 }
0x1ff0   :  { %2767 = vrot.lane.b32.xlu0 %v4429_v61, %s4565_s4 }
0x2062   :  { %v2768_v63 = vpop.permute.xlu0 %2767 }
0x2063   :  { %v2770_v1 = vmul.f32 %v2768_v63, %v2765_v62 }
0x2065   :  { %v2772_v2 = vadd.f32 %v2771_v0, %v2770_v1 }
0x2067   :  { %2774 = vrot.lane.b32.xlu1 %v2772_v2, %s4565_s4 }
0x20d9   :  { %v2775_v3 = vpop.permute.xlu1 %2774 }
0x20da   :  { %4041 = vmatmul.mubr.msk.f32.vlgmr.msra.gmra.mrb[24].mxu0 %vm289_vm4, %v2775_v3  ;;  %v3181_v3 = vld [vmem:[#allocation3 + $0x1e] sm:$0x3] }
0x20db   :  { %4272 = vmatpush3.bf16.msra.mxu0 %v5046_v37  ;;  %4062 = vmatprep.mubr.msk.f32.mxu0 %vm4562_vm1, %v4563_v21 }
0x20dc   :  { %4273 = vmatprep.subr.bf16.mxu0 %v4561_v13 }
0x20df   :  { %4275 = vmatpush3.bf16.msra.mxu0 %v5053_v41 }
0x20e0   :  { %4282 = vmatprep.subr.bf16.mxu0 %v4561_v13 }
0x21ad   :  { %v2844_v4 = vpop.f32.mrb[24].mxu0 }
0x21ae   :  { %v2845_v5 = vadd.f32 %v5086_v12, %v2844_v4  ;;  %v4042_v6 = vpop.f32.mrb[25].mxu0 }
0x21b0   :  { %2857 = vrot.lane.b32.xlu0 %v2845_v5, %s4564_s19  ;;  %v2849_v8 = vadd.f32 %v2848_v7, %v2845_v5 }
0x21b2   :  { %v3570_v9 = vmul.f32 -1.442695, %v2849_v8 }
0x21b4   :  { %4430 = vpow2.f32 %v3570_v9 }
0x21be   :  { %v4431_v10 = vpop.eup %4430 }
0x21bf   :  { %v2853_v11 = vadd.f32 1.0, %v4431_v10 }
0x21c1   :  { %4432 = vrcp.f32 %v2853_v11 }
0x21cb   :  { %v4433_v15 = vpop.eup %4432 }
0x21cc   :  { %v2867_v24 = vsub.f32 1.0, %v4433_v15  ;;  %v2873_v26 = vmul.f32 %v4433_v15, %v2772_v2  ;;  %v3577_v2 = vld [vmem:[%s5247_s8 + $0x1] ss:$0 sm:$0xff]  ;;  %s3471_s8 = sshll.u32 %s4567_s2, 4  ;;  %s3472_s8 = int_to_ptr.vmem [resolvable:$true] %s3471_s8 }
0x21cd   :  { %v3188_v4 = vadd.f32 %v3577_v2, %v3181_v3  ;;  %p4533_p11 = scmp.lt.s32.totalorder %s3472_s8, %s3472_s8 }
0x21cf   :  { %v3578_v5 = vmul.f32 -1.442695, %v3188_v4  ;;  %v3297_v4 = vld [vmem:[%s5250_s11 + $0x10] sm:$0xff] }
0x2222   :  { %v2858_v16 = vpop.permute.xlu0 %2857 }
0x2223   :  { %v2860_v18 = vmul.f32 %v4433_v15, %v2858_v16 }
0x2225   :  { %2862 = vrot.lane.b32.xlu1 %v2860_v18, %s4564_s19 }
0x2297   :  { %v2863_v17 = vpop.permute.xlu1 %2862 }
0x2298   :  { %v2865_v22 = vadd.f32 %v2863_v17, %v2848_v7 }
0x229a   :  { %4434 = vtanh.f32 %v2865_v22 }
0x22a4   :  { %v4435_v23 = vpop.eup %4434 }
0x22a5   :  { %2869 = vrot.lane.b32.xlu0 %v4435_v23, %s4565_s4 }
0x2317   :  { %v2870_v25 = vpop.permute.xlu0 %2869 }
0x2318   :  { %v2872_v27 = vmul.f32 %v2870_v25, %v2867_v24 }
0x231a   :  { %v2874_v28 = vadd.f32 %v2873_v26, %v2872_v27 }
0x231c   :  { %2876 = vrot.lane.b32.xlu1 %v2874_v28, %s4565_s4 }
0x238e   :  { %v2877_v29 = vpop.permute.xlu1 %2876 }
0x238f   :  { %4052 = vmatmul.mubr.msk.f32.vlgmr.msra.gmra.mrb[24].mxu1 %vm289_vm4, %v2877_v29 }
0x2390   :  { %4278 = vmatpush3.bf16.msra.mxu1 %v5046_v37  ;;  %4073 = vmatprep.mubr.msk.f32.mxu1 %vm4562_vm1, %v4563_v21 }
0x2391   :  { %4279 = vmatprep.subr.bf16.mxu1 %v4561_v13 }
0x2394   :  { %4281 = vmatpush3.bf16.msra.mxu1 %v5053_v41 }
0x2395   :  { %4288 = vmatprep.subr.bf16.mxu1 %v4561_v13 }
0x2462   :  { %v2946_v30 = vpop.f32.mrb[24].mxu1 }
0x2463   :  { %v2947_v31 = vadd.f32 %v5086_v12, %v2946_v30  ;;  %v4053_v33 = vpop.f32.mrb[25].mxu1 }
0x2465   :  { %2959 = vrot.lane.b32.xlu0 %v2947_v31, %s4564_s19  ;;  %v2951_v36 = vadd.f32 %v2950_v35, %v2947_v31 }
0x2467   :  { %v3572_v38 = vmul.f32 -1.442695, %v2951_v36 }
0x2469   :  { %4436 = vpow2.f32 %v3572_v38 }
0x2473   :  { %v4437_v37 = vpop.eup %4436 }
0x2474   :  { %v2955_v39 = vadd.f32 1.0, %v4437_v37 }
0x2476   :  { %4438 = vrcp.f32 %v2955_v39 }
0x2480   :  { %v4439_v40 = vpop.eup %4438 }
0x2481   :  { %v2969_v45 = vsub.f32 1.0, %v4439_v40  ;;  %v2975_v34 = vmul.f32 %v4439_v40, %v2874_v28  ;;  %v3154_v28 = vld [vmem:[#allocation3 + $0xe] sm:$0x3] }
0x24d7   :  { %v2960_v42 = vpop.permute.xlu0 %2959 }
0x24d8   :  { %v2962_v43 = vmul.f32 %v4439_v40, %v2960_v42 }
0x24da   :  { %2964 = vrot.lane.b32.xlu1 %v2962_v43, %s4564_s19 }
0x254c   :  { %v2965_v41 = vpop.permute.xlu1 %2964 }
0x254d   :  { %v2967_v32 = vadd.f32 %v2965_v41, %v2950_v35 }
0x254f   :  { %4440 = vtanh.f32 %v2967_v32 }
0x2559   :  { %v4441_v44 = vpop.eup %4440 }
0x255a   :  { %2971 = vrot.lane.b32.xlu0 %v4441_v44, %s4565_s4 }
0x25cc   :  { %v2972_v46 = vpop.permute.xlu0 %2971 }
0x25cd   :  { %v2974_v47 = vmul.f32 %v2972_v46, %v2969_v45 }
0x25cf   :  { %v2976_v48 = vadd.f32 %v2975_v34, %v2974_v47 }
0x25d1   :  { %2978 = vrot.lane.b32.xlu1 %v2976_v48, %s4565_s4 }
0x2643   :  { %v2979_v49 = vpop.permute.xlu1 %2978 }
0x2644   :  { %4063 = vmatmul.mubr.msk.f32.vlgmr.msra.gmra.mrb[26].mxu0 %vm289_vm4, %v2979_v49 }
0x2645   :  { %4084 = vmatprep.mubr.msk.f32.mxu0 %vm4562_vm1, %v4563_v21 }
0x2717   :  { %v3048_v50 = vpop.f32.mrb[26].mxu0 }
0x2718   :  { %v3049_v51 = vadd.f32 %v5086_v12, %v3048_v50  ;;  %v4064_v52 = vpop.f32.mrb[27].mxu0 }
0x271a   :  { %3061 = vrot.lane.b32.xlu0 %v3049_v51, %s4564_s19  ;;  %v3053_v54 = vadd.f32 %v3052_v53, %v3049_v51 }
0x271c   :  { %v3574_v14 = vmul.f32 -1.442695, %v3053_v54 }
0x271e   :  { %4442 = vpow2.f32 %v3574_v14  ;;  %v3582_v14 = vld [vmem:[%s5248_s9 + $0x1] ss:$0 sm:$0xff] }
0x2728   :  { %v4443_v19 = vpop.eup %4442 }
0x2729   :  { %v3057_v55 = vadd.f32 1.0, %v4443_v19 }
0x272b   :  { %4444 = vrcp.f32 %v3057_v55 }
0x2735   :  { %v4445_v56 = vpop.eup %4444 }
0x2736   :  { %v3071_v61 = vsub.f32 1.0, %v4445_v56  ;;  %v3077_v63 = vmul.f32 %v4445_v56, %v2976_v48 }
0x278c   :  { %v3062_v57 = vpop.permute.xlu0 %3061 }
0x278d   :  { %v3064_v58 = vmul.f32 %v4445_v56, %v3062_v57 }
0x278f   :  { %3066 = vrot.lane.b32.xlu1 %v3064_v58, %s4564_s19  ;;  %v3584_v58 = vld [vmem:[%s5249_s10 + $0x1] ss:$0 sm:$0xff] }
0x2801   :  { %v3067_v20 = vpop.permute.xlu1 %3066 }
0x2802   :  { %v3069_v59 = vadd.f32 %v3067_v20, %v3052_v53  ;;  %v3579_v20 = vld [vmem:[%s5248_s9] ss:$0 sm:$0xff] }
0x2804   :  { %4446 = vtanh.f32 %v3069_v59  ;;  %v3580_v59 = vld [vmem:[%s5249_s10] ss:$0 sm:$0xff] }
0x2805   :  { %4448 = vpow2.f32 %v3578_v5  ;;  %v3298_v5 = vld [vmem:[%s5250_s11 + $0x18] sm:$0xff] }
0x280e   :  { %v4447_v60 = vpop.eup %4446 }
0x280f   :  { %3073 = vrot.lane.b32.xlu0 %v4447_v60, %s4565_s4  ;;  %v4449_v6 = vpop.eup %4448  ;;  %v3585_v60 = vld [vmem:[%s5250_s11 + $0x20] sm:$0xff] }
0x2810   :  { %v3192_v7 = vadd.f32 1.0, %v4449_v6 }
0x2812   :  { %4450 = vrcp.f32 %v3192_v7  ;;  %v4292_v7 = vpack.c.bf16 %v3298_v5, %v3297_v4 }
0x281c   :  { %v4451_v9 = vpop.eup %4450 }
0x281d   :  { %v3205_v24 = vsub.f32 1.0, %v4451_v9 }
0x2881   :  { %v3074_v62 = vpop.permute.xlu0 %3073 }
0x2882   :  { %v3076_v0 = vmul.f32 %v3074_v62, %v3071_v61  ;;  %v3586_v61 = vld [vmem:[%s5250_s11 + $0x28] sm:$0xff]  ;;  %v3295_v62 = vld [vmem:[%s5250_s11] sm:$0xff] }
0x2884   :  { %v3078_v1 = vadd.f32 %v3077_v63, %v3076_v0  ;;  %v4283_v63 = vpack.c.bf16 %v3586_v61, %v3585_v60  ;;  %v3296_v0 = vld [vmem:[%s5250_s11 + $0x8] sm:$0xff] }
0x2886   :  { %3080 = vrot.lane.b32.xlu1 %v3078_v1, %s4565_s4  ;;  %4284 = vmatpush3.bf16.msra.mxu0 %v4283_v63 }
0x2887   :  { %4285 = vmatprep.subr.bf16.mxu0 %v4561_v13 }
0x288a   :  { %3195 = vrot.lane.b32.xlu1 %v3577_v2, %s4564_s19  ;;  %v3588_v2 = vld [vmem:[%s5250_s11 + $0x38] sm:$0xff] }
0x28f8   :  { %v3081_v8 = vpop.permute.xlu1 %3080 }
0x28f9   :  { %4074 = vmatmul.mubr.msk.f32.vlgmr.msra.gmra.mrb[26].mxu1 %vm289_vm4, %v3081_v8 }
0x28fa   :  { %4095 = vmatprep.mubr.msk.f32.mxu1 %vm4562_vm1, %v4563_v21  ;;  %v3211_v21 = vmul.f32 0.0, %v4451_v9 }
0x28fc   :  { %v3196_v10 = vpop.permute.xlu1 %3195 }
0x28fd   :  { %v3198_v11 = vmul.f32 %v4451_v9, %v3196_v10 }
0x28ff   :  { %3200 = vrot.lane.b32.xlu1 %v3198_v11, %s4564_s19 }
0x2971   :  { %v3201_v15 = vpop.permute.xlu1 %3200 }
0x2972   :  { %v3203_v16 = vadd.f32 %v3201_v15, %v3181_v3  ;;  %v4289_v3 = vpack.c.bf16 %v3296_v0, %v3295_v62 }
0x2974   :  { %4452 = vtanh.f32 %v3203_v16  ;;  %4290 = vmatpush3.bf16.msra.mxu1 %v4289_v3 }
0x2975   :  { %4291 = vmatprep.subr.bf16.mxu1 %v4561_v13 }
0x2978   :  { %4293 = vmatpush3.bf16.msra.mxu1 %v4292_v7 }
0x297e   :  { %v4453_v18 = vpop.eup %4452 }
0x297f   :  { %3207 = vrot.lane.b32.xlu1 %v4453_v18, %s4565_s4 }
0x29cc   :  { %v3150_v17 = vpop.f32.mrb[26].mxu1 }
0x29cd   :  { %v3151_v22 = vadd.f32 %v5086_v12, %v3150_v17  ;;  %v4075_v23 = vpop.f32.mrb[27].mxu1 }
0x29cf   :  { %3163 = vrot.lane.b32.xlu0 %v3151_v22, %s4564_s19  ;;  %v3155_v29 = vadd.f32 %v3154_v28, %v3151_v22 }
0x29d1   :  { %v3576_v30 = vmul.f32 -1.442695, %v3155_v29 }
0x29d3   :  { %4454 = vpow2.f32 %v3576_v30 }
0x29dd   :  { %v4455_v31 = vpop.eup %4454 }
0x29de   :  { %v3159_v33 = vadd.f32 1.0, %v4455_v31 }
0x29e0   :  { %4456 = vrcp.f32 %v3159_v33  ;;  %v3591_v33 = vld [vmem:[%s5251_s12] ss:$0 sm:$0xff] }
0x29ea   :  { %v4457_v35 = vpop.eup %4456 }
0x29eb   :  { %v3173_v43 = vsub.f32 1.0, %v4457_v35  ;;  %v3179_v32 = vmul.f32 %v4457_v35, %v3078_v1  ;;  %v3587_v1 = vld [vmem:[%s5250_s11 + $0x30] sm:$0xff] }
0x29ec   :  { %v4286_v6 = vpack.c.bf16 %v3588_v2, %v3587_v1 }
0x29ee   :  { %4287 = vmatpush3.bf16.msra.mxu0 %v4286_v6 }
0x29f1   :  { %v3208_v25 = vpop.permute.xlu1 %3207 }
0x29f2   :  { %v3210_v26 = vmul.f32 %v3208_v25, %v3205_v24 }
0x29f4   :  { %v3212_v27 = vadd.f32 %v3211_v21, %v3210_v26 }
0x29f6   :  { %3221 = vrot.lane.b32.xlu1 %v3212_v27, %s4565_s4 }
0x2a41   :  { %v3164_v36 = vpop.permute.xlu0 %3163 }
0x2a42   :  { %v3166_v12 = vmul.f32 %v4457_v35, %v3164_v36 }
0x2a44   :  { %3168 = vrot.lane.b32.xlu0 %v3166_v12, %s4564_s19 }
0x2a68   :  { %v3222_v38 = vpop.permute.xlu1 %3221 }
0x2a69   :  { %v3224_v37 = vsel %vm499_vm3, %v3222_v38, 0.0 }
0x2a6a   :  { %3225 = vadd.xlane.f32.xlu1 %v3224_v37 }
0x2ab6   :  { %v3169_v39 = vpop.permute.xlu0 %3168 }
0x2ab7   :  { %v3171_v40 = vadd.f32 %v3169_v39, %v3154_v28 }
0x2ab9   :  { %4458 = vtanh.f32 %v3171_v40 }
0x2ac3   :  { %v4459_v42 = vpop.eup %4458 }
0x2ac4   :  { %3175 = vrot.lane.b32.xlu0 %v4459_v42, %s4565_s4 }
0x2af7   :  { %v3226_v47 = vpop.xlane.xlu1 %3225 }
0x2b36   :  { %v3176_v41 = vpop.permute.xlu0 %3175 }
0x2b37   :  { %v3178_v44 = vmul.f32 %v3176_v41, %v3173_v43 }
0x2b39   :  { %v3180_v45 = vadd.f32 %v3179_v32, %v3178_v44 }
0x2b3b   :  { %3214 = vrot.lane.b32.xlu0 %v3180_v45, %s4565_s4 }
0x2bad   :  { %v3215_v46 = vpop.permute.xlu0 %3214 }
0x2bae   :  { %v3217_v34 = vsel %vm499_vm3, %v3215_v46, 0.0 }
0x2baf   :  { %3218 = vadd.xlane.f32.xlu0 %v3217_v34 }
0x2c3c   :  { %v3219_v48 = vpop.xlane.xlu0 %3218 }
0x2c3d   :  { %v3227_v49 = vadd.f32 %v3226_v47, %v3219_v48 }
0x2c3f   :  { %v3228_v50 = vmul.f32 0.015625, %v3227_v49 }
0x2c41   :  { %v3229_v51 = vsub.f32 %v3180_v45, %v3228_v50  ;;  %v3230_v52 = vsub.f32 %v3212_v27, %v3228_v50 }
0x2c43   :  { %v3231_v53 = vmul.f32 %v3229_v51, %v3229_v51  ;;  %v3239_v54 = vmul.f32 %v3230_v52, %v3230_v52 }
0x2c45   :  { %3241 = vrot.lane.b32.xlu1 %v3239_v54, %s4565_s4  ;;  %3233 = vrot.lane.b32.xlu0 %v3231_v53, %s4565_s4 }
0x2c49   :  { %3280 = vrot.lane.b32.xlu1 %v3582_v14, %s4566_s26 }
0x2cb7   :  { %v3242_v19 = vpop.permute.xlu1 %3241  ;;  %v3234_v55 = vpop.permute.xlu0 %3233 }
0x2cb8   :  { %v3244_v56 = vsel %vm499_vm3, %v3242_v19, 0.0  ;;  %v3236_v57 = vsel %vm499_vm3, %v3234_v55, 0.0 }
0x2cb9   :  { %3245 = vadd.xlane.f32.xlu1 %v3244_v56  ;;  %3237 = vadd.xlane.f32.xlu0 %v3236_v57 }
0x2cbb   :  { %v3281_v8 = vpop.permute.xlu1 %3280 }
0x2cca   :  { %3291 = vrot.lane.b32.xlu1 %v3584_v58, %s4566_s26 }
0x2ccf   :  { %3258 = vrot.lane.b32.xlu0 %v3579_v20, %s4566_s26 }
0x2cd3   :  { %3268 = vrot.lane.b32.xlu0 %v3580_v59, %s4566_s26 }
0x2d46   :  { %v3246_v9 = vpop.xlane.xlu1 %3245  ;;  %v3238_v10 = vpop.xlane.xlu0 %3237 }
0x2d47   :  { %v3247_v11 = vadd.f32 %v3246_v9, %v3238_v10 }
0x2d49   :  { %v3248_v15 = vmul.f32 0.015625, %v3247_v11 }
0x2d4a   :  { %v3259_v18 = vpop.permute.xlu0 %3258  ;;  %v3292_v24 = vpop.permute.xlu1 %3291 }
0x2d4b   :  { %v3249_v16 = vadd.f32 1e-05, %v3248_v15 }
0x2d4d   :  { %4460 = vrsqrt.f32 %v3249_v16 }
0x2d4e   :  { %v3269_v25 = vpop.permute.xlu0 %3268 }
0x2d57   :  { %v4461_v17 = vpop.eup %4460 }
0x2d58   :  { %v3251_v22 = vmul.f32 %v4461_v17, %v3229_v51  ;;  %v3272_v23 = vmul.f32 %v4461_v17, %v3230_v52 }
0x2d5a   :  { %v3261_v21 = vmul.f32 %v3259_v18, %v3251_v22  ;;  %v3283_v26 = vmul.f32 %v3281_v8, %v3272_v23 }
0x2d5c   :  { %v3294_v27 = vadd.f32 %v3292_v24, %v3283_v26  ;;  %v3271_v28 = vadd.f32 %v3269_v25, %v3261_v21 }
0x2d5e   :  { %3305 = vrot.lane.b32.xlu0 %v3294_v27, %s4565_s4  ;;  %3380 = vrot.lane.b32.xlu1 %v3271_v28, %s4565_s4  ;;  %s4528_s4 = scalar_lea.vmem %s3472_s8, 32 }
0x2d5f   :  { %p4529_p10 = scmp.ne.s32.totalorder %s3472_s8, %s4528_s4  ;;  %p4534_p12 = scmp.lt.s32.totalorder %s4528_s4, %s4528_s4 }
0x2d61   :  { %p4535_p13 = por %p4534_p12, %p4533_p11 }
0x2d63   :  { %p4536_p0 = pnand %p4535_p13, %p4529_p10 }
0x2dd0   :  { %v3381_v13 = vpop.permute.xlu1 %3380  ;;  %v3306_v29 = vpop.permute.xlu0 %3305 }
0x2dd1   :  { %4085 = vmatmul.mubr.msk.f32.vlgmr.msra.gmra.mrb[28].mxu0 %vm289_vm4, %v3306_v29  ;;  %4096 = vmatmul.mubr.msk.f32.vlgmr.msra.gmra.mrb[28].mxu1 %vm289_vm4, %v3381_v13 }
0x2ea4   :  { %v3375_v30 = vpop.f32.mrb[28].mxu0  ;;  %v3450_v31 = vpop.f32.mrb[28].mxu1 }
0x2ea5   :  { %v3451_v35 = vadd.f32 %v3450_v31, %v3375_v30  ;;  %v4086_v36 = vpop.f32.mrb[29].mxu0  ;;  %v4097_v12 = vpop.f32.mrb[29].mxu1 }
0x2ea7   :  { %v3461_v38 = vadd.f32 %v3591_v33, %v3451_v35 }
0x2ea9   :  { %v3462_v37 = vmax.f32 %v3461_v38, 0.0 }
0x2eab   :  { %3464 = vst.msk [vmem:[#allocation10] sm:$0x3] %vm3463_vm5, %v3462_v37 }
0x2eac   :  { %4539 = shalt.err (!%p4536_p0)
}
0x2ead   :  { %s4540_s12 = scalar_lea.hbm %s5252_s13, 32 }
0x2eae   :  { %p4541_p1 = scmp.ne.s32.totalorder %s5252_s13, %s4540_s12  ;;  %p4544_p2 = scmp.lt.u32.totalorder %s4540_s12, %s5252_s13 }
0x2eb0   :  { %p4546_p3 = pnand %p4544_p2, %p4541_p1 }
0x2eb2   :  { %4549 = shalt.err (!%p4546_p3)
}
0x2eb3   :  { %3474 = dma.vmem_to_hbm [thread:$0]  %s3472_s8, 32, %s5252_s13, [#allocation6]  }
0x2eb4   :  { %4554 = dma.done.wait [#allocation6], 32  }
0x2eb5   :  { %4555 = vsyncadd [#allocation6], 4294967264 }
0x2eb6   :  { %3478 = vsyncpa [#allocation5], 1 }
0x2eb7   :  { %3479 = vsyncpa [#allocation8], 1 }
0x2eb8   :  { %3480 = vsyncpa [#allocation6], 1 }

</bundles_post_ra>
